<compile_context>
chip_gen: v7x
topology: tpu7x:2x2x1
jax: 0.10.0
libtpu: 0.0.40
codegen_flags: <defaults>
</compile_context>

<pallas_src>
import jax
import jax.numpy as jnp
from jax import lax
from jax.experimental import pallas as pl
from jax.experimental.pallas import tpu as pltpu

H = 100            # torch LSTM hidden size (per direction)
HP = 128           # lane-padded hidden size used inside the kernel
IN = 768           # LSTM input feature size
G = 4 * HP         # padded gate width per direction (gate order: i, f, o, g)
FEAT = 770         # hiddens feature dim: [0:768]=lstm input, 768=score, 769=pos
NUM_HOSTS = 16


def _vmem():
    # tiny full-array blocks resident in VMEM
    return pl.BlockSpec(memory_space=pltpu.MemorySpace.VMEM)


# ----------------------------------------------------------------------------
# Single fused kernel: biLSTM + sentence_lin + aggregation/BCE loss
# ----------------------------------------------------------------------------
def _make_fused_kernel(S, B):
    B2 = 2 * B

    def kernel(x_ref, wihT_ref, bias_ref, whhbd_ref,
               w1T_ref, b1_ref, w2T_ref, b2_ref,
               scores_ref, pos_ref, host_ref, label_ref,
               doc_ref, out_ref, loss_ref,
               pg_ref, hf_ref, hb_ref):
        # ---- hoisted input projection: all pre-gates in one MXU call -------
        pre = jnp.dot(x_ref[...], wihT_ref[...],
                      preferred_element_type=jnp.float32) + bias_ref[...]
        # pg_ref[t]: rows 0:B  = fwd pre-gates for time t
        #            rows B:2B = bwd pre-gates for time S-1-t
        for t in range(S):
            pf = pre[t * B:(t + 1) * B, :G]
            pb = pre[(S - 1 - t) * B:(S - t) * B, G:]
            pg_ref[t] = jnp.concatenate([pf, pb], axis=0)

        whh_bd = whhbd_ref[...]                          # (2*HP, 4*HP)
        row_ids = lax.broadcasted_iota(jnp.int32, (B2, 2 * HP), 0)
        col_ids = lax.broadcasted_iota(jnp.int32, (B2, 2 * HP), 1)
        # block-diag state mask: fwd rows keep cols [0:HP), bwd rows [HP:2HP)
        dir_mask = jnp.where((row_ids < B) == (col_ids < HP),
                             1.0, 0.0).astype(jnp.float32)

        def step(t, carry):
            h2, c = carry                                # (2B, 2HP), (2B, HP)
            gates = pg_ref[t] + jnp.dot(h2, whh_bd,
                                        preferred_element_type=jnp.float32)
            sig = jax.nn.sigmoid(gates[:, :3 * HP])      # i | f | o (contiguous)
            i_g = sig[:, :HP]
            f_g = sig[:, HP:2 * HP]
            o_g = sig[:, 2 * HP:3 * HP]
            g_g = jnp.tanh(gates[:, 3 * HP:])
            c_new = f_g * c + i_g * g_g
            h_new = o_g * jnp.tanh(c_new)                # (2B, HP)
            hf_ref[t] = h_new[:B]                        # fwd hidden at time t
            hb_ref[t] = h_new[B:]                        # bwd hidden at time S-1-t
            h2_new = jnp.concatenate([h_new, h_new], axis=-1) * dir_mask
            return h2_new, c_new

        lax.fori_loop(0, S, step,
                      (jnp.zeros((B2, 2 * HP), jnp.float32),
                       jnp.zeros((B2, HP), jnp.float32)),
                      unroll=True)

        # ---- sentence_lin (dead value in the torch forward; kept for parity)
        rows = []
        for u in range(S):
            rows.append(jnp.concatenate([hf_ref[u], hb_ref[S - 1 - u]],
                                        axis=-1))        # (B, 2HP), seq time u
        d2h = jnp.concatenate(rows, axis=0)              # (S*B, 2HP)
        hmid = jnp.maximum(
            jnp.dot(d2h, w1T_ref[...], preferred_element_type=jnp.float32)
            + b1_ref[...], 0.0)
        doc_ref[...] = jnp.dot(hmid, w2T_ref[...],
                               preferred_element_type=jnp.float32) + b2_ref[...]

        # ---- score aggregation + BCEWithLogits loss -------------------------
        prod = pos_ref[...] * scores_ref[...]            # (B, S)
        per_doc = jnp.mean(prod, axis=-1, keepdims=True)  # (B, 1)
        logit = jnp.mean(per_doc * host_ref[...])         # scalar
        y = jnp.maximum(label_ref[0, 0], 0.0)             # labels.clamp(min=0)
        # stable BCEWithLogits: max(x,0) - x*y + log(1 + exp(-|x|))
        loss = (jnp.maximum(logit, 0.0) - logit * y
                + jnp.log1p(jnp.exp(-jnp.abs(logit))))
        out_ref[...] = jnp.broadcast_to(logit, (1, 1))
        loss_ref[...] = jnp.broadcast_to(loss, (1, 1))

    return kernel


# ----------------------------------------------------------------------------
# Wrapper-side weight prep: fold biases, pad H->HP, reorder gates, transpose
# ----------------------------------------------------------------------------
def _prep_lstm_dir(wih, whh, bih, bhh):
    b = bih + bhh
    wih_blocks, whh_blocks, b_blocks = [], [], []
    for gidx in (0, 1, 3, 2):                            # (i, f, g, o) -> (i, f, o, g)
        sl = slice(gidx * H, (gidx + 1) * H)
        wih_blocks.append(jnp.pad(wih[sl], ((0, HP - H), (0, 0))))       # (HP, IN)
        whh_blocks.append(jnp.pad(whh[sl], ((0, HP - H), (0, HP - H))))  # (HP, HP)
        b_blocks.append(jnp.pad(b[sl], (0, HP - H)))                     # (HP,)
    wihT = jnp.concatenate(wih_blocks, axis=0).T         # (IN, 4*HP)
    whhT = jnp.concatenate(whh_blocks, axis=0).T         # (HP, 4*HP)
    bias = jnp.concatenate(b_blocks, axis=0)             # (4*HP,)
    return wihT, whhT, bias


# ----------------------------------------------------------------------------
# Parameter init (deterministic, shapes match the torch module)
# ----------------------------------------------------------------------------
def init_params(key):
    ks = jax.random.split(key, 12)

    def u(k, shape, scale):
        return jax.random.uniform(k, shape, jnp.float32, -scale, scale)

    s_lstm = 1.0 / jnp.sqrt(jnp.float32(H))
    return dict(
        wih_f=u(ks[0], (4 * H, IN), s_lstm), whh_f=u(ks[1], (4 * H, H), s_lstm),
        bih_f=u(ks[2], (4 * H,), s_lstm),    bhh_f=u(ks[3], (4 * H,), s_lstm),
        wih_b=u(ks[4], (4 * H, IN), s_lstm), whh_b=u(ks[5], (4 * H, H), s_lstm),
        bih_b=u(ks[6], (4 * H,), s_lstm),    bhh_b=u(ks[7], (4 * H,), s_lstm),
        host_emb=jax.random.normal(ks[8], (NUM_HOSTS, 1), jnp.float32),
        w1=u(ks[9], (100, 200), 1.0 / jnp.sqrt(jnp.float32(200))),
        b1=jnp.zeros((100,), jnp.float32),
        w2=u(ks[10], (1, 100), 0.1),
        b2=jnp.zeros((1,), jnp.float32),
        # self.host (Linear(10,10)->ReLU->Linear(10,1)) is never called in
        # forward(), so no parameters are materialized for it.
    )


# ----------------------------------------------------------------------------
# Forward (matches Model.forward): returns (output, loss)
# ----------------------------------------------------------------------------
def forward(params, hiddens, mt5_scores, host_ids, labels):
    del mt5_scores  # unused in the torch forward as well
    B, S, _ = hiddens.shape

    # LSTM weights: padded / reordered / folded (cheap, done in XLA)
    wihT_f, whhT_f, b_f = _prep_lstm_dir(params["wih_f"], params["whh_f"],
                                         params["bih_f"], params["bhh_f"])
    wihT_b, whhT_b, b_b = _prep_lstm_dir(params["wih_b"], params["whh_b"],
                                         params["bih_b"], params["bhh_b"])
    wihT_cat = jnp.concatenate([wihT_f, wihT_b], axis=1)        # (768, 2*4*HP)
    bias_cat = jnp.concatenate([b_f, b_b]).reshape(1, 2 * G)    # (1, 1024)
    whh_bd = jnp.concatenate([whhT_f, whhT_b], axis=0)          # (2*HP, 4*HP)

    # sentence_lin weights, padded to the 128-lane hidden layout
    w1T = params["w1"].T                                        # (200, 100)
    w1T_p = jnp.zeros((2 * HP, HP), jnp.float32)
    w1T_p = w1T_p.at[:H, :H].set(w1T[:H])
    w1T_p = w1T_p.at[HP:HP + H, :H].set(w1T[H:])
    b1_p = jnp.pad(params["b1"], (0, HP - H)).reshape(1, HP)
    w2T_p = jnp.pad(params["w2"].T, ((0, HP - H), (0, 0)))      # (HP, 1)
    b2_p = params["b2"].reshape(1, 1)

    # inputs
    x_tm = jnp.transpose(hiddens[:, :, :IN], (1, 0, 2)
                         ).reshape(S * B, IN).astype(jnp.float32)   # time-major
    sentence_scores = hiddens[:, :, IN].astype(jnp.float32)         # (B, S)
    sentence_pos = hiddens[:, :, IN + 1].astype(jnp.float32)        # (B, S)
    # TODO(synk): host_emb lookup is a tiny (B,) gather; done as JAX glue
    # rather than a dedicated DMA-gather kernel.
    host_score = params["host_emb"][host_ids, 0].reshape(B, 1)      # (B, 1)
    label_arr = jnp.asarray(labels, jnp.float32).reshape(1, 1)

    kernel = _make_fused_kernel(S, B)
    doc, out, loss = pl.pallas_call(
        kernel,
        out_shape=(jax.ShapeDtypeStruct((S * B, 1), jnp.float32),   # doc_score
                   jax.ShapeDtypeStruct((1, 1), jnp.float32),       # output
                   jax.ShapeDtypeStruct((1, 1), jnp.float32)),      # loss
        in_specs=[_vmem()] * 12,
        out_specs=(_vmem(), _vmem(), _vmem()),
        scratch_shapes=[pltpu.VMEM((S, 2 * B, G), jnp.float32),     # pre-gates
                        pltpu.VMEM((S, B, HP), jnp.float32),        # fwd hiddens
                        pltpu.VMEM((S, B, HP), jnp.float32)],       # bwd hiddens
    )(x_tm, wihT_cat, bias_cat, whh_bd,
      w1T_p, b1_p, w2T_p, b2_p,
      sentence_scores, sentence_pos, host_score, label_arr)

    del doc  # doc_score is computed but unused, mirroring the torch forward
    return out[0, 0], loss[0, 0]


if __name__ == "__main__":
    key = jax.random.PRNGKey(0)
    kp, kh, km, ki = jax.random.split(key, 4)

    B, S = 2, 8
    params = init_params(kp)
    hiddens = jax.random.normal(kh, (B, S, FEAT), jnp.float32)
    mt5_scores = jax.random.normal(km, (B, S), jnp.float32)     # unused, as in torch
    host_ids = jax.random.randint(ki, (B,), 0, NUM_HOSTS)
    labels = jnp.float32(1.0)                                   # 0-dim target

    out, loss = jax.jit(forward)(params, hiddens, mt5_scores, host_ids, labels)
    jax.block_until_ready((out, loss))
    print("KERNEL_OK")
</pallas_src>

<mosaic_0001>
module attributes {stable_mosaic.version = 11 : i64} {
  func.func @kernel(%arg0: memref<16x768xf32, #tpu.memory_space<vmem>>, %arg1: memref<768x1024xf32, #tpu.memory_space<vmem>>, %arg2: memref<1x1024xf32, #tpu.memory_space<vmem>>, %arg3: memref<256x512xf32, #tpu.memory_space<vmem>>, %arg4: memref<256x128xf32, #tpu.memory_space<vmem>>, %arg5: memref<1x128xf32, #tpu.memory_space<vmem>>, %arg6: memref<128x1xf32, #tpu.memory_space<vmem>>, %arg7: memref<1x1xf32, #tpu.memory_space<vmem>>, %arg8: memref<2x8xf32, #tpu.memory_space<vmem>>, %arg9: memref<2x8xf32, #tpu.memory_space<vmem>>, %arg10: memref<2x1xf32, #tpu.memory_space<vmem>>, %arg11: memref<1x1xf32, #tpu.memory_space<vmem>>, %arg12: memref<16x1xf32, #tpu.memory_space<vmem>>, %arg13: memref<1x1xf32, #tpu.memory_space<vmem>>, %arg14: memref<1x1xf32, #tpu.memory_space<vmem>>, %arg15: memref<8x4x512xf32, #tpu.memory_space<vmem>>, %arg16: memref<8x2x128xf32, #tpu.memory_space<vmem>>, %arg17: memref<8x2x128xf32, #tpu.memory_space<vmem>>) attributes {dimension_semantics = [], scalar_prefetch = 0 : i64, scratch_operands = 3 : i64, tpu.core_type = #tpu.core_type<tc>} {
    %c0 = arith.constant 0 : index
    %c0_0 = arith.constant 0 : index
    %0 = vector.load %arg0[%c0, %c0_0] : memref<16x768xf32, #tpu.memory_space<vmem>>, vector<16x768xf32>
    %c0_1 = arith.constant 0 : index
    %c0_2 = arith.constant 0 : index
    %1 = vector.load %arg1[%c0_1, %c0_2] : memref<768x1024xf32, #tpu.memory_space<vmem>>, vector<768x1024xf32>
    %cst = arith.constant dense<0.000000e+00> : vector<16x1024xf32>
    %2 = tpu.matmul %0, %1, %cst {dimension_numbers = #tpu.dot_dimension_numbers<[1], [0], [0], [1], [0, 0, 1, 1], [], []>} : vector<16x768xf32>, vector<768x1024xf32>, vector<16x1024xf32> -> vector<16x1024xf32>
    %c0_3 = arith.constant 0 : index
    %c0_4 = arith.constant 0 : index
    %3 = vector.load %arg2[%c0_3, %c0_4] : memref<1x1024xf32, #tpu.memory_space<vmem>>, vector<1x1024xf32>
    %4 = vector.broadcast %3 : vector<1x1024xf32> to vector<16x1024xf32>
    %5 = arith.addf %2, %4 : vector<16x1024xf32>
    %6 = vector.extract_strided_slice %5 {offsets = [0, 0], sizes = [2, 512], strides = [1, 1]} : vector<16x1024xf32> to vector<2x512xf32>
    %7 = vector.extract_strided_slice %5 {offsets = [14, 512], sizes = [2, 512], strides = [1, 1]} : vector<16x1024xf32> to vector<2x512xf32>
    %8 = tpu.concatenate %6, %7 in 0 : vector<2x512xf32>, vector<2x512xf32> -> vector<4x512xf32>
    %c0_5 = arith.constant 0 : index
    %c0_6 = arith.constant 0 : index
    %c0_7 = arith.constant 0 : index
    %9 = vector.load %arg15[%c0_5, %c0_6, %c0_7] : memref<8x4x512xf32, #tpu.memory_space<vmem>>, vector<1x4x512xf32>
    %10 = vector.shape_cast %9 : vector<1x4x512xf32> to vector<4x512xf32>
    %11 = vector.shape_cast %8 : vector<4x512xf32> to vector<1x4x512xf32>
    tpu.vector_store %arg15[%c0_5, %c0_6, %c0_7], %11 {strides = array<i32>} : memref<8x4x512xf32, #tpu.memory_space<vmem>>, vector<1x4x512xf32>,
    %12 = vector.extract_strided_slice %5 {offsets = [2, 0], sizes = [2, 512], strides = [1, 1]} : vector<16x1024xf32> to vector<2x512xf32>
    %13 = vector.extract_strided_slice %5 {offsets = [12, 512], sizes = [2, 512], strides = [1, 1]} : vector<16x1024xf32> to vector<2x512xf32>
    %14 = tpu.concatenate %12, %13 in 0 : vector<2x512xf32>, vector<2x512xf32> -> vector<4x512xf32>
    %c1 = arith.constant 1 : index
    %c0_8 = arith.constant 0 : index
    %c0_9 = arith.constant 0 : index
    %15 = vector.load %arg15[%c1, %c0_8, %c0_9] : memref<8x4x512xf32, #tpu.memory_space<vmem>>, vector<1x4x512xf32>
    %16 = vector.shape_cast %15 : vector<1x4x512xf32> to vector<4x512xf32>
    %17 = vector.shape_cast %14 : vector<4x512xf32> to vector<1x4x512xf32>
    tpu.vector_store %arg15[%c1, %c0_8, %c0_9], %17 {strides = array<i32>} : memref<8x4x512xf32, #tpu.memory_space<vmem>>, vector<1x4x512xf32>,
    %18 = vector.extract_strided_slice %5 {offsets = [4, 0], sizes = [2, 512], strides = [1, 1]} : vector<16x1024xf32> to vector<2x512xf32>
    %19 = vector.extract_strided_slice %5 {offsets = [10, 512], sizes = [2, 512], strides = [1, 1]} : vector<16x1024xf32> to vector<2x512xf32>
    %20 = tpu.concatenate %18, %19 in 0 : vector<2x512xf32>, vector<2x512xf32> -> vector<4x512xf32>
    %c2 = arith.constant 2 : index
    %c0_10 = arith.constant 0 : index
    %c0_11 = arith.constant 0 : index
    %21 = vector.load %arg15[%c2, %c0_10, %c0_11] : memref<8x4x512xf32, #tpu.memory_space<vmem>>, vector<1x4x512xf32>
    %22 = vector.shape_cast %21 : vector<1x4x512xf32> to vector<4x512xf32>
    %23 = vector.shape_cast %20 : vector<4x512xf32> to vector<1x4x512xf32>
    tpu.vector_store %arg15[%c2, %c0_10, %c0_11], %23 {strides = array<i32>} : memref<8x4x512xf32, #tpu.memory_space<vmem>>, vector<1x4x512xf32>,
    %24 = vector.extract_strided_slice %5 {offsets = [6, 0], sizes = [2, 512], strides = [1, 1]} : vector<16x1024xf32> to vector<2x512xf32>
    %25 = vector.extract_strided_slice %5 {offsets = [8, 512], sizes = [2, 512], strides = [1, 1]} : vector<16x1024xf32> to vector<2x512xf32>
    %26 = tpu.concatenate %24, %25 in 0 : vector<2x512xf32>, vector<2x512xf32> -> vector<4x512xf32>
    %c3 = arith.constant 3 : index
    %c0_12 = arith.constant 0 : index
    %c0_13 = arith.constant 0 : index
    %27 = vector.load %arg15[%c3, %c0_12, %c0_13] : memref<8x4x512xf32, #tpu.memory_space<vmem>>, vector<1x4x512xf32>
    %28 = vector.shape_cast %27 : vector<1x4x512xf32> to vector<4x512xf32>
    %29 = vector.shape_cast %26 : vector<4x512xf32> to vector<1x4x512xf32>
    tpu.vector_store %arg15[%c3, %c0_12, %c0_13], %29 {strides = array<i32>} : memref<8x4x512xf32, #tpu.memory_space<vmem>>, vector<1x4x512xf32>,
    %30 = vector.extract_strided_slice %5 {offsets = [8, 0], sizes = [2, 512], strides = [1, 1]} : vector<16x1024xf32> to vector<2x512xf32>
    %31 = vector.extract_strided_slice %5 {offsets = [6, 512], sizes = [2, 512], strides = [1, 1]} : vector<16x1024xf32> to vector<2x512xf32>
    %32 = tpu.concatenate %30, %31 in 0 : vector<2x512xf32>, vector<2x512xf32> -> vector<4x512xf32>
    %c4 = arith.constant 4 : index
    %c0_14 = arith.constant 0 : index
    %c0_15 = arith.constant 0 : index
    %33 = vector.load %arg15[%c4, %c0_14, %c0_15] : memref<8x4x512xf32, #tpu.memory_space<vmem>>, vector<1x4x512xf32>
    %34 = vector.shape_cast %33 : vector<1x4x512xf32> to vector<4x512xf32>
    %35 = vector.shape_cast %32 : vector<4x512xf32> to vector<1x4x512xf32>
    tpu.vector_store %arg15[%c4, %c0_14, %c0_15], %35 {strides = array<i32>} : memref<8x4x512xf32, #tpu.memory_space<vmem>>, vector<1x4x512xf32>,
    %36 = vector.extract_strided_slice %5 {offsets = [10, 0], sizes = [2, 512], strides = [1, 1]} : vector<16x1024xf32> to vector<2x512xf32>
    %37 = vector.extract_strided_slice %5 {offsets = [4, 512], sizes = [2, 512], strides = [1, 1]} : vector<16x1024xf32> to vector<2x512xf32>
    %38 = tpu.concatenate %36, %37 in 0 : vector<2x512xf32>, vector<2x512xf32> -> vector<4x512xf32>
    %c5 = arith.constant 5 : index
    %c0_16 = arith.constant 0 : index
    %c0_17 = arith.constant 0 : index
    %39 = vector.load %arg15[%c5, %c0_16, %c0_17] : memref<8x4x512xf32, #tpu.memory_space<vmem>>, vector<1x4x512xf32>
    %40 = vector.shape_cast %39 : vector<1x4x512xf32> to vector<4x512xf32>
    %41 = vector.shape_cast %38 : vector<4x512xf32> to vector<1x4x512xf32>
    tpu.vector_store %arg15[%c5, %c0_16, %c0_17], %41 {strides = array<i32>} : memref<8x4x512xf32, #tpu.memory_space<vmem>>, vector<1x4x512xf32>,
    %42 = vector.extract_strided_slice %5 {offsets = [12, 0], sizes = [2, 512], strides = [1, 1]} : vector<16x1024xf32> to vector<2x512xf32>
    %43 = vector.extract_strided_slice %5 {offsets = [2, 512], sizes = [2, 512], strides = [1, 1]} : vector<16x1024xf32> to vector<2x512xf32>
    %44 = tpu.concatenate %42, %43 in 0 : vector<2x512xf32>, vector<2x512xf32> -> vector<4x512xf32>
    %c6 = arith.constant 6 : index
    %c0_18 = arith.constant 0 : index
    %c0_19 = arith.constant 0 : index
    %45 = vector.load %arg15[%c6, %c0_18, %c0_19] : memref<8x4x512xf32, #tpu.memory_space<vmem>>, vector<1x4x512xf32>
    %46 = vector.shape_cast %45 : vector<1x4x512xf32> to vector<4x512xf32>
    %47 = vector.shape_cast %44 : vector<4x512xf32> to vector<1x4x512xf32>
    tpu.vector_store %arg15[%c6, %c0_18, %c0_19], %47 {strides = array<i32>} : memref<8x4x512xf32, #tpu.memory_space<vmem>>, vector<1x4x512xf32>,
    %48 = vector.extract_strided_slice %5 {offsets = [14, 0], sizes = [2, 512], strides = [1, 1]} : vector<16x1024xf32> to vector<2x512xf32>
    %49 = vector.extract_strided_slice %5 {offsets = [0, 512], sizes = [2, 512], strides = [1, 1]} : vector<16x1024xf32> to vector<2x512xf32>
    %50 = tpu.concatenate %48, %49 in 0 : vector<2x512xf32>, vector<2x512xf32> -> vector<4x512xf32>
    %c7 = arith.constant 7 : index
    %c0_20 = arith.constant 0 : index
    %c0_21 = arith.constant 0 : index
    %51 = vector.load %arg15[%c7, %c0_20, %c0_21] : memref<8x4x512xf32, #tpu.memory_space<vmem>>, vector<1x4x512xf32>
    %52 = vector.shape_cast %51 : vector<1x4x512xf32> to vector<4x512xf32>
    %53 = vector.shape_cast %50 : vector<4x512xf32> to vector<1x4x512xf32>
    tpu.vector_store %arg15[%c7, %c0_20, %c0_21], %53 {strides = array<i32>} : memref<8x4x512xf32, #tpu.memory_space<vmem>>, vector<1x4x512xf32>,
    %c0_22 = arith.constant 0 : index
    %c0_23 = arith.constant 0 : index
    %54 = vector.load %arg3[%c0_22, %c0_23] : memref<256x512xf32, #tpu.memory_space<vmem>>, vector<256x512xf32>
    %55 = tpu.iota {dimensions = array<i32: 0>} : vector<4x256xi32>
    %56 = tpu.iota {dimensions = array<i32: 1>} : vector<4x256xi32>
    %c2_i32 = arith.constant 2 : i32
    %57 = vector.broadcast %c2_i32 : i32 to vector<4x256xi32>
    %58 = arith.cmpi slt, %55, %57 : vector<4x256xi32>
    %c128_i32 = arith.constant 128 : i32
    %59 = vector.broadcast %c128_i32 : i32 to vector<4x256xi32>
    %60 = arith.cmpi slt, %56, %59 : vector<4x256xi32>
    %61 = arith.xori %58, %60 : vector<4x256xi1>
    %cst_24 = arith.constant dense<true> : vector<4x256xi1>
    %62 = arith.xori %61, %cst_24 : vector<4x256xi1>
    %cst_25 = arith.constant 1.000000e+00 : f32
    %cst_26 = arith.constant 0.000000e+00 : f32
    %63 = vector.broadcast %cst_25 : f32 to vector<4x256xf32>
    %64 = vector.broadcast %cst_26 : f32 to vector<4x256xf32>
    %65 = arith.select %62, %63, %64 : vector<4x256xi1>, vector<4x256xf32>
    %cst_27 = arith.constant 0.000000e+00 : f32
    %66 = vector.broadcast %cst_27 : f32 to vector<4x256xf32>
    %cst_28 = arith.constant 0.000000e+00 : f32
    %67 = vector.broadcast %cst_28 : f32 to vector<4x128xf32>
    %c0_i32 = arith.constant 0 : i32
    %68 = arith.index_cast %c0_i32 : i32 to index
    %c0_29 = arith.constant 0 : index
    %c0_30 = arith.constant 0 : index
    %69 = vector.load %arg15[%68, %c0_29, %c0_30] : memref<8x4x512xf32, #tpu.memory_space<vmem>>, vector<1x4x512xf32>
    %70 = vector.shape_cast %69 : vector<1x4x512xf32> to vector<4x512xf32>
    %cst_31 = arith.constant dense<0.000000e+00> : vector<4x512xf32>
    %71 = tpu.matmul %66, %54, %cst_31 {dimension_numbers = #tpu.dot_dimension_numbers<[1], [0], [0], [1], [0, 0, 1, 1], [], []>} : vector<4x256xf32>, vector<256x512xf32>, vector<4x512xf32> -> vector<4x512xf32>
    %72 = arith.addf %70, %71 : vector<4x512xf32>
    %73 = vector.extract_strided_slice %72 {offsets = [0, 0], sizes = [4, 384], strides = [1, 1]} : vector<4x512xf32> to vector<4x384xf32>
    %74 = arith.negf %73 : vector<4x384xf32>
    %75 = math.exp %74 : vector<4x384xf32>
    %cst_32 = arith.constant 1.000000e+00 : f32
    %76 = vector.broadcast %cst_32 : f32 to vector<4x384xf32>
    %77 = arith.addf %76, %75 : vector<4x384xf32>
    %78 = arith.divf %76, %77 : vector<4x384xf32>
    %79 = vector.extract_strided_slice %78 {offsets = [0, 0], sizes = [4, 128], strides = [1, 1]} : vector<4x384xf32> to vector<4x128xf32>
    %80 = vector.extract_strided_slice %78 {offsets = [0, 128], sizes = [4, 128], strides = [1, 1]} : vector<4x384xf32> to vector<4x128xf32>
    %81 = vector.extract_strided_slice %78 {offsets = [0, 256], sizes = [4, 128], strides = [1, 1]} : vector<4x384xf32> to vector<4x128xf32>
    %82 = vector.extract_strided_slice %72 {offsets = [0, 384], sizes = [4, 128], strides = [1, 1]} : vector<4x512xf32> to vector<4x128xf32>
    %83 = math.tanh %82 : vector<4x128xf32>
    %84 = arith.mulf %80, %67 : vector<4x128xf32>
    %85 = arith.mulf %79, %83 : vector<4x128xf32>
    %86 = arith.addf %84, %85 : vector<4x128xf32>
    %87 = math.tanh %86 : vector<4x128xf32>
    %88 = arith.mulf %81, %87 : vector<4x128xf32>
    %89 = vector.extract_strided_slice %88 {offsets = [0, 0], sizes = [2, 128], strides = [1, 1]} : vector<4x128xf32> to vector<2x128xf32>
    %90 = arith.index_cast %c0_i32 : i32 to index
    %c0_33 = arith.constant 0 : index
    %c0_34 = arith.constant 0 : index
    %91 = vector.load %arg16[%90, %c0_33, %c0_34] : memref<8x2x128xf32, #tpu.memory_space<vmem>>, vector<1x2x128xf32>
    %92 = vector.shape_cast %91 : vector<1x2x128xf32> to vector<2x128xf32>
    %93 = vector.shape_cast %89 : vector<2x128xf32> to vector<1x2x128xf32>
    tpu.vector_store %arg16[%90, %c0_33, %c0_34], %93 {strides = array<i32>} : memref<8x2x128xf32, #tpu.memory_space<vmem>>, vector<1x2x128xf32>,
    %94 = vector.extract_strided_slice %88 {offsets = [2, 0], sizes = [2, 128], strides = [1, 1]} : vector<4x128xf32> to vector<2x128xf32>
    %95 = arith.index_cast %c0_i32 : i32 to index
    %c0_35 = arith.constant 0 : index
    %c0_36 = arith.constant 0 : index
    %96 = vector.load %arg17[%95, %c0_35, %c0_36] : memref<8x2x128xf32, #tpu.memory_space<vmem>>, vector<1x2x128xf32>
    %97 = vector.shape_cast %96 : vector<1x2x128xf32> to vector<2x128xf32>
    %98 = vector.shape_cast %94 : vector<2x128xf32> to vector<1x2x128xf32>
    tpu.vector_store %arg17[%95, %c0_35, %c0_36], %98 {strides = array<i32>} : memref<8x2x128xf32, #tpu.memory_space<vmem>>, vector<1x2x128xf32>,
    %99 = tpu.concatenate %88, %88 in 1 : vector<4x128xf32>, vector<4x128xf32> -> vector<4x256xf32>
    %100 = arith.mulf %99, %65 : vector<4x256xf32>
    %c1_i32 = arith.constant 1 : i32
    %101 = arith.index_cast %c1_i32 : i32 to index
    %c0_37 = arith.constant 0 : index
    %c0_38 = arith.constant 0 : index
    %102 = vector.load %arg15[%101, %c0_37, %c0_38] : memref<8x4x512xf32, #tpu.memory_space<vmem>>, vector<1x4x512xf32>
    %103 = vector.shape_cast %102 : vector<1x4x512xf32> to vector<4x512xf32>
    %cst_39 = arith.constant dense<0.000000e+00> : vector<4x512xf32>
    %104 = tpu.matmul %100, %54, %cst_39 {dimension_numbers = #tpu.dot_dimension_numbers<[1], [0], [0], [1], [0, 0, 1, 1], [], []>} : vector<4x256xf32>, vector<256x512xf32>, vector<4x512xf32> -> vector<4x512xf32>
    %105 = arith.addf %103, %104 : vector<4x512xf32>
    %106 = vector.extract_strided_slice %105 {offsets = [0, 0], sizes = [4, 384], strides = [1, 1]} : vector<4x512xf32> to vector<4x384xf32>
    %107 = arith.negf %106 : vector<4x384xf32>
    %108 = math.exp %107 : vector<4x384xf32>
    %cst_40 = arith.constant 1.000000e+00 : f32
    %109 = vector.broadcast %cst_40 : f32 to vector<4x384xf32>
    %110 = arith.addf %109, %108 : vector<4x384xf32>
    %111 = arith.divf %109, %110 : vector<4x384xf32>
    %112 = vector.extract_strided_slice %111 {offsets = [0, 0], sizes = [4, 128], strides = [1, 1]} : vector<4x384xf32> to vector<4x128xf32>
    %113 = vector.extract_strided_slice %111 {offsets = [0, 128], sizes = [4, 128], strides = [1, 1]} : vector<4x384xf32> to vector<4x128xf32>
    %114 = vector.extract_strided_slice %111 {offsets = [0, 256], sizes = [4, 128], strides = [1, 1]} : vector<4x384xf32> to vector<4x128xf32>
    %115 = vector.extract_strided_slice %105 {offsets = [0, 384], sizes = [4, 128], strides = [1, 1]} : vector<4x512xf32> to vector<4x128xf32>
    %116 = math.tanh %115 : vector<4x128xf32>
    %117 = arith.mulf %113, %86 : vector<4x128xf32>
    %118 = arith.mulf %112, %116 : vector<4x128xf32>
    %119 = arith.addf %117, %118 : vector<4x128xf32>
    %120 = math.tanh %119 : vector<4x128xf32>
    %121 = arith.mulf %114, %120 : vector<4x128xf32>
    %122 = vector.extract_strided_slice %121 {offsets = [0, 0], sizes = [2, 128], strides = [1, 1]} : vector<4x128xf32> to vector<2x128xf32>
    %123 = arith.index_cast %c1_i32 : i32 to index
    %c0_41 = arith.constant 0 : index
    %c0_42 = arith.constant 0 : index
    %124 = vector.load %arg16[%123, %c0_41, %c0_42] : memref<8x2x128xf32, #tpu.memory_space<vmem>>, vector<1x2x128xf32>
    %125 = vector.shape_cast %124 : vector<1x2x128xf32> to vector<2x128xf32>
    %126 = vector.shape_cast %122 : vector<2x128xf32> to vector<1x2x128xf32>
    tpu.vector_store %arg16[%123, %c0_41, %c0_42], %126 {strides = array<i32>} : memref<8x2x128xf32, #tpu.memory_space<vmem>>, vector<1x2x128xf32>,
    %127 = vector.extract_strided_slice %121 {offsets = [2, 0], sizes = [2, 128], strides = [1, 1]} : vector<4x128xf32> to vector<2x128xf32>
    %128 = arith.index_cast %c1_i32 : i32 to index
    %c0_43 = arith.constant 0 : index
    %c0_44 = arith.constant 0 : index
    %129 = vector.load %arg17[%128, %c0_43, %c0_44] : memref<8x2x128xf32, #tpu.memory_space<vmem>>, vector<1x2x128xf32>
    %130 = vector.shape_cast %129 : vector<1x2x128xf32> to vector<2x128xf32>
    %131 = vector.shape_cast %127 : vector<2x128xf32> to vector<1x2x128xf32>
    tpu.vector_store %arg17[%128, %c0_43, %c0_44], %131 {strides = array<i32>} : memref<8x2x128xf32, #tpu.memory_space<vmem>>, vector<1x2x128xf32>,
    %132 = tpu.concatenate %121, %121 in 1 : vector<4x128xf32>, vector<4x128xf32> -> vector<4x256xf32>
    %133 = arith.mulf %132, %65 : vector<4x256xf32>
    %c2_i32_45 = arith.constant 2 : i32
    %134 = arith.index_cast %c2_i32_45 : i32 to index
    %c0_46 = arith.constant 0 : index
    %c0_47 = arith.constant 0 : index
    %135 = vector.load %arg15[%134, %c0_46, %c0_47] : memref<8x4x512xf32, #tpu.memory_space<vmem>>, vector<1x4x512xf32>
    %136 = vector.shape_cast %135 : vector<1x4x512xf32> to vector<4x512xf32>
    %cst_48 = arith.constant dense<0.000000e+00> : vector<4x512xf32>
    %137 = tpu.matmul %133, %54, %cst_48 {dimension_numbers = #tpu.dot_dimension_numbers<[1], [0], [0], [1], [0, 0, 1, 1], [], []>} : vector<4x256xf32>, vector<256x512xf32>, vector<4x512xf32> -> vector<4x512xf32>
    %138 = arith.addf %136, %137 : vector<4x512xf32>
    %139 = vector.extract_strided_slice %138 {offsets = [0, 0], sizes = [4, 384], strides = [1, 1]} : vector<4x512xf32> to vector<4x384xf32>
    %140 = arith.negf %139 : vector<4x384xf32>
    %141 = math.exp %140 : vector<4x384xf32>
    %cst_49 = arith.constant 1.000000e+00 : f32
    %142 = vector.broadcast %cst_49 : f32 to vector<4x384xf32>
    %143 = arith.addf %142, %141 : vector<4x384xf32>
    %144 = arith.divf %142, %143 : vector<4x384xf32>
    %145 = vector.extract_strided_slice %144 {offsets = [0, 0], sizes = [4, 128], strides = [1, 1]} : vector<4x384xf32> to vector<4x128xf32>
    %146 = vector.extract_strided_slice %144 {offsets = [0, 128], sizes = [4, 128], strides = [1, 1]} : vector<4x384xf32> to vector<4x128xf32>
    %147 = vector.extract_strided_slice %144 {offsets = [0, 256], sizes = [4, 128], strides = [1, 1]} : vector<4x384xf32> to vector<4x128xf32>
    %148 = vector.extract_strided_slice %138 {offsets = [0, 384], sizes = [4, 128], strides = [1, 1]} : vector<4x512xf32> to vector<4x128xf32>
    %149 = math.tanh %148 : vector<4x128xf32>
    %150 = arith.mulf %146, %119 : vector<4x128xf32>
    %151 = arith.mulf %145, %149 : vector<4x128xf32>
    %152 = arith.addf %150, %151 : vector<4x128xf32>
    %153 = math.tanh %152 : vector<4x128xf32>
    %154 = arith.mulf %147, %153 : vector<4x128xf32>
    %155 = vector.extract_strided_slice %154 {offsets = [0, 0], sizes = [2, 128], strides = [1, 1]} : vector<4x128xf32> to vector<2x128xf32>
    %156 = arith.index_cast %c2_i32_45 : i32 to index
    %c0_50 = arith.constant 0 : index
    %c0_51 = arith.constant 0 : index
    %157 = vector.load %arg16[%156, %c0_50, %c0_51] : memref<8x2x128xf32, #tpu.memory_space<vmem>>, vector<1x2x128xf32>
    %158 = vector.shape_cast %157 : vector<1x2x128xf32> to vector<2x128xf32>
    %159 = vector.shape_cast %155 : vector<2x128xf32> to vector<1x2x128xf32>
    tpu.vector_store %arg16[%156, %c0_50, %c0_51], %159 {strides = array<i32>} : memref<8x2x128xf32, #tpu.memory_space<vmem>>, vector<1x2x128xf32>,
    %160 = vector.extract_strided_slice %154 {offsets = [2, 0], sizes = [2, 128], strides = [1, 1]} : vector<4x128xf32> to vector<2x128xf32>
    %161 = arith.index_cast %c2_i32_45 : i32 to index
    %c0_52 = arith.constant 0 : index
    %c0_53 = arith.constant 0 : index
    %162 = vector.load %arg17[%161, %c0_52, %c0_53] : memref<8x2x128xf32, #tpu.memory_space<vmem>>, vector<1x2x128xf32>
    %163 = vector.shape_cast %162 : vector<1x2x128xf32> to vector<2x128xf32>
    %164 = vector.shape_cast %160 : vector<2x128xf32> to vector<1x2x128xf32>
    tpu.vector_store %arg17[%161, %c0_52, %c0_53], %164 {strides = array<i32>} : memref<8x2x128xf32, #tpu.memory_space<vmem>>, vector<1x2x128xf32>,
    %165 = tpu.concatenate %154, %154 in 1 : vector<4x128xf32>, vector<4x128xf32> -> vector<4x256xf32>
    %166 = arith.mulf %165, %65 : vector<4x256xf32>
    %c3_i32 = arith.constant 3 : i32
    %167 = arith.index_cast %c3_i32 : i32 to index
    %c0_54 = arith.constant 0 : index
    %c0_55 = arith.constant 0 : index
    %168 = vector.load %arg15[%167, %c0_54, %c0_55] : memref<8x4x512xf32, #tpu.memory_space<vmem>>, vector<1x4x512xf32>
    %169 = vector.shape_cast %168 : vector<1x4x512xf32> to vector<4x512xf32>
    %cst_56 = arith.constant dense<0.000000e+00> : vector<4x512xf32>
    %170 = tpu.matmul %166, %54, %cst_56 {dimension_numbers = #tpu.dot_dimension_numbers<[1], [0], [0], [1], [0, 0, 1, 1], [], []>} : vector<4x256xf32>, vector<256x512xf32>, vector<4x512xf32> -> vector<4x512xf32>
    %171 = arith.addf %169, %170 : vector<4x512xf32>
    %172 = vector.extract_strided_slice %171 {offsets = [0, 0], sizes = [4, 384], strides = [1, 1]} : vector<4x512xf32> to vector<4x384xf32>
    %173 = arith.negf %172 : vector<4x384xf32>
    %174 = math.exp %173 : vector<4x384xf32>
    %cst_57 = arith.constant 1.000000e+00 : f32
    %175 = vector.broadcast %cst_57 : f32 to vector<4x384xf32>
    %176 = arith.addf %175, %174 : vector<4x384xf32>
    %177 = arith.divf %175, %176 : vector<4x384xf32>
    %178 = vector.extract_strided_slice %177 {offsets = [0, 0], sizes = [4, 128], strides = [1, 1]} : vector<4x384xf32> to vector<4x128xf32>
    %179 = vector.extract_strided_slice %177 {offsets = [0, 128], sizes = [4, 128], strides = [1, 1]} : vector<4x384xf32> to vector<4x128xf32>
    %180 = vector.extract_strided_slice %177 {offsets = [0, 256], sizes = [4, 128], strides = [1, 1]} : vector<4x384xf32> to vector<4x128xf32>
    %181 = vector.extract_strided_slice %171 {offsets = [0, 384], sizes = [4, 128], strides = [1, 1]} : vector<4x512xf32> to vector<4x128xf32>
    %182 = math.tanh %181 : vector<4x128xf32>
    %183 = arith.mulf %179, %152 : vector<4x128xf32>
    %184 = arith.mulf %178, %182 : vector<4x128xf32>
    %185 = arith.addf %183, %184 : vector<4x128xf32>
    %186 = math.tanh %185 : vector<4x128xf32>
    %187 = arith.mulf %180, %186 : vector<4x128xf32>
    %188 = vector.extract_strided_slice %187 {offsets = [0, 0], sizes = [2, 128], strides = [1, 1]} : vector<4x128xf32> to vector<2x128xf32>
    %189 = arith.index_cast %c3_i32 : i32 to index
    %c0_58 = arith.constant 0 : index
    %c0_59 = arith.constant 0 : index
    %190 = vector.load %arg16[%189, %c0_58, %c0_59] : memref<8x2x128xf32, #tpu.memory_space<vmem>>, vector<1x2x128xf32>
    %191 = vector.shape_cast %190 : vector<1x2x128xf32> to vector<2x128xf32>
    %192 = vector.shape_cast %188 : vector<2x128xf32> to vector<1x2x128xf32>
    tpu.vector_store %arg16[%189, %c0_58, %c0_59], %192 {strides = array<i32>} : memref<8x2x128xf32, #tpu.memory_space<vmem>>, vector<1x2x128xf32>,
    %193 = vector.extract_strided_slice %187 {offsets = [2, 0], sizes = [2, 128], strides = [1, 1]} : vector<4x128xf32> to vector<2x128xf32>
    %194 = arith.index_cast %c3_i32 : i32 to index
    %c0_60 = arith.constant 0 : index
    %c0_61 = arith.constant 0 : index
    %195 = vector.load %arg17[%194, %c0_60, %c0_61] : memref<8x2x128xf32, #tpu.memory_space<vmem>>, vector<1x2x128xf32>
    %196 = vector.shape_cast %195 : vector<1x2x128xf32> to vector<2x128xf32>
    %197 = vector.shape_cast %193 : vector<2x128xf32> to vector<1x2x128xf32>
    tpu.vector_store %arg17[%194, %c0_60, %c0_61], %197 {strides = array<i32>} : memref<8x2x128xf32, #tpu.memory_space<vmem>>, vector<1x2x128xf32>,
    %198 = tpu.concatenate %187, %187 in 1 : vector<4x128xf32>, vector<4x128xf32> -> vector<4x256xf32>
    %199 = arith.mulf %198, %65 : vector<4x256xf32>
    %c4_i32 = arith.constant 4 : i32
    %200 = arith.index_cast %c4_i32 : i32 to index
    %c0_62 = arith.constant 0 : index
    %c0_63 = arith.constant 0 : index
    %201 = vector.load %arg15[%200, %c0_62, %c0_63] : memref<8x4x512xf32, #tpu.memory_space<vmem>>, vector<1x4x512xf32>
    %202 = vector.shape_cast %201 : vector<1x4x512xf32> to vector<4x512xf32>
    %cst_64 = arith.constant dense<0.000000e+00> : vector<4x512xf32>
    %203 = tpu.matmul %199, %54, %cst_64 {dimension_numbers = #tpu.dot_dimension_numbers<[1], [0], [0], [1], [0, 0, 1, 1], [], []>} : vector<4x256xf32>, vector<256x512xf32>, vector<4x512xf32> -> vector<4x512xf32>
    %204 = arith.addf %202, %203 : vector<4x512xf32>
    %205 = vector.extract_strided_slice %204 {offsets = [0, 0], sizes = [4, 384], strides = [1, 1]} : vector<4x512xf32> to vector<4x384xf32>
    %206 = arith.negf %205 : vector<4x384xf32>
    %207 = math.exp %206 : vector<4x384xf32>
    %cst_65 = arith.constant 1.000000e+00 : f32
    %208 = vector.broadcast %cst_65 : f32 to vector<4x384xf32>
    %209 = arith.addf %208, %207 : vector<4x384xf32>
    %210 = arith.divf %208, %209 : vector<4x384xf32>
    %211 = vector.extract_strided_slice %210 {offsets = [0, 0], sizes = [4, 128], strides = [1, 1]} : vector<4x384xf32> to vector<4x128xf32>
    %212 = vector.extract_strided_slice %210 {offsets = [0, 128], sizes = [4, 128], strides = [1, 1]} : vector<4x384xf32> to vector<4x128xf32>
    %213 = vector.extract_strided_slice %210 {offsets = [0, 256], sizes = [4, 128], strides = [1, 1]} : vector<4x384xf32> to vector<4x128xf32>
    %214 = vector.extract_strided_slice %204 {offsets = [0, 384], sizes = [4, 128], strides = [1, 1]} : vector<4x512xf32> to vector<4x128xf32>
    %215 = math.tanh %214 : vector<4x128xf32>
    %216 = arith.mulf %212, %185 : vector<4x128xf32>
    %217 = arith.mulf %211, %215 : vector<4x128xf32>
    %218 = arith.addf %216, %217 : vector<4x128xf32>
    %219 = math.tanh %218 : vector<4x128xf32>
    %220 = arith.mulf %213, %219 : vector<4x128xf32>
    %221 = vector.extract_strided_slice %220 {offsets = [0, 0], sizes = [2, 128], strides = [1, 1]} : vector<4x128xf32> to vector<2x128xf32>
    %222 = arith.index_cast %c4_i32 : i32 to index
    %c0_66 = arith.constant 0 : index
    %c0_67 = arith.constant 0 : index
    %223 = vector.load %arg16[%222, %c0_66, %c0_67] : memref<8x2x128xf32, #tpu.memory_space<vmem>>, vector<1x2x128xf32>
    %224 = vector.shape_cast %223 : vector<1x2x128xf32> to vector<2x128xf32>
    %225 = vector.shape_cast %221 : vector<2x128xf32> to vector<1x2x128xf32>
    tpu.vector_store %arg16[%222, %c0_66, %c0_67], %225 {strides = array<i32>} : memref<8x2x128xf32, #tpu.memory_space<vmem>>, vector<1x2x128xf32>,
    %226 = vector.extract_strided_slice %220 {offsets = [2, 0], sizes = [2, 128], strides = [1, 1]} : vector<4x128xf32> to vector<2x128xf32>
    %227 = arith.index_cast %c4_i32 : i32 to index
    %c0_68 = arith.constant 0 : index
    %c0_69 = arith.constant 0 : index
    %228 = vector.load %arg17[%227, %c0_68, %c0_69] : memref<8x2x128xf32, #tpu.memory_space<vmem>>, vector<1x2x128xf32>
    %229 = vector.shape_cast %228 : vector<1x2x128xf32> to vector<2x128xf32>
    %230 = vector.shape_cast %226 : vector<2x128xf32> to vector<1x2x128xf32>
    tpu.vector_store %arg17[%227, %c0_68, %c0_69], %230 {strides = array<i32>} : memref<8x2x128xf32, #tpu.memory_space<vmem>>, vector<1x2x128xf32>,
    %231 = tpu.concatenate %220, %220 in 1 : vector<4x128xf32>, vector<4x128xf32> -> vector<4x256xf32>
    %232 = arith.mulf %231, %65 : vector<4x256xf32>
    %c5_i32 = arith.constant 5 : i32
    %233 = arith.index_cast %c5_i32 : i32 to index
    %c0_70 = arith.constant 0 : index
    %c0_71 = arith.constant 0 : index
    %234 = vector.load %arg15[%233, %c0_70, %c0_71] : memref<8x4x512xf32, #tpu.memory_space<vmem>>, vector<1x4x512xf32>
    %235 = vector.shape_cast %234 : vector<1x4x512xf32> to vector<4x512xf32>
    %cst_72 = arith.constant dense<0.000000e+00> : vector<4x512xf32>
    %236 = tpu.matmul %232, %54, %cst_72 {dimension_numbers = #tpu.dot_dimension_numbers<[1], [0], [0], [1], [0, 0, 1, 1], [], []>} : vector<4x256xf32>, vector<256x512xf32>, vector<4x512xf32> -> vector<4x512xf32>
    %237 = arith.addf %235, %236 : vector<4x512xf32>
    %238 = vector.extract_strided_slice %237 {offsets = [0, 0], sizes = [4, 384], strides = [1, 1]} : vector<4x512xf32> to vector<4x384xf32>
    %239 = arith.negf %238 : vector<4x384xf32>
    %240 = math.exp %239 : vector<4x384xf32>
    %cst_73 = arith.constant 1.000000e+00 : f32
    %241 = vector.broadcast %cst_73 : f32 to vector<4x384xf32>
    %242 = arith.addf %241, %240 : vector<4x384xf32>
    %243 = arith.divf %241, %242 : vector<4x384xf32>
    %244 = vector.extract_strided_slice %243 {offsets = [0, 0], sizes = [4, 128], strides = [1, 1]} : vector<4x384xf32> to vector<4x128xf32>
    %245 = vector.extract_strided_slice %243 {offsets = [0, 128], sizes = [4, 128], strides = [1, 1]} : vector<4x384xf32> to vector<4x128xf32>
    %246 = vector.extract_strided_slice %243 {offsets = [0, 256], sizes = [4, 128], strides = [1, 1]} : vector<4x384xf32> to vector<4x128xf32>
    %247 = vector.extract_strided_slice %237 {offsets = [0, 384], sizes = [4, 128], strides = [1, 1]} : vector<4x512xf32> to vector<4x128xf32>
    %248 = math.tanh %247 : vector<4x128xf32>
    %249 = arith.mulf %245, %218 : vector<4x128xf32>
    %250 = arith.mulf %244, %248 : vector<4x128xf32>
    %251 = arith.addf %249, %250 : vector<4x128xf32>
    %252 = math.tanh %251 : vector<4x128xf32>
    %253 = arith.mulf %246, %252 : vector<4x128xf32>
    %254 = vector.extract_strided_slice %253 {offsets = [0, 0], sizes = [2, 128], strides = [1, 1]} : vector<4x128xf32> to vector<2x128xf32>
    %255 = arith.index_cast %c5_i32 : i32 to index
    %c0_74 = arith.constant 0 : index
    %c0_75 = arith.constant 0 : index
    %256 = vector.load %arg16[%255, %c0_74, %c0_75] : memref<8x2x128xf32, #tpu.memory_space<vmem>>, vector<1x2x128xf32>
    %257 = vector.shape_cast %256 : vector<1x2x128xf32> to vector<2x128xf32>
    %258 = vector.shape_cast %254 : vector<2x128xf32> to vector<1x2x128xf32>
    tpu.vector_store %arg16[%255, %c0_74, %c0_75], %258 {strides = array<i32>} : memref<8x2x128xf32, #tpu.memory_space<vmem>>, vector<1x2x128xf32>,
    %259 = vector.extract_strided_slice %253 {offsets = [2, 0], sizes = [2, 128], strides = [1, 1]} : vector<4x128xf32> to vector<2x128xf32>
    %260 = arith.index_cast %c5_i32 : i32 to index
    %c0_76 = arith.constant 0 : index
    %c0_77 = arith.constant 0 : index
    %261 = vector.load %arg17[%260, %c0_76, %c0_77] : memref<8x2x128xf32, #tpu.memory_space<vmem>>, vector<1x2x128xf32>
    %262 = vector.shape_cast %261 : vector<1x2x128xf32> to vector<2x128xf32>
    %263 = vector.shape_cast %259 : vector<2x128xf32> to vector<1x2x128xf32>
    tpu.vector_store %arg17[%260, %c0_76, %c0_77], %263 {strides = array<i32>} : memref<8x2x128xf32, #tpu.memory_space<vmem>>, vector<1x2x128xf32>,
    %264 = tpu.concatenate %253, %253 in 1 : vector<4x128xf32>, vector<4x128xf32> -> vector<4x256xf32>
    %265 = arith.mulf %264, %65 : vector<4x256xf32>
    %c6_i32 = arith.constant 6 : i32
    %266 = arith.index_cast %c6_i32 : i32 to index
    %c0_78 = arith.constant 0 : index
    %c0_79 = arith.constant 0 : index
    %267 = vector.load %arg15[%266, %c0_78, %c0_79] : memref<8x4x512xf32, #tpu.memory_space<vmem>>, vector<1x4x512xf32>
    %268 = vector.shape_cast %267 : vector<1x4x512xf32> to vector<4x512xf32>
    %cst_80 = arith.constant dense<0.000000e+00> : vector<4x512xf32>
    %269 = tpu.matmul %265, %54, %cst_80 {dimension_numbers = #tpu.dot_dimension_numbers<[1], [0], [0], [1], [0, 0, 1, 1], [], []>} : vector<4x256xf32>, vector<256x512xf32>, vector<4x512xf32> -> vector<4x512xf32>
    %270 = arith.addf %268, %269 : vector<4x512xf32>
    %271 = vector.extract_strided_slice %270 {offsets = [0, 0], sizes = [4, 384], strides = [1, 1]} : vector<4x512xf32> to vector<4x384xf32>
    %272 = arith.negf %271 : vector<4x384xf32>
    %273 = math.exp %272 : vector<4x384xf32>
    %cst_81 = arith.constant 1.000000e+00 : f32
    %274 = vector.broadcast %cst_81 : f32 to vector<4x384xf32>
    %275 = arith.addf %274, %273 : vector<4x384xf32>
    %276 = arith.divf %274, %275 : vector<4x384xf32>
    %277 = vector.extract_strided_slice %276 {offsets = [0, 0], sizes = [4, 128], strides = [1, 1]} : vector<4x384xf32> to vector<4x128xf32>
    %278 = vector.extract_strided_slice %276 {offsets = [0, 128], sizes = [4, 128], strides = [1, 1]} : vector<4x384xf32> to vector<4x128xf32>
    %279 = vector.extract_strided_slice %276 {offsets = [0, 256], sizes = [4, 128], strides = [1, 1]} : vector<4x384xf32> to vector<4x128xf32>
    %280 = vector.extract_strided_slice %270 {offsets = [0, 384], sizes = [4, 128], strides = [1, 1]} : vector<4x512xf32> to vector<4x128xf32>
    %281 = math.tanh %280 : vector<4x128xf32>
    %282 = arith.mulf %278, %251 : vector<4x128xf32>
    %283 = arith.mulf %277, %281 : vector<4x128xf32>
    %284 = arith.addf %282, %283 : vector<4x128xf32>
    %285 = math.tanh %284 : vector<4x128xf32>
    %286 = arith.mulf %279, %285 : vector<4x128xf32>
    %287 = vector.extract_strided_slice %286 {offsets = [0, 0], sizes = [2, 128], strides = [1, 1]} : vector<4x128xf32> to vector<2x128xf32>
    %288 = arith.index_cast %c6_i32 : i32 to index
    %c0_82 = arith.constant 0 : index
    %c0_83 = arith.constant 0 : index
    %289 = vector.load %arg16[%288, %c0_82, %c0_83] : memref<8x2x128xf32, #tpu.memory_space<vmem>>, vector<1x2x128xf32>
    %290 = vector.shape_cast %289 : vector<1x2x128xf32> to vector<2x128xf32>
    %291 = vector.shape_cast %287 : vector<2x128xf32> to vector<1x2x128xf32>
    tpu.vector_store %arg16[%288, %c0_82, %c0_83], %291 {strides = array<i32>} : memref<8x2x128xf32, #tpu.memory_space<vmem>>, vector<1x2x128xf32>,
    %292 = vector.extract_strided_slice %286 {offsets = [2, 0], sizes = [2, 128], strides = [1, 1]} : vector<4x128xf32> to vector<2x128xf32>
    %293 = arith.index_cast %c6_i32 : i32 to index
    %c0_84 = arith.constant 0 : index
    %c0_85 = arith.constant 0 : index
    %294 = vector.load %arg17[%293, %c0_84, %c0_85] : memref<8x2x128xf32, #tpu.memory_space<vmem>>, vector<1x2x128xf32>
    %295 = vector.shape_cast %294 : vector<1x2x128xf32> to vector<2x128xf32>
    %296 = vector.shape_cast %292 : vector<2x128xf32> to vector<1x2x128xf32>
    tpu.vector_store %arg17[%293, %c0_84, %c0_85], %296 {strides = array<i32>} : memref<8x2x128xf32, #tpu.memory_space<vmem>>, vector<1x2x128xf32>,
    %297 = tpu.concatenate %286, %286 in 1 : vector<4x128xf32>, vector<4x128xf32> -> vector<4x256xf32>
    %298 = arith.mulf %297, %65 : vector<4x256xf32>
    %c7_i32 = arith.constant 7 : i32
    %299 = arith.index_cast %c7_i32 : i32 to index
    %c0_86 = arith.constant 0 : index
    %c0_87 = arith.constant 0 : index
    %300 = vector.load %arg15[%299, %c0_86, %c0_87] : memref<8x4x512xf32, #tpu.memory_space<vmem>>, vector<1x4x512xf32>
    %301 = vector.shape_cast %300 : vector<1x4x512xf32> to vector<4x512xf32>
    %cst_88 = arith.constant dense<0.000000e+00> : vector<4x512xf32>
    %302 = tpu.matmul %298, %54, %cst_88 {dimension_numbers = #tpu.dot_dimension_numbers<[1], [0], [0], [1], [0, 0, 1, 1], [], []>} : vector<4x256xf32>, vector<256x512xf32>, vector<4x512xf32> -> vector<4x512xf32>
    %303 = arith.addf %301, %302 : vector<4x512xf32>
    %304 = vector.extract_strided_slice %303 {offsets = [0, 0], sizes = [4, 384], strides = [1, 1]} : vector<4x512xf32> to vector<4x384xf32>
    %305 = arith.negf %304 : vector<4x384xf32>
    %306 = math.exp %305 : vector<4x384xf32>
    %cst_89 = arith.constant 1.000000e+00 : f32
    %307 = vector.broadcast %cst_89 : f32 to vector<4x384xf32>
    %308 = arith.addf %307, %306 : vector<4x384xf32>
    %309 = arith.divf %307, %308 : vector<4x384xf32>
    %310 = vector.extract_strided_slice %309 {offsets = [0, 0], sizes = [4, 128], strides = [1, 1]} : vector<4x384xf32> to vector<4x128xf32>
    %311 = vector.extract_strided_slice %309 {offsets = [0, 128], sizes = [4, 128], strides = [1, 1]} : vector<4x384xf32> to vector<4x128xf32>
    %312 = vector.extract_strided_slice %309 {offsets = [0, 256], sizes = [4, 128], strides = [1, 1]} : vector<4x384xf32> to vector<4x128xf32>
    %313 = vector.extract_strided_slice %303 {offsets = [0, 384], sizes = [4, 128], strides = [1, 1]} : vector<4x512xf32> to vector<4x128xf32>
    %314 = math.tanh %313 : vector<4x128xf32>
    %315 = arith.mulf %311, %284 : vector<4x128xf32>
    %316 = arith.mulf %310, %314 : vector<4x128xf32>
    %317 = arith.addf %315, %316 : vector<4x128xf32>
    %318 = math.tanh %317 : vector<4x128xf32>
    %319 = arith.mulf %312, %318 : vector<4x128xf32>
    %320 = vector.extract_strided_slice %319 {offsets = [0, 0], sizes = [2, 128], strides = [1, 1]} : vector<4x128xf32> to vector<2x128xf32>
    %321 = arith.index_cast %c7_i32 : i32 to index
    %c0_90 = arith.constant 0 : index
    %c0_91 = arith.constant 0 : index
    %322 = vector.load %arg16[%321, %c0_90, %c0_91] : memref<8x2x128xf32, #tpu.memory_space<vmem>>, vector<1x2x128xf32>
    %323 = vector.shape_cast %322 : vector<1x2x128xf32> to vector<2x128xf32>
    %324 = vector.shape_cast %320 : vector<2x128xf32> to vector<1x2x128xf32>
    tpu.vector_store %arg16[%321, %c0_90, %c0_91], %324 {strides = array<i32>} : memref<8x2x128xf32, #tpu.memory_space<vmem>>, vector<1x2x128xf32>,
    %325 = vector.extract_strided_slice %319 {offsets = [2, 0], sizes = [2, 128], strides = [1, 1]} : vector<4x128xf32> to vector<2x128xf32>
    %326 = arith.index_cast %c7_i32 : i32 to index
    %c0_92 = arith.constant 0 : index
    %c0_93 = arith.constant 0 : index
    %327 = vector.load %arg17[%326, %c0_92, %c0_93] : memref<8x2x128xf32, #tpu.memory_space<vmem>>, vector<1x2x128xf32>
    %328 = vector.shape_cast %327 : vector<1x2x128xf32> to vector<2x128xf32>
    %329 = vector.shape_cast %325 : vector<2x128xf32> to vector<1x2x128xf32>
    tpu.vector_store %arg17[%326, %c0_92, %c0_93], %329 {strides = array<i32>} : memref<8x2x128xf32, #tpu.memory_space<vmem>>, vector<1x2x128xf32>,
    %330 = tpu.concatenate %319, %319 in 1 : vector<4x128xf32>, vector<4x128xf32> -> vector<4x256xf32>
    %331 = arith.mulf %330, %65 : vector<4x256xf32>
    %c8_i32 = arith.constant 8 : i32
    %c0_94 = arith.constant 0 : index
    %c0_95 = arith.constant 0 : index
    %c0_96 = arith.constant 0 : index
    %332 = vector.load %arg16[%c0_94, %c0_95, %c0_96] : memref<8x2x128xf32, #tpu.memory_space<vmem>>, vector<1x2x128xf32>
    %333 = vector.shape_cast %332 : vector<1x2x128xf32> to vector<2x128xf32>
    %c7_97 = arith.constant 7 : index
    %c0_98 = arith.constant 0 : index
    %c0_99 = arith.constant 0 : index
    %334 = vector.load %arg17[%c7_97, %c0_98, %c0_99] : memref<8x2x128xf32, #tpu.memory_space<vmem>>, vector<1x2x128xf32>
    %335 = vector.shape_cast %334 : vector<1x2x128xf32> to vector<2x128xf32>
    %336 = tpu.concatenate %333, %335 in 1 : vector<2x128xf32>, vector<2x128xf32> -> vector<2x256xf32>
    %c1_100 = arith.constant 1 : index
    %c0_101 = arith.constant 0 : index
    %c0_102 = arith.constant 0 : index
    %337 = vector.load %arg16[%c1_100, %c0_101, %c0_102] : memref<8x2x128xf32, #tpu.memory_space<vmem>>, vector<1x2x128xf32>
    %338 = vector.shape_cast %337 : vector<1x2x128xf32> to vector<2x128xf32>
    %c6_103 = arith.constant 6 : index
    %c0_104 = arith.constant 0 : index
    %c0_105 = arith.constant 0 : index
    %339 = vector.load %arg17[%c6_103, %c0_104, %c0_105] : memref<8x2x128xf32, #tpu.memory_space<vmem>>, vector<1x2x128xf32>
    %340 = vector.shape_cast %339 : vector<1x2x128xf32> to vector<2x128xf32>
    %341 = tpu.concatenate %338, %340 in 1 : vector<2x128xf32>, vector<2x128xf32> -> vector<2x256xf32>
    %c2_106 = arith.constant 2 : index
    %c0_107 = arith.constant 0 : index
    %c0_108 = arith.constant 0 : index
    %342 = vector.load %arg16[%c2_106, %c0_107, %c0_108] : memref<8x2x128xf32, #tpu.memory_space<vmem>>, vector<1x2x128xf32>
    %343 = vector.shape_cast %342 : vector<1x2x128xf32> to vector<2x128xf32>
    %c5_109 = arith.constant 5 : index
    %c0_110 = arith.constant 0 : index
    %c0_111 = arith.constant 0 : index
    %344 = vector.load %arg17[%c5_109, %c0_110, %c0_111] : memref<8x2x128xf32, #tpu.memory_space<vmem>>, vector<1x2x128xf32>
    %345 = vector.shape_cast %344 : vector<1x2x128xf32> to vector<2x128xf32>
    %346 = tpu.concatenate %343, %345 in 1 : vector<2x128xf32>, vector<2x128xf32> -> vector<2x256xf32>
    %c3_112 = arith.constant 3 : index
    %c0_113 = arith.constant 0 : index
    %c0_114 = arith.constant 0 : index
    %347 = vector.load %arg16[%c3_112, %c0_113, %c0_114] : memref<8x2x128xf32, #tpu.memory_space<vmem>>, vector<1x2x128xf32>
    %348 = vector.shape_cast %347 : vector<1x2x128xf32> to vector<2x128xf32>
    %c4_115 = arith.constant 4 : index
    %c0_116 = arith.constant 0 : index
    %c0_117 = arith.constant 0 : index
    %349 = vector.load %arg17[%c4_115, %c0_116, %c0_117] : memref<8x2x128xf32, #tpu.memory_space<vmem>>, vector<1x2x128xf32>
    %350 = vector.shape_cast %349 : vector<1x2x128xf32> to vector<2x128xf32>
    %351 = tpu.concatenate %348, %350 in 1 : vector<2x128xf32>, vector<2x128xf32> -> vector<2x256xf32>
    %c4_118 = arith.constant 4 : index
    %c0_119 = arith.constant 0 : index
    %c0_120 = arith.constant 0 : index
    %352 = vector.load %arg16[%c4_118, %c0_119, %c0_120] : memref<8x2x128xf32, #tpu.memory_space<vmem>>, vector<1x2x128xf32>
    %353 = vector.shape_cast %352 : vector<1x2x128xf32> to vector<2x128xf32>
    %c3_121 = arith.constant 3 : index
    %c0_122 = arith.constant 0 : index
    %c0_123 = arith.constant 0 : index
    %354 = vector.load %arg17[%c3_121, %c0_122, %c0_123] : memref<8x2x128xf32, #tpu.memory_space<vmem>>, vector<1x2x128xf32>
    %355 = vector.shape_cast %354 : vector<1x2x128xf32> to vector<2x128xf32>
    %356 = tpu.concatenate %353, %355 in 1 : vector<2x128xf32>, vector<2x128xf32> -> vector<2x256xf32>
    %c5_124 = arith.constant 5 : index
    %c0_125 = arith.constant 0 : index
    %c0_126 = arith.constant 0 : index
    %357 = vector.load %arg16[%c5_124, %c0_125, %c0_126] : memref<8x2x128xf32, #tpu.memory_space<vmem>>, vector<1x2x128xf32>
    %358 = vector.shape_cast %357 : vector<1x2x128xf32> to vector<2x128xf32>
    %c2_127 = arith.constant 2 : index
    %c0_128 = arith.constant 0 : index
    %c0_129 = arith.constant 0 : index
    %359 = vector.load %arg17[%c2_127, %c0_128, %c0_129] : memref<8x2x128xf32, #tpu.memory_space<vmem>>, vector<1x2x128xf32>
    %360 = vector.shape_cast %359 : vector<1x2x128xf32> to vector<2x128xf32>
    %361 = tpu.concatenate %358, %360 in 1 : vector<2x128xf32>, vector<2x128xf32> -> vector<2x256xf32>
    %c6_130 = arith.constant 6 : index
    %c0_131 = arith.constant 0 : index
    %c0_132 = arith.constant 0 : index
    %362 = vector.load %arg16[%c6_130, %c0_131, %c0_132] : memref<8x2x128xf32, #tpu.memory_space<vmem>>, vector<1x2x128xf32>
    %363 = vector.shape_cast %362 : vector<1x2x128xf32> to vector<2x128xf32>
    %c1_133 = arith.constant 1 : index
    %c0_134 = arith.constant 0 : index
    %c0_135 = arith.constant 0 : index
    %364 = vector.load %arg17[%c1_133, %c0_134, %c0_135] : memref<8x2x128xf32, #tpu.memory_space<vmem>>, vector<1x2x128xf32>
    %365 = vector.shape_cast %364 : vector<1x2x128xf32> to vector<2x128xf32>
    %366 = tpu.concatenate %363, %365 in 1 : vector<2x128xf32>, vector<2x128xf32> -> vector<2x256xf32>
    %c7_136 = arith.constant 7 : index
    %c0_137 = arith.constant 0 : index
    %c0_138 = arith.constant 0 : index
    %367 = vector.load %arg16[%c7_136, %c0_137, %c0_138] : memref<8x2x128xf32, #tpu.memory_space<vmem>>, vector<1x2x128xf32>
    %368 = vector.shape_cast %367 : vector<1x2x128xf32> to vector<2x128xf32>
    %c0_139 = arith.constant 0 : index
    %c0_140 = arith.constant 0 : index
    %c0_141 = arith.constant 0 : index
    %369 = vector.load %arg17[%c0_139, %c0_140, %c0_141] : memref<8x2x128xf32, #tpu.memory_space<vmem>>, vector<1x2x128xf32>
    %370 = vector.shape_cast %369 : vector<1x2x128xf32> to vector<2x128xf32>
    %371 = tpu.concatenate %368, %370 in 1 : vector<2x128xf32>, vector<2x128xf32> -> vector<2x256xf32>
    %372 = tpu.concatenate %336, %341, %346, %351, %356, %361, %366, %371 in 0 : vector<2x256xf32>, vector<2x256xf32>, vector<2x256xf32>, vector<2x256xf32>, vector<2x256xf32>, vector<2x256xf32>, vector<2x256xf32>, vector<2x256xf32> -> vector<16x256xf32>
    %c0_142 = arith.constant 0 : index
    %c0_143 = arith.constant 0 : index
    %373 = vector.load %arg4[%c0_142, %c0_143] : memref<256x128xf32, #tpu.memory_space<vmem>>, vector<256x128xf32>
    %cst_144 = arith.constant dense<0.000000e+00> : vector<16x128xf32>
    %374 = tpu.matmul %372, %373, %cst_144 {dimension_numbers = #tpu.dot_dimension_numbers<[1], [0], [0], [1], [0, 0, 1, 1], [], []>} : vector<16x256xf32>, vector<256x128xf32>, vector<16x128xf32> -> vector<16x128xf32>
    %c0_145 = arith.constant 0 : index
    %c0_146 = arith.constant 0 : index
    %375 = vector.load %arg5[%c0_145, %c0_146] : memref<1x128xf32, #tpu.memory_space<vmem>>, vector<1x128xf32>
    %376 = vector.broadcast %375 : vector<1x128xf32> to vector<16x128xf32>
    %377 = arith.addf %374, %376 : vector<16x128xf32>
    %cst_147 = arith.constant 0.000000e+00 : f32
    %378 = vector.broadcast %cst_147 : f32 to vector<16x128xf32>
    %379 = arith.maximumf %377, %378 : vector<16x128xf32>
    %c0_148 = arith.constant 0 : index
    %c0_149 = arith.constant 0 : index
    %380 = vector.load %arg6[%c0_148, %c0_149] : memref<128x1xf32, #tpu.memory_space<vmem>>, vector<128x1xf32>
    %cst_150 = arith.constant dense<0.000000e+00> : vector<16x1xf32>
    %381 = tpu.matmul %379, %380, %cst_150 {dimension_numbers = #tpu.dot_dimension_numbers<[1], [0], [0], [1], [0, 0, 1, 1], [], []>} : vector<16x128xf32>, vector<128x1xf32>, vector<16x1xf32> -> vector<16x1xf32>
    %c0_151 = arith.constant 0 : index
    %c0_152 = arith.constant 0 : index
    %382 = vector.load %arg7[%c0_151, %c0_152] : memref<1x1xf32, #tpu.memory_space<vmem>>, vector<1x1xf32>
    %383 = vector.broadcast %382 : vector<1x1xf32> to vector<16x1xf32>
    %384 = arith.addf %381, %383 : vector<16x1xf32>
    %c0_153 = arith.constant 0 : index
    %c0_154 = arith.constant 0 : index
    %385 = vector.load %arg12[%c0_153, %c0_154] : memref<16x1xf32, #tpu.memory_space<vmem>>, vector<16x1xf32>
    tpu.vector_store %arg12[%c0_153, %c0_154], %384 {strides = array<i32>} : memref<16x1xf32, #tpu.memory_space<vmem>>, vector<16x1xf32>,
    %c0_155 = arith.constant 0 : index
    %c0_156 = arith.constant 0 : index
    %386 = vector.load %arg9[%c0_155, %c0_156] : memref<2x8xf32, #tpu.memory_space<vmem>>, vector<2x8xf32>
    %c0_157 = arith.constant 0 : index
    %c0_158 = arith.constant 0 : index
    %387 = vector.load %arg8[%c0_157, %c0_158] : memref<2x8xf32, #tpu.memory_space<vmem>>, vector<2x8xf32>
    %388 = arith.mulf %386, %387 : vector<2x8xf32>
    %cst_159 = arith.constant dense<0.000000e+00> : vector<2xf32>
    %389 = vector.multi_reduction <add>, %388, %cst_159 [1] : vector<2x8xf32> to vector<2xf32>
    %390 = vector.shape_cast %389 : vector<2xf32> to vector<2x1xf32>
    %cst_160 = arith.constant 8.000000e+00 : f32
    %391 = vector.broadcast %cst_160 : f32 to vector<2x1xf32>
    %392 = arith.divf %390, %391 : vector<2x1xf32>
    %c0_161 = arith.constant 0 : index
    %c0_162 = arith.constant 0 : index
    %393 = vector.load %arg10[%c0_161, %c0_162] : memref<2x1xf32, #tpu.memory_space<vmem>>, vector<2x1xf32>
    %394 = arith.mulf %392, %393 : vector<2x1xf32>
    %395 = vector.shape_cast %394 : vector<2x1xf32> to vector<1x2x1xf32>
    %cst_163 = arith.constant dense<0.000000e+00> : vector<1xf32>
    %396 = vector.multi_reduction <add>, %395, %cst_163 [1, 2] : vector<1x2x1xf32> to vector<1xf32>
    %397 = vector.shape_cast %396 : vector<1xf32> to vector<1x1x1xf32>
    %398 = vector.extract %397[0, 0, 0] : f32 from vector<1x1x1xf32>
    %cst_164 = arith.constant 2.000000e+00 : f32
    %399 = arith.divf %398, %cst_164 : f32
    %c0_165 = arith.constant 0 : index
    %c0_166 = arith.constant 0 : index
    %400 = vector.load %arg11[%c0_165, %c0_166] : memref<1x1xf32, #tpu.memory_space<vmem>>, vector<1x1xf32>
    %401 = vector.extract %400[0, 0] : f32 from vector<1x1xf32>
    %cst_167 = arith.constant 0.000000e+00 : f32
    %402 = arith.maximumf %401, %cst_167 : f32
    %cst_168 = arith.constant 0.000000e+00 : f32
    %403 = arith.maximumf %399, %cst_168 : f32
    %404 = arith.mulf %399, %402 : f32
    %405 = arith.subf %403, %404 : f32
    %406 = math.absf %399 : f32
    %cst_169 = arith.constant 0.000000e+00 : f32
    %407 = arith.subf %cst_169, %406 : f32
    %408 = math.exp %407 : f32
    %409 = math.log1p %408 : f32
    %410 = arith.addf %405, %409 : f32
    %411 = vector.broadcast %399 : f32 to vector<1x1xf32>
    %c0_170 = arith.constant 0 : index
    %c0_171 = arith.constant 0 : index
    %412 = vector.load %arg13[%c0_170, %c0_171] : memref<1x1xf32, #tpu.memory_space<vmem>>, vector<1x1xf32>
    tpu.vector_store %arg13[%c0_170, %c0_171], %411 {strides = array<i32>} : memref<1x1xf32, #tpu.memory_space<vmem>>, vector<1x1xf32>,
    %413 = vector.broadcast %410 : f32 to vector<1x1xf32>
    %c0_172 = arith.constant 0 : index
    %c0_173 = arith.constant 0 : index
    %414 = vector.load %arg14[%c0_172, %c0_173] : memref<1x1xf32, #tpu.memory_space<vmem>>, vector<1x1xf32>
    tpu.vector_store %arg14[%c0_172, %c0_173], %413 {strides = array<i32>} : memref<1x1xf32, #tpu.memory_space<vmem>>, vector<1x1xf32>,
    return
  }
}

</mosaic_0001>

<bundles_post_ra>
// kernel: custom-call.2
= control target key start
LH: loop header
LB: loop body
LE: loop exit
PB: predicated region body
PF: predicated region fallthrough
CT: control target
= control target key end

     0   :  { %s6_s0 = inlined_call_operand.vmem [shape: f32[1024], index: 0, kind: output, shape index: {}]  }

// kernel: forward.1
= control target key start
LH: loop header
LB: loop body
LE: loop exit
PB: predicated region body
PF: predicated region fallthrough
CT: control target
= control target key end

     0   :  { %s10318_s0 = inlined_call_operand.vmem [shape: f32[16,768], index: 0, kind: input, shape index: {}]   ;;  %s10319_s1 = inlined_call_operand.vmem [shape: f32[768,1024], index: 1, kind: input, shape index: {}]   ;;  %s10320_s2 = inlined_call_operand.vmem [shape: f32[1,1024], index: 2, kind: input, shape index: {}]   ;;  %s10321_s3 = inlined_call_operand.vmem [shape: f32[256,512], index: 3, kind: input, shape index: {}]   ;;  %s10322_s4 = inlined_call_operand.vmem [shape: f32[256,128], index: 4, kind: input, shape index: {}]   ;;  %s10323_s5 = inlined_call_operand.vmem [shape: f32[1,128], index: 5, kind: input, shape index: {}]   ;;  %s10324_s6 = inlined_call_operand.vmem [shape: f32[128,1], index: 6, kind: input, shape index: {}]   ;;  %s10325_s7 = inlined_call_operand.<no memory space> [shape: f32[1,1], index: 7, kind: input, shape index: {}]   ;;  %s10326_s8 = inlined_call_operand.vmem [shape: f32[2,8], index: 8, kind: input, shape index: {}]   ;;  %s10327_s9 = inlined_call_operand.vmem [shape: f32[2,8], index: 9, kind: input, shape index: {}]   ;;  %s10328_s10 = inlined_call_operand.vmem [shape: f32[2,1], index: 10, kind: input, shape index: {}]   ;;  %s10329_s12 = inlined_call_operand.hbm [shape: f32[16,1], index: 12, kind: output, shape index: {0}]   ;;  %s10330_s13 = inlined_call_operand.hbm [shape: f32[1,1], index: 13, kind: output, shape index: {1}]   ;;  %s10331_s14 = inlined_call_operand.hbm [shape: f32[1,1], index: 14, kind: output, shape index: {2}]   ;;  %s10332_s11 = inlined_call_operand.<no memory space> [shape: f32[1,1], index: 11, kind: input, shape index: {}]  }
   0x1   :  { %v20_v0 = vstv %s10325_s7  ;;  %v22_v1 = vstv %s10332_s11 }
   0x2   :  { %21 = vst [vmem:[#allocation5] sm:$0x1] %v20_v0  ;;  %23 = vst [vmem:[#allocation6] sm:$0x1] %v22_v1 }
   0x3   :  { %24 = vsyncpa [#allocation8], 0  ;;  %v63_v2 = vld [vmem:[%s10319_s1 + $0x8] sm:$0xff]  ;;  %v65_v4 = vld [vmem:[%s10319_s1 + $0x18] sm:$0xff] }
   0x4   :  { %v71_v3 = vld [vmem:[%s10319_s1 + $0x48] sm:$0xff]  ;;  %v73_v6 = vld [vmem:[%s10319_s1 + $0x58] sm:$0xff]  ;;  %v62_v7 = vld [vmem:[%s10319_s1] sm:$0xff] }
   0x5   :  { %v4127_v5 = vpack.c.bf16 %v71_v3, %v63_v2  ;;  %v70_v8 = vld [vmem:[%s10319_s1 + $0x40] sm:$0xff]  ;;  %v4319_v9 = vpack.c.bf16 %v73_v6, %v65_v4  ;;  %v64_v11 = vld [vmem:[%s10319_s1 + $0x10] sm:$0xff]  ;;  %v79_v13 = vld [vmem:[%s10319_s1 + $0x88] sm:$0xff] }
   0x6   :  { %v4129_v10 = vpack.c.bf16 %v70_v8, %v62_v7  ;;  %v72_v12 = vld [vmem:[%s10319_s1 + $0x50] sm:$0xff]  ;;  %v87_v15 = vld [vmem:[%s10319_s1 + $0xc8] sm:$0xff]  ;;  %v81_v16 = vld [vmem:[%s10319_s1 + $0x98] sm:$0xff] }
   0x7   :  { %4128 = vmatprep.subr.bf16.mxu0 %v4127_v5  ;;  %v4321_v14 = vpack.c.bf16 %v72_v12, %v64_v11  ;;  %v89_v17 = vld [vmem:[%s10319_s1 + $0xd8] sm:$0xff]  ;;  %4320 = vmatprep.subr.bf16.mxu1 %v4319_v9  ;;  %v4131_v18 = vpack.c.bf16 %v87_v15, %v79_v13  ;;  %v78_v20 = vld [vmem:[%s10319_s1 + $0x80] sm:$0xff]  ;;  %v80_v22 = vld [vmem:[%s10319_s1 + $0x90] sm:$0xff] }
   0x8   :  { %4130 = vmatpush1.bf16.msra.mxu0 %v4129_v10  ;;  %v4323_v19 = vpack.c.bf16 %v89_v17, %v81_v16  ;;  %v86_v21 = vld [vmem:[%s10319_s1 + $0xc0] sm:$0xff]  ;;  %v88_v24 = vld [vmem:[%s10319_s1 + $0xd0] sm:$0xff]  ;;  %v95_v25 = vld [vmem:[%s10319_s1 + $0x108] sm:$0xff] }
   0x9   :  { %4322 = vmatpush1.bf16.msra.mxu1 %v4321_v14  ;;  %v4133_v23 = vpack.c.bf16 %v86_v21, %v78_v20  ;;  %v103_v26 = vld [vmem:[%s10319_s1 + $0x148] sm:$0xff]  ;;  %4132 = vmatprep.subr.bf16.mxu0 %v4131_v18  ;;  %v4325_v27 = vpack.c.bf16 %v88_v24, %v80_v22  ;;  %v97_v29 = vld [vmem:[%s10319_s1 + $0x118] sm:$0xff]  ;;  %v94_v31 = vld [vmem:[%s10319_s1 + $0x100] sm:$0xff] }
   0xa   :  { %4324 = vmatprep.subr.bf16.mxu1 %v4323_v19  ;;  %v4135_v28 = vpack.c.bf16 %v103_v26, %v95_v25  ;;  %v105_v30 = vld [vmem:[%s10319_s1 + $0x158] sm:$0xff]  ;;  %v102_v33 = vld [vmem:[%s10319_s1 + $0x140] sm:$0xff]  ;;  %v96_v34 = vld [vmem:[%s10319_s1 + $0x110] sm:$0xff] }
   0xb   :  { %v4327_v32 = vpack.c.bf16 %v105_v30, %v97_v29  ;;  %v104_v35 = vld [vmem:[%s10319_s1 + $0x150] sm:$0xff]  ;;  %v4137_v36 = vpack.c.bf16 %v102_v33, %v94_v31  ;;  %v111_v37 = vld [vmem:[%s10319_s1 + $0x188] sm:$0xff]  ;;  %v113_v39 = vld [vmem:[%s10319_s1 + $0x198] sm:$0xff] }
   0xc   :  { %4134 = vmatpush1.bf16.msra.mxu0 %v4133_v23  ;;  %v119_v38 = vld [vmem:[%s10319_s1 + $0x1c8] sm:$0xff]  ;;  %v4329_v40 = vpack.c.bf16 %v104_v35, %v96_v34  ;;  %v121_v42 = vld [vmem:[%s10319_s1 + $0x1d8] sm:$0xff]  ;;  %v110_v43 = vld [vmem:[%s10319_s1 + $0x180] sm:$0xff] }
   0xd   :  { %4326 = vmatpush1.bf16.msra.mxu1 %v4325_v27  ;;  %4136 = vmatprep.subr.bf16.mxu0 %v4135_v28  ;;  %v4139_v41 = vpack.c.bf16 %v119_v38, %v111_v37  ;;  %v118_v44 = vld [vmem:[%s10319_s1 + $0x1c0] sm:$0xff]  ;;  %v4331_v45 = vpack.c.bf16 %v121_v42, %v113_v39  ;;  %v112_v46 = vld [vmem:[%s10319_s1 + $0x190] sm:$0xff]  ;;  %v127_v48 = vld [vmem:[%s10319_s1 + $0x208] sm:$0xff] }
   0xe   :  { %4328 = vmatprep.subr.bf16.mxu1 %v4327_v32  ;;  %v120_v47 = vld [vmem:[%s10319_s1 + $0x1d0] sm:$0xff]  ;;  %v135_v49 = vld [vmem:[%s10319_s1 + $0x248] sm:$0xff]  ;;  %v129_v50 = vld [vmem:[%s10319_s1 + $0x218] sm:$0xff]  ;;  %v4141_v52 = vpack.c.bf16 %v118_v44, %v110_v43 }
   0xf   :  { %v137_v51 = vld [vmem:[%s10319_s1 + $0x258] sm:$0xff]  ;;  %v4333_v53 = vpack.c.bf16 %v120_v47, %v112_v46  ;;  %v4143_v54 = vpack.c.bf16 %v135_v49, %v127_v48  ;;  %v126_v55 = vld [vmem:[%s10319_s1 + $0x200] sm:$0xff]  ;;  %v128_v57 = vld [vmem:[%s10319_s1 + $0x210] sm:$0xff] }
  0x10   :  { %4138 = vmatpush1.bf16.msra.mxu0 %v4137_v36  ;;  %v134_v56 = vld [vmem:[%s10319_s1 + $0x240] sm:$0xff]  ;;  %v4335_v58 = vpack.c.bf16 %v137_v51, %v129_v50  ;;  %v136_v59 = vld [vmem:[%s10319_s1 + $0x250] sm:$0xff]  ;;  %v143_v60 = vld [vmem:[%s10319_s1 + $0x288] sm:$0xff] }
  0x11   :  { %4330 = vmatpush1.bf16.msra.mxu1 %v4329_v40  ;;  %4140 = vmatprep.subr.bf16.mxu0 %v4139_v41  ;;  %v151_v61 = vld [vmem:[%s10319_s1 + $0x2c8] sm:$0xff]  ;;  %v145_v62 = vld [vmem:[%s10319_s1 + $0x298] sm:$0xff]  ;;  %v4145_v0 = vpack.c.bf16 %v134_v56, %v126_v55  ;;  %v4337_v1 = vpack.c.bf16 %v136_v59, %v128_v57  ;;  %v142_v3 = vld [vmem:[%s10319_s1 + $0x280] sm:$0xff] }
  0x12   :  { %4332 = vmatprep.subr.bf16.mxu1 %v4331_v45  ;;  %v153_v63 = vld [vmem:[%s10319_s1 + $0x2d8] sm:$0xff]  ;;  %v4147_v2 = vpack.c.bf16 %v151_v61, %v143_v60  ;;  %v150_v4 = vld [vmem:[%s10319_s1 + $0x2c0] sm:$0xff]  ;;  %v144_v5 = vld [vmem:[%s10319_s1 + $0x290] sm:$0xff] }
  0x13   :  { %v4339_v6 = vpack.c.bf16 %v153_v63, %v145_v62  ;;  %v152_v7 = vld [vmem:[%s10319_s1 + $0x2d0] sm:$0xff]  ;;  %v159_v8 = vld [vmem:[%s10319_s1 + $0x308] sm:$0xff]  ;;  %v161_v10 = vld [vmem:[%s10319_s1 + $0x318] sm:$0xff]  ;;  %v4149_v12 = vpack.c.bf16 %v150_v4, %v142_v3 }
  0x14   :  { %4142 = vmatpush1.bf16.msra.mxu0 %v4141_v52  ;;  %v167_v9 = vld [vmem:[%s10319_s1 + $0x348] sm:$0xff]  ;;  %v169_v11 = vld [vmem:[%s10319_s1 + $0x358] sm:$0xff]  ;;  %v4341_v13 = vpack.c.bf16 %v152_v7, %v144_v5  ;;  %v158_v15 = vld [vmem:[%s10319_s1 + $0x300] sm:$0xff] }
  0x15   :  { %4334 = vmatpush1.bf16.msra.mxu1 %v4333_v53  ;;  %4144 = vmatprep.subr.bf16.mxu0 %v4143_v54  ;;  %v4151_v14 = vpack.c.bf16 %v167_v9, %v159_v8  ;;  %v166_v16 = vld [vmem:[%s10319_s1 + $0x340] sm:$0xff]  ;;  %v160_v17 = vld [vmem:[%s10319_s1 + $0x310] sm:$0xff]  ;;  %v4343_v18 = vpack.c.bf16 %v169_v11, %v161_v10  ;;  %v175_v20 = vld [vmem:[%s10319_s1 + $0x388] sm:$0xff] }
  0x16   :  { %4336 = vmatprep.subr.bf16.mxu1 %v4335_v58  ;;  %v168_v19 = vld [vmem:[%s10319_s1 + $0x350] sm:$0xff]  ;;  %v183_v21 = vld [vmem:[%s10319_s1 + $0x3c8] sm:$0xff]  ;;  %v177_v22 = vld [vmem:[%s10319_s1 + $0x398] sm:$0xff]  ;;  %v4153_v24 = vpack.c.bf16 %v166_v16, %v158_v15 }
  0x17   :  { %v185_v23 = vld [vmem:[%s10319_s1 + $0x3d8] sm:$0xff]  ;;  %v4345_v25 = vpack.c.bf16 %v168_v19, %v160_v17  ;;  %v4155_v26 = vpack.c.bf16 %v183_v21, %v175_v20  ;;  %v174_v27 = vld [vmem:[%s10319_s1 + $0x380] sm:$0xff]  ;;  %v176_v29 = vld [vmem:[%s10319_s1 + $0x390] sm:$0xff] }
  0x18   :  { %4146 = vmatpush1.bf16.msra.mxu0 %v4145_v0  ;;  %v182_v28 = vld [vmem:[%s10319_s1 + $0x3c0] sm:$0xff]  ;;  %v4347_v30 = vpack.c.bf16 %v185_v23, %v177_v22  ;;  %v184_v31 = vld [vmem:[%s10319_s1 + $0x3d0] sm:$0xff]  ;;  %v191_v32 = vld [vmem:[%s10319_s1 + $0x408] sm:$0xff] }
  0x19   :  { %4338 = vmatpush1.bf16.msra.mxu1 %v4337_v1  ;;  %4148 = vmatprep.subr.bf16.mxu0 %v4147_v2  ;;  %v199_v33 = vld [vmem:[%s10319_s1 + $0x448] sm:$0xff]  ;;  %v193_v34 = vld [vmem:[%s10319_s1 + $0x418] sm:$0xff]  ;;  %v4157_v36 = vpack.c.bf16 %v182_v28, %v174_v27  ;;  %v4349_v37 = vpack.c.bf16 %v184_v31, %v176_v29  ;;  %v190_v39 = vld [vmem:[%s10319_s1 + $0x400] sm:$0xff] }
  0x1a   :  { %4340 = vmatprep.subr.bf16.mxu1 %v4339_v6  ;;  %v201_v35 = vld [vmem:[%s10319_s1 + $0x458] sm:$0xff]  ;;  %v4159_v38 = vpack.c.bf16 %v199_v33, %v191_v32  ;;  %v198_v40 = vld [vmem:[%s10319_s1 + $0x440] sm:$0xff]  ;;  %v192_v41 = vld [vmem:[%s10319_s1 + $0x410] sm:$0xff] }
  0x1b   :  { %v4351_v42 = vpack.c.bf16 %v201_v35, %v193_v34  ;;  %v200_v43 = vld [vmem:[%s10319_s1 + $0x450] sm:$0xff]  ;;  %v207_v44 = vld [vmem:[%s10319_s1 + $0x488] sm:$0xff]  ;;  %v209_v46 = vld [vmem:[%s10319_s1 + $0x498] sm:$0xff]  ;;  %v4161_v48 = vpack.c.bf16 %v198_v40, %v190_v39 }
  0x1c   :  { %4150 = vmatpush1.bf16.msra.mxu0 %v4149_v12  ;;  %v215_v45 = vld [vmem:[%s10319_s1 + $0x4c8] sm:$0xff]  ;;  %v217_v47 = vld [vmem:[%s10319_s1 + $0x4d8] sm:$0xff]  ;;  %v4353_v49 = vpack.c.bf16 %v200_v43, %v192_v41  ;;  %v206_v51 = vld [vmem:[%s10319_s1 + $0x480] sm:$0xff] }
  0x1d   :  { %4342 = vmatpush1.bf16.msra.mxu1 %v4341_v13  ;;  %4152 = vmatprep.subr.bf16.mxu0 %v4151_v14  ;;  %v4163_v50 = vpack.c.bf16 %v215_v45, %v207_v44  ;;  %v214_v52 = vld [vmem:[%s10319_s1 + $0x4c0] sm:$0xff]  ;;  %v208_v53 = vld [vmem:[%s10319_s1 + $0x490] sm:$0xff]  ;;  %v4355_v54 = vpack.c.bf16 %v217_v47, %v209_v46  ;;  %v223_v56 = vld [vmem:[%s10319_s1 + $0x508] sm:$0xff] }
  0x1e   :  { %4344 = vmatprep.subr.bf16.mxu1 %v4343_v18  ;;  %v216_v55 = vld [vmem:[%s10319_s1 + $0x4d0] sm:$0xff]  ;;  %v231_v57 = vld [vmem:[%s10319_s1 + $0x548] sm:$0xff]  ;;  %v225_v58 = vld [vmem:[%s10319_s1 + $0x518] sm:$0xff]  ;;  %v4165_v60 = vpack.c.bf16 %v214_v52, %v206_v51 }
  0x1f   :  { %v233_v59 = vld [vmem:[%s10319_s1 + $0x558] sm:$0xff]  ;;  %v4357_v61 = vpack.c.bf16 %v216_v55, %v208_v53  ;;  %v4167_v62 = vpack.c.bf16 %v231_v57, %v223_v56  ;;  %v222_v63 = vld [vmem:[%s10319_s1 + $0x500] sm:$0xff]  ;;  %v224_v1 = vld [vmem:[%s10319_s1 + $0x510] sm:$0xff] }
  0x20   :  { %4154 = vmatpush1.bf16.msra.mxu0 %v4153_v24  ;;  %v230_v0 = vld [vmem:[%s10319_s1 + $0x540] sm:$0xff]  ;;  %v4359_v2 = vpack.c.bf16 %v233_v59, %v225_v58  ;;  %v232_v3 = vld [vmem:[%s10319_s1 + $0x550] sm:$0xff]  ;;  %v239_v4 = vld [vmem:[%s10319_s1 + $0x588] sm:$0xff] }
  0x21   :  { %4346 = vmatpush1.bf16.msra.mxu1 %v4345_v25  ;;  %4156 = vmatprep.subr.bf16.mxu0 %v4155_v26  ;;  %v247_v5 = vld [vmem:[%s10319_s1 + $0x5c8] sm:$0xff]  ;;  %v241_v6 = vld [vmem:[%s10319_s1 + $0x598] sm:$0xff]  ;;  %v4169_v8 = vpack.c.bf16 %v230_v0, %v222_v63  ;;  %v238_v9 = vld [vmem:[%s10319_s1 + $0x580] sm:$0xff]  ;;  %v4361_v10 = vpack.c.bf16 %v232_v3, %v224_v1 }
  0x22   :  { %4348 = vmatprep.subr.bf16.mxu1 %v4347_v30  ;;  %v249_v7 = vld [vmem:[%s10319_s1 + $0x5d8] sm:$0xff]  ;;  %v4171_v11 = vpack.c.bf16 %v247_v5, %v239_v4  ;;  %v246_v12 = vld [vmem:[%s10319_s1 + $0x5c0] sm:$0xff]  ;;  %v240_v13 = vld [vmem:[%s10319_s1 + $0x590] sm:$0xff] }
  0x23   :  { %v248_v14 = vld [vmem:[%s10319_s1 + $0x5d0] sm:$0xff]  ;;  %v4363_v15 = vpack.c.bf16 %v249_v7, %v241_v6  ;;  %v255_v16 = vld [vmem:[%s10319_s1 + $0x608] sm:$0xff]  ;;  %v257_v19 = vld [vmem:[%s10319_s1 + $0x618] sm:$0xff]  ;;  %v4173_v21 = vpack.c.bf16 %v246_v12, %v238_v9 }
  0x24   :  { %4158 = vmatpush1.bf16.msra.mxu0 %v4157_v36  ;;  %v263_v17 = vld [vmem:[%s10319_s1 + $0x648] sm:$0xff]  ;;  %v265_v20 = vld [vmem:[%s10319_s1 + $0x658] sm:$0xff]  ;;  %v4365_v22 = vpack.c.bf16 %v248_v14, %v240_v13  ;;  %v254_v24 = vld [vmem:[%s10319_s1 + $0x600] sm:$0xff] }
  0x25   :  { %4350 = vmatpush1.bf16.msra.mxu1 %v4349_v37  ;;  %4160 = vmatprep.subr.bf16.mxu0 %v4159_v38  ;;  %v51_v18 = vld [vmem:[%s10318_s0 + $0x8] sm:$0xff]  ;;  %v4175_v23 = vpack.c.bf16 %v263_v17, %v255_v16  ;;  %v262_v25 = vld [vmem:[%s10319_s1 + $0x640] sm:$0xff]  ;;  %v256_v26 = vld [vmem:[%s10319_s1 + $0x610] sm:$0xff]  ;;  %v4367_v27 = vpack.c.bf16 %v265_v20, %v257_v19 }
  0x26   :  { %4352 = vmatprep.subr.bf16.mxu1 %v4351_v42  ;;  %936 = vmatprep.mubr.f32.mxu0 %v51_v18  ;;  %v264_v28 = vld [vmem:[%s10319_s1 + $0x650] sm:$0xff]  ;;  %v271_v29 = vld [vmem:[%s10319_s1 + $0x688] sm:$0xff]  ;;  %v273_v31 = vld [vmem:[%s10319_s1 + $0x698] sm:$0xff]  ;;  %v4177_v33 = vpack.c.bf16 %v262_v25, %v254_v24 }
  0x27   :  { %1167 = vmatprep.mubr.f32.mxu1 %v51_v18  ;;  %v279_v30 = vld [vmem:[%s10319_s1 + $0x6c8] sm:$0xff]  ;;  %v281_v32 = vld [vmem:[%s10319_s1 + $0x6d8] sm:$0xff]  ;;  %v4369_v34 = vpack.c.bf16 %v264_v28, %v256_v26  ;;  %v270_v36 = vld [vmem:[%s10319_s1 + $0x680] sm:$0xff] }
  0x28   :  { %4162 = vmatpush1.bf16.msra.mxu0 %v4161_v48  ;;  %v4179_v35 = vpack.c.bf16 %v279_v30, %v271_v29  ;;  %v278_v37 = vld [vmem:[%s10319_s1 + $0x6c0] sm:$0xff]  ;;  %v272_v38 = vld [vmem:[%s10319_s1 + $0x690] sm:$0xff]  ;;  %v4371_v39 = vpack.c.bf16 %v281_v32, %v273_v31  ;;  %v287_v41 = vld [vmem:[%s10319_s1 + $0x708] sm:$0xff] }
  0x29   :  { %4354 = vmatpush1.bf16.msra.mxu1 %v4353_v49  ;;  %4164 = vmatprep.subr.bf16.mxu0 %v4163_v50  ;;  %v280_v40 = vld [vmem:[%s10319_s1 + $0x6d0] sm:$0xff]  ;;  %v295_v42 = vld [vmem:[%s10319_s1 + $0x748] sm:$0xff]  ;;  %v289_v43 = vld [vmem:[%s10319_s1 + $0x718] sm:$0xff]  ;;  %v4181_v45 = vpack.c.bf16 %v278_v37, %v270_v36 }
  0x2a   :  { %4356 = vmatprep.subr.bf16.mxu1 %v4355_v54  ;;  %v297_v44 = vld [vmem:[%s10319_s1 + $0x758] sm:$0xff]  ;;  %v4373_v46 = vpack.c.bf16 %v280_v40, %v272_v38  ;;  %v4183_v47 = vpack.c.bf16 %v295_v42, %v287_v41  ;;  %v286_v48 = vld [vmem:[%s10319_s1 + $0x700] sm:$0xff]  ;;  %v288_v50 = vld [vmem:[%s10319_s1 + $0x710] sm:$0xff] }
  0x2b   :  { %v294_v49 = vld [vmem:[%s10319_s1 + $0x740] sm:$0xff]  ;;  %v4375_v51 = vpack.c.bf16 %v297_v44, %v289_v43  ;;  %v296_v52 = vld [vmem:[%s10319_s1 + $0x750] sm:$0xff]  ;;  %v303_v53 = vld [vmem:[%s10319_s1 + $0x788] sm:$0xff] }
  0x2c   :  { %4166 = vmatpush1.bf16.msra.mxu0 %v4165_v60  ;;  %v311_v54 = vld [vmem:[%s10319_s1 + $0x7c8] sm:$0xff]  ;;  %v305_v55 = vld [vmem:[%s10319_s1 + $0x798] sm:$0xff]  ;;  %v4185_v57 = vpack.c.bf16 %v294_v49, %v286_v48  ;;  %v4377_v58 = vpack.c.bf16 %v296_v52, %v288_v50  ;;  %v302_v60 = vld [vmem:[%s10319_s1 + $0x780] sm:$0xff] }
  0x2d   :  { %4358 = vmatpush1.bf16.msra.mxu1 %v4357_v61  ;;  %4168 = vmatprep.subr.bf16.mxu0 %v4167_v62  ;;  %v313_v56 = vld [vmem:[%s10319_s1 + $0x7d8] sm:$0xff]  ;;  %v4187_v59 = vpack.c.bf16 %v311_v54, %v303_v53  ;;  %v310_v61 = vld [vmem:[%s10319_s1 + $0x7c0] sm:$0xff]  ;;  %v304_v62 = vld [vmem:[%s10319_s1 + $0x790] sm:$0xff] }
  0x2e   :  { %4360 = vmatprep.subr.bf16.mxu1 %v4359_v2  ;;  %v4379_v63 = vpack.c.bf16 %v313_v56, %v305_v55  ;;  %v312_v0 = vld [vmem:[%s10319_s1 + $0x7d0] sm:$0xff]  ;;  %v319_v1 = vld [vmem:[%s10319_s1 + $0x808] sm:$0xff]  ;;  %v321_v3 = vld [vmem:[%s10319_s1 + $0x818] sm:$0xff]  ;;  %v4189_v5 = vpack.c.bf16 %v310_v61, %v302_v60 }
  0x2f   :  { %v327_v2 = vld [vmem:[%s10319_s1 + $0x848] sm:$0xff]  ;;  %v329_v4 = vld [vmem:[%s10319_s1 + $0x858] sm:$0xff]  ;;  %v4381_v6 = vpack.c.bf16 %v312_v0, %v304_v62  ;;  %v326_v9 = vld [vmem:[%s10319_s1 + $0x840] sm:$0xff] }
  0x30   :  { %4170 = vmatpush1.bf16.msra.mxu0 %v4169_v8  ;;  %v4191_v7 = vpack.c.bf16 %v327_v2, %v319_v1  ;;  %v318_v8 = vld [vmem:[%s10319_s1 + $0x800] sm:$0xff]  ;;  %v328_v12 = vld [vmem:[%s10319_s1 + $0x850] sm:$0xff]  ;;  %v335_v13 = vld [vmem:[%s10319_s1 + $0x888] sm:$0xff] }
  0x31   :  { %4362 = vmatpush1.bf16.msra.mxu1 %v4361_v10  ;;  %4172 = vmatprep.subr.bf16.mxu0 %v4171_v11  ;;  %v320_v10 = vld [vmem:[%s10319_s1 + $0x810] sm:$0xff]  ;;  %v4383_v11 = vpack.c.bf16 %v329_v4, %v321_v3  ;;  %v343_v14 = vld [vmem:[%s10319_s1 + $0x8c8] sm:$0xff]  ;;  %v345_v16 = vld [vmem:[%s10319_s1 + $0x8d8] sm:$0xff]  ;;  %v4193_v18 = vpack.c.bf16 %v326_v9, %v318_v8 }
  0x32   :  { %4364 = vmatprep.subr.bf16.mxu1 %v4363_v15  ;;  %v337_v15 = vld [vmem:[%s10319_s1 + $0x898] sm:$0xff]  ;;  %v50_v17 = vld [vmem:[%s10318_s0] sm:$0xff]  ;;  %v4385_v19 = vpack.c.bf16 %v328_v12, %v320_v10  ;;  %v4195_v20 = vpack.c.bf16 %v343_v14, %v335_v13  ;;  %v344_v25 = vld [vmem:[%s10319_s1 + $0x8d0] sm:$0xff] }
  0x33   :  { %v4387_v24 = vpack.c.bf16 %v345_v16, %v337_v15  ;;  %v351_v26 = vld [vmem:[%s10319_s1 + $0x908] sm:$0xff]  ;;  %v353_v28 = vld [vmem:[%s10319_s1 + $0x918] sm:$0xff]  ;;  %v360_v37 = vld [vmem:[%s10319_s1 + $0x950] sm:$0xff] }
  0x34   :  { %4174 = vmatpush1.bf16.msra.mxu0 %v4173_v21  ;;  %v334_v21 = vld [vmem:[%s10319_s1 + $0x880] sm:$0xff]  ;;  %v361_v29 = vld [vmem:[%s10319_s1 + $0x958] sm:$0xff]  ;;  %v367_v38 = vld [vmem:[%s10319_s1 + $0x988] sm:$0xff] }
  0x35   :  { %4366 = vmatpush1.bf16.msra.mxu1 %v4365_v22  ;;  %4176 = vmatprep.subr.bf16.mxu0 %v4175_v23  ;;  %v342_v22 = vld [vmem:[%s10319_s1 + $0x8c0] sm:$0xff]  ;;  %v336_v23 = vld [vmem:[%s10319_s1 + $0x890] sm:$0xff]  ;;  %v4391_v36 = vpack.c.bf16 %v361_v29, %v353_v28  ;;  %v369_v40 = vld [vmem:[%s10319_s1 + $0x998] sm:$0xff] }
  0x36   :  { %4368 = vmatprep.subr.bf16.mxu1 %v4367_v27  ;;  %v359_v27 = vld [vmem:[%s10319_s1 + $0x948] sm:$0xff]  ;;  %v4197_v30 = vpack.c.bf16 %v342_v22, %v334_v21  ;;  %v4389_v31 = vpack.c.bf16 %v344_v25, %v336_v23  ;;  %v377_v41 = vld [vmem:[%s10319_s1 + $0x9d8] sm:$0xff]  ;;  %v376_v49 = vld [vmem:[%s10319_s1 + $0x9d0] sm:$0xff] }
  0x37   :  { %v4199_v32 = vpack.c.bf16 %v359_v27, %v351_v26  ;;  %v4395_v48 = vpack.c.bf16 %v377_v41, %v369_v40  ;;  %v383_v50 = vld [vmem:[%s10319_s1 + $0xa08] sm:$0xff]  ;;  %v385_v52 = vld [vmem:[%s10319_s1 + $0xa18] sm:$0xff]  ;;  %v392_v61 = vld [vmem:[%s10319_s1 + $0xa50] sm:$0xff] }
  0x38   :  { %4178 = vmatpush1.bf16.msra.mxu0 %v4177_v33  ;;  %v350_v33 = vld [vmem:[%s10319_s1 + $0x900] sm:$0xff]  ;;  %v393_v53 = vld [vmem:[%s10319_s1 + $0xa58] sm:$0xff]  ;;  %v399_v62 = vld [vmem:[%s10319_s1 + $0xa88] sm:$0xff] }
  0x39   :  { %4370 = vmatpush1.bf16.msra.mxu1 %v4369_v34  ;;  %4180 = vmatprep.subr.bf16.mxu0 %v4179_v35  ;;  %v358_v34 = vld [vmem:[%s10319_s1 + $0x940] sm:$0xff]  ;;  %v352_v35 = vld [vmem:[%s10319_s1 + $0x910] sm:$0xff]  ;;  %v4399_v60 = vpack.c.bf16 %v393_v53, %v385_v52  ;;  %v401_v0 = vld [vmem:[%s10319_s1 + $0xa98] sm:$0xff] }
  0x3a   :  { %4372 = vmatprep.subr.bf16.mxu1 %v4371_v39  ;;  %v375_v39 = vld [vmem:[%s10319_s1 + $0x9c8] sm:$0xff]  ;;  %v4201_v42 = vpack.c.bf16 %v358_v34, %v350_v33  ;;  %v4393_v43 = vpack.c.bf16 %v360_v37, %v352_v35  ;;  %v409_v1 = vld [vmem:[%s10319_s1 + $0xad8] sm:$0xff]  ;;  %v408_v9 = vld [vmem:[%s10319_s1 + $0xad0] sm:$0xff] }
  0x3b   :  { %v4203_v44 = vpack.c.bf16 %v375_v39, %v367_v38  ;;  %v4403_v8 = vpack.c.bf16 %v409_v1, %v401_v0  ;;  %v415_v10 = vld [vmem:[%s10319_s1 + $0xb08] sm:$0xff]  ;;  %v417_v12 = vld [vmem:[%s10319_s1 + $0xb18] sm:$0xff]  ;;  %v414_v16 = vld [vmem:[%s10319_s1 + $0xb00] sm:$0xff] }
  0x3c   :  { %4182 = vmatpush1.bf16.msra.mxu0 %v4181_v45  ;;  %v366_v45 = vld [vmem:[%s10319_s1 + $0x980] sm:$0xff]  ;;  %v425_v13 = vld [vmem:[%s10319_s1 + $0xb58] sm:$0xff]  ;;  %v424_v21 = vld [vmem:[%s10319_s1 + $0xb50] sm:$0xff] }
  0x3d   :  { %4374 = vmatpush1.bf16.msra.mxu1 %v4373_v46  ;;  %4184 = vmatprep.subr.bf16.mxu0 %v4183_v47  ;;  %v374_v46 = vld [vmem:[%s10319_s1 + $0x9c0] sm:$0xff]  ;;  %v368_v47 = vld [vmem:[%s10319_s1 + $0x990] sm:$0xff]  ;;  %v57_v14 = vld [vmem:[%s10318_s0 + $0x38] sm:$0xff]  ;;  %v4407_v23 = vpack.c.bf16 %v425_v13, %v417_v12 }
  0x3e   :  { %4376 = vmatprep.subr.bf16.mxu1 %v4375_v51  ;;  %v391_v51 = vld [vmem:[%s10319_s1 + $0xa48] sm:$0xff]  ;;  %v4205_v54 = vpack.c.bf16 %v374_v46, %v366_v45  ;;  %v4397_v55 = vpack.c.bf16 %v376_v49, %v368_v47  ;;  %v56_v22 = vld [vmem:[%s10318_s0 + $0x30] sm:$0xff]  ;;  %v53_v26 = vld [vmem:[%s10318_s0 + $0x18] sm:$0xff] }
  0x3f   :  { %v4207_v56 = vpack.c.bf16 %v391_v51, %v383_v50  ;;  %v439_v25 = vld [vmem:[%s10319_s1 + $0xbc8] sm:$0xff]  ;;  %v433_v27 = vld [vmem:[%s10319_s1 + $0xb98] sm:$0xff]  ;;  %v438_v33 = vld [vmem:[%s10319_s1 + $0xbc0] sm:$0xff] }
  0x40   :  { %4186 = vmatpush1.bf16.msra.mxu0 %v4185_v57  ;;  %v382_v57 = vld [vmem:[%s10319_s1 + $0xa00] sm:$0xff]  ;;  %v441_v28 = vld [vmem:[%s10319_s1 + $0xbd8] sm:$0xff]  ;;  %v432_v34 = vld [vmem:[%s10319_s1 + $0xb90] sm:$0xff] }
  0x41   :  { %4378 = vmatpush1.bf16.msra.mxu1 %v4377_v58  ;;  %4188 = vmatprep.subr.bf16.mxu0 %v4187_v59  ;;  %v390_v58 = vld [vmem:[%s10319_s1 + $0xa40] sm:$0xff]  ;;  %v384_v59 = vld [vmem:[%s10319_s1 + $0xa10] sm:$0xff]  ;;  %v4411_v35 = vpack.c.bf16 %v441_v28, %v433_v27  ;;  %v447_v37 = vld [vmem:[%s10319_s1 + $0xc08] sm:$0xff] }
  0x42   :  { %4380 = vmatprep.subr.bf16.mxu1 %v4379_v63  ;;  %v407_v63 = vld [vmem:[%s10319_s1 + $0xac8] sm:$0xff]  ;;  %v4209_v2 = vpack.c.bf16 %v390_v58, %v382_v57  ;;  %v4401_v3 = vpack.c.bf16 %v392_v61, %v384_v59  ;;  %v449_v39 = vld [vmem:[%s10319_s1 + $0xc18] sm:$0xff]  ;;  %v454_v45 = vld [vmem:[%s10319_s1 + $0xc40] sm:$0xff] }
  0x43   :  { %v4211_v4 = vpack.c.bf16 %v407_v63, %v399_v62  ;;  %v455_v38 = vld [vmem:[%s10319_s1 + $0xc48] sm:$0xff]  ;;  %v457_v40 = vld [vmem:[%s10319_s1 + $0xc58] sm:$0xff]  ;;  %v448_v46 = vld [vmem:[%s10319_s1 + $0xc10] sm:$0xff] }
  0x44   :  { %4190 = vmatpush1.bf16.msra.mxu0 %v4189_v5  ;;  %v398_v5 = vld [vmem:[%s10319_s1 + $0xa80] sm:$0xff]  ;;  %v4415_v47 = vpack.c.bf16 %v457_v40, %v449_v39  ;;  %v463_v49 = vld [vmem:[%s10319_s1 + $0xc88] sm:$0xff]  ;;  %v465_v51 = vld [vmem:[%s10319_s1 + $0xc98] sm:$0xff] }
  0x45   :  { %4382 = vmatpush1.bf16.msra.mxu1 %v4381_v6  ;;  %4192 = vmatprep.subr.bf16.mxu0 %v4191_v7  ;;  %v406_v6 = vld [vmem:[%s10319_s1 + $0xac0] sm:$0xff]  ;;  %v400_v7 = vld [vmem:[%s10319_s1 + $0xa90] sm:$0xff]  ;;  %v471_v50 = vld [vmem:[%s10319_s1 + $0xcc8] sm:$0xff] }
  0x46   :  { %4384 = vmatprep.subr.bf16.mxu1 %v4383_v11  ;;  %v423_v11 = vld [vmem:[%s10319_s1 + $0xb48] sm:$0xff]  ;;  %v4213_v15 = vpack.c.bf16 %v406_v6, %v398_v5  ;;  %v473_v52 = vld [vmem:[%s10319_s1 + $0xcd8] sm:$0xff]  ;;  %v470_v57 = vld [vmem:[%s10319_s1 + $0xcc0] sm:$0xff] }
  0x47   :  { %937 = vmatmul.mubr.f32.vlgmr.msra.gmra.mrb[0].mxu0 %v50_v17  ;;  %v464_v58 = vld [vmem:[%s10319_s1 + $0xc90] sm:$0xff]  ;;  %v4419_v59 = vpack.c.bf16 %v473_v52, %v465_v51  ;;  %v479_v61 = vld [vmem:[%s10319_s1 + $0xd08] sm:$0xff]  ;;  %v481_v63 = vld [vmem:[%s10319_s1 + $0xd18] sm:$0xff] }
  0x48   :  { %4194 = vmatpush1.bf16.msra.mxu0 %v4193_v18  ;;  %1168 = vmatmul.mubr.f32.vlgmr.msra.gmra.mrb[0].mxu1 %v50_v17  ;;  %v422_v17 = vld [vmem:[%s10319_s1 + $0xb40] sm:$0xff]  ;;  %v4405_v18 = vpack.c.bf16 %v408_v9, %v400_v7  ;;  %v487_v62 = vld [vmem:[%s10319_s1 + $0xd48] sm:$0xff]  ;;  %v489_v0 = vld [vmem:[%s10319_s1 + $0xd58] sm:$0xff] }
  0x49   :  { %4386 = vmatpush1.bf16.msra.mxu1 %v4385_v19  ;;  %4196 = vmatprep.subr.bf16.mxu0 %v4195_v20  ;;  %v4215_v19 = vpack.c.bf16 %v423_v11, %v415_v10  ;;  %v416_v20 = vld [vmem:[%s10319_s1 + $0xb10] sm:$0xff]  ;;  %v4217_v29 = vpack.c.bf16 %v422_v17, %v414_v16  ;;  %v486_v5 = vld [vmem:[%s10319_s1 + $0xd40] sm:$0xff]  ;;  %v4423_v7 = vpack.c.bf16 %v489_v0, %v481_v63  ;;  %v495_v9 = vld [vmem:[%s10319_s1 + $0xd88] sm:$0xff] }
  0x4a   :  { %4388 = vmatprep.subr.bf16.mxu1 %v4387_v24  ;;  %942 = vmatprep.mubr.f32.mxu0 %v57_v14  ;;  %v431_v24 = vld [vmem:[%s10319_s1 + $0xb88] sm:$0xff]  ;;  %v480_v6 = vld [vmem:[%s10319_s1 + $0xd10] sm:$0xff]  ;;  %v497_v11 = vld [vmem:[%s10319_s1 + $0xd98] sm:$0xff] }
  0x4b   :  { %1173 = vmatprep.mubr.f32.mxu1 %v57_v14  ;;  %943 = vmatmul.mubr.f32.gmra.mrb[2].mxu0 %v56_v22  ;;  %v503_v10 = vld [vmem:[%s10319_s1 + $0xdc8] sm:$0xff]  ;;  %v505_v12 = vld [vmem:[%s10319_s1 + $0xdd8] sm:$0xff]  ;;  %v494_v16 = vld [vmem:[%s10319_s1 + $0xd80] sm:$0xff] }
  0x4c   :  { %4198 = vmatpush1.bf16.msra.mxu0 %v4197_v30  ;;  %1174 = vmatmul.mubr.f32.gmra.mrb[2].mxu1 %v56_v22  ;;  %v4409_v30 = vpack.c.bf16 %v424_v21, %v416_v20  ;;  %v502_v17 = vld [vmem:[%s10319_s1 + $0xdc0] sm:$0xff]  ;;  %v504_v20 = vld [vmem:[%s10319_s1 + $0xdd0] sm:$0xff]  ;;  %v511_v21 = vld [vmem:[%s10319_s1 + $0xe08] sm:$0xff] }
  0x4d   :  { %4390 = vmatpush1.bf16.msra.mxu1 %v4389_v31  ;;  %4200 = vmatprep.subr.bf16.mxu0 %v4199_v32  ;;  %v4219_v31 = vpack.c.bf16 %v439_v25, %v431_v24  ;;  %v430_v32 = vld [vmem:[%s10319_s1 + $0xb80] sm:$0xff]  ;;  %v519_v22 = vld [vmem:[%s10319_s1 + $0xe48] sm:$0xff]  ;;  %v521_v24 = vld [vmem:[%s10319_s1 + $0xe58] sm:$0xff]  ;;  %v4237_v25 = vpack.c.bf16 %v502_v17, %v494_v16 }
  0x4e   :  { %4392 = vmatprep.subr.bf16.mxu1 %v4391_v36  ;;  %1013 = vmatprep.mubr.f32.mxu0 %v53_v26  ;;  %v440_v36 = vld [vmem:[%s10319_s1 + $0xbd0] sm:$0xff]  ;;  %v4221_v41 = vpack.c.bf16 %v438_v33, %v430_v32  ;;  %v4239_v27 = vpack.c.bf16 %v519_v22, %v511_v21  ;;  %v510_v28 = vld [vmem:[%s10319_s1 + $0xe00] sm:$0xff]  ;;  %v527_v33 = vld [vmem:[%s10319_s1 + $0xe88] sm:$0xff] }
  0x4f   :  { %1244 = vmatprep.mubr.f32.mxu1 %v53_v26  ;;  %v520_v32 = vld [vmem:[%s10319_s1 + $0xe50] sm:$0xff]  ;;  %v526_v40 = vld [vmem:[%s10319_s1 + $0xe80] sm:$0xff]  ;;  %v591_v17 = vld [vmem:[%s10319_s1 + $0x1088] sm:$0xff] }
  0x50   :  { %4202 = vmatpush1.bf16.msra.mxu0 %v4201_v42  ;;  %v4413_v42 = vpack.c.bf16 %v440_v36, %v432_v34  ;;  %v535_v34 = vld [vmem:[%s10319_s1 + $0xec8] sm:$0xff]  ;;  %v537_v36 = vld [vmem:[%s10319_s1 + $0xed8] sm:$0xff]  ;;  %v542_v52 = vld [vmem:[%s10319_s1 + $0xf00] sm:$0xff] }
  0x51   :  { %4394 = vmatpush1.bf16.msra.mxu1 %v4393_v43  ;;  %4204 = vmatprep.subr.bf16.mxu0 %v4203_v44  ;;  %v4223_v43 = vpack.c.bf16 %v455_v38, %v447_v37  ;;  %v446_v44 = vld [vmem:[%s10319_s1 + $0xc00] sm:$0xff]  ;;  %v4243_v39 = vpack.c.bf16 %v535_v34, %v527_v33  ;;  %v584_v16 = vld [vmem:[%s10319_s1 + $0x1050] sm:$0xff]  ;;  %v617_v33 = vld [vmem:[%s10319_s1 + $0x1158] sm:$0xff] }
  0x52   :  { %4396 = vmatprep.subr.bf16.mxu1 %v4395_v48  ;;  %v456_v48 = vld [vmem:[%s10319_s1 + $0xc50] sm:$0xff]  ;;  %v4225_v53 = vpack.c.bf16 %v454_v45, %v446_v44  ;;  %v543_v45 = vld [vmem:[%s10319_s1 + $0xf08] sm:$0xff]  ;;  %v558_v0 = vld [vmem:[%s10319_s1 + $0xf80] sm:$0xff] }
  0x53   :  { %v536_v44 = vld [vmem:[%s10319_s1 + $0xed0] sm:$0xff]  ;;  %v59_v34 = vld [vmem:[%s10318_s0 + $0x48] sm:$0xff] }
  0x54   :  { %4206 = vmatpush1.bf16.msra.mxu0 %v4205_v54  ;;  %v4417_v54 = vpack.c.bf16 %v456_v48, %v448_v46  ;;  %v551_v46 = vld [vmem:[%s10319_s1 + $0xf48] sm:$0xff]  ;;  %v553_v48 = vld [vmem:[%s10319_s1 + $0xf58] sm:$0xff]  ;;  %v52_v21 = vld [vmem:[%s10318_s0 + $0x10] sm:$0xff] }
  0x55   :  { %4398 = vmatpush1.bf16.msra.mxu1 %v4397_v55  ;;  %4208 = vmatprep.subr.bf16.mxu0 %v4207_v56  ;;  %v4227_v55 = vpack.c.bf16 %v471_v50, %v463_v49  ;;  %v462_v56 = vld [vmem:[%s10319_s1 + $0xc80] sm:$0xff]  ;;  %v4247_v51 = vpack.c.bf16 %v551_v46, %v543_v45  ;;  %v631_v45 = vld [vmem:[%s10319_s1 + $0x11c8] sm:$0xff]  ;;  %v625_v46 = vld [vmem:[%s10319_s1 + $0x1198] sm:$0xff] }
  0x56   :  { %4400 = vmatprep.subr.bf16.mxu1 %v4399_v60  ;;  %v472_v60 = vld [vmem:[%s10319_s1 + $0xcd0] sm:$0xff]  ;;  %v4229_v1 = vpack.c.bf16 %v470_v57, %v462_v56  ;;  %v559_v57 = vld [vmem:[%s10319_s1 + $0xf88] sm:$0xff] }
  0x57   :  { %v552_v56 = vld [vmem:[%s10319_s1 + $0xf50] sm:$0xff] }
  0x58   :  { %4210 = vmatpush1.bf16.msra.mxu0 %v4209_v2  ;;  %v4421_v2 = vpack.c.bf16 %v472_v60, %v464_v58  ;;  %v567_v58 = vld [vmem:[%s10319_s1 + $0xfc8] sm:$0xff]  ;;  %v569_v60 = vld [vmem:[%s10319_s1 + $0xfd8] sm:$0xff] }
  0x59   :  { %4402 = vmatpush1.bf16.msra.mxu1 %v4401_v3  ;;  %4212 = vmatprep.subr.bf16.mxu0 %v4211_v4  ;;  %v4231_v3 = vpack.c.bf16 %v487_v62, %v479_v61  ;;  %v478_v4 = vld [vmem:[%s10319_s1 + $0xd00] sm:$0xff]  ;;  %v4251_v63 = vpack.c.bf16 %v567_v58, %v559_v57  ;;  %v639_v57 = vld [vmem:[%s10319_s1 + $0x1208] sm:$0xff] }
  0x5a   :  { %4404 = vmatprep.subr.bf16.mxu1 %v4403_v8  ;;  %v488_v8 = vld [vmem:[%s10319_s1 + $0xd50] sm:$0xff]  ;;  %v4233_v13 = vpack.c.bf16 %v486_v5, %v478_v4  ;;  %v575_v5 = vld [vmem:[%s10319_s1 + $0x1008] sm:$0xff] }
  0x5b   :  { %v4425_v14 = vpack.c.bf16 %v488_v8, %v480_v6  ;;  %v568_v4 = vld [vmem:[%s10319_s1 + $0xfd0] sm:$0xff]  ;;  %v583_v6 = vld [vmem:[%s10319_s1 + $0x1048] sm:$0xff]  ;;  %v585_v8 = vld [vmem:[%s10319_s1 + $0x1058] sm:$0xff] }
  0x5c   :  { %4214 = vmatpush1.bf16.msra.mxu0 %v4213_v15  ;;  %v4235_v15 = vpack.c.bf16 %v503_v10, %v495_v9  ;;  %v647_v58 = vld [vmem:[%s10319_s1 + $0x1248] sm:$0xff] }
  0x5d   :  { %4406 = vmatpush1.bf16.msra.mxu1 %v4405_v18  ;;  %4216 = vmatprep.subr.bf16.mxu0 %v4215_v19  ;;  %v496_v18 = vld [vmem:[%s10319_s1 + $0xd90] sm:$0xff]  ;;  %v4427_v19 = vpack.c.bf16 %v505_v12, %v497_v11  ;;  %v4255_v11 = vpack.c.bf16 %v583_v6, %v575_v5  ;;  %v574_v12 = vld [vmem:[%s10319_s1 + $0x1000] sm:$0xff]  ;;  %v655_v5 = vld [vmem:[%s10319_s1 + $0x1288] sm:$0xff] }
  0x5e   :  { %4408 = vmatprep.subr.bf16.mxu1 %v4407_v23  ;;  %v513_v23 = vld [vmem:[%s10319_s1 + $0xe18] sm:$0xff]  ;;  %v4429_v26 = vpack.c.bf16 %v504_v20, %v496_v18  ;;  %v599_v18 = vld [vmem:[%s10319_s1 + $0x10c8] sm:$0xff] }
  0x5f   :  { %v601_v20 = vld [vmem:[%s10319_s1 + $0x10d8] sm:$0xff]  ;;  %v663_v6 = vld [vmem:[%s10319_s1 + $0x12c8] sm:$0xff] }
  0x60   :  { %4218 = vmatpush1.bf16.msra.mxu0 %v4217_v29  ;;  %v518_v29 = vld [vmem:[%s10319_s1 + $0xe40] sm:$0xff] }
  0x61   :  { %4410 = vmatpush1.bf16.msra.mxu1 %v4409_v30  ;;  %4220 = vmatprep.subr.bf16.mxu0 %v4219_v31  ;;  %v512_v30 = vld [vmem:[%s10319_s1 + $0xe10] sm:$0xff]  ;;  %v4431_v31 = vpack.c.bf16 %v521_v24, %v513_v23  ;;  %v4241_v37 = vpack.c.bf16 %v518_v29, %v510_v28  ;;  %v4259_v24 = vpack.c.bf16 %v599_v18, %v591_v17  ;;  %v671_v17 = vld [vmem:[%s10319_s1 + $0x1308] sm:$0xff] }
  0x62   :  { %4412 = vmatprep.subr.bf16.mxu1 %v4411_v35  ;;  %v529_v35 = vld [vmem:[%s10319_s1 + $0xe98] sm:$0xff]  ;;  %v4433_v38 = vpack.c.bf16 %v520_v32, %v512_v30  ;;  %v600_v29 = vld [vmem:[%s10319_s1 + $0x10d0] sm:$0xff]  ;;  %v607_v30 = vld [vmem:[%s10319_s1 + $0x1108] sm:$0xff] }
  0x63   :  { %v609_v32 = vld [vmem:[%s10319_s1 + $0x1118] sm:$0xff]  ;;  %v679_v18 = vld [vmem:[%s10319_s1 + $0x1348] sm:$0xff] }
  0x64   :  { %4222 = vmatpush1.bf16.msra.mxu0 %v4221_v41  ;;  %v534_v41 = vld [vmem:[%s10319_s1 + $0xec0] sm:$0xff] }
  0x65   :  { %4414 = vmatpush1.bf16.msra.mxu1 %v4413_v42  ;;  %4224 = vmatprep.subr.bf16.mxu0 %v4223_v43  ;;  %v528_v42 = vld [vmem:[%s10319_s1 + $0xe90] sm:$0xff]  ;;  %v4435_v43 = vpack.c.bf16 %v537_v36, %v529_v35  ;;  %v4245_v49 = vpack.c.bf16 %v534_v41, %v526_v40  ;;  %v58_v36 = vld [vmem:[%s10318_s0 + $0x40] sm:$0xff] }
  0x66   :  { %4416 = vmatprep.subr.bf16.mxu1 %v4415_v47  ;;  %v545_v47 = vld [vmem:[%s10319_s1 + $0xf18] sm:$0xff]  ;;  %v4437_v50 = vpack.c.bf16 %v536_v44, %v528_v42  ;;  %v614_v40 = vld [vmem:[%s10319_s1 + $0x1140] sm:$0xff]  ;;  %v608_v41 = vld [vmem:[%s10319_s1 + $0x1110] sm:$0xff]  ;;  %v4455_v42 = vpack.c.bf16 %v617_v33, %v609_v32 }
  0x67   :  { %v623_v44 = vld [vmem:[%s10319_s1 + $0x1188] sm:$0xff]  ;;  %v697_v32 = vld [vmem:[%s10319_s1 + $0x13d8] sm:$0xff] }
  0x68   :  { %4226 = vmatpush1.bf16.msra.mxu0 %v4225_v53  ;;  %v550_v53 = vld [vmem:[%s10319_s1 + $0xf40] sm:$0xff] }
  0x69   :  { %4418 = vmatpush1.bf16.msra.mxu1 %v4417_v54  ;;  %4228 = vmatprep.subr.bf16.mxu0 %v4227_v55  ;;  %v544_v54 = vld [vmem:[%s10319_s1 + $0xf10] sm:$0xff]  ;;  %v4439_v55 = vpack.c.bf16 %v553_v48, %v545_v47  ;;  %v4249_v61 = vpack.c.bf16 %v550_v53, %v542_v52  ;;  %v633_v47 = vld [vmem:[%s10319_s1 + $0x11d8] sm:$0xff]  ;;  %v55_v48 = vld [vmem:[%s10318_s0 + $0x28] sm:$0xff] }
  0x6a   :  { %4420 = vmatprep.subr.bf16.mxu1 %v4419_v59  ;;  %v561_v59 = vld [vmem:[%s10319_s1 + $0xf98] sm:$0xff]  ;;  %v4441_v62 = vpack.c.bf16 %v552_v56, %v544_v54  ;;  %v622_v52 = vld [vmem:[%s10319_s1 + $0x1180] sm:$0xff]  ;;  %v624_v54 = vld [vmem:[%s10319_s1 + $0x1190] sm:$0xff] }
  0x6b   :  { %v630_v53 = vld [vmem:[%s10319_s1 + $0x11c0] sm:$0xff]  ;;  %v632_v56 = vld [vmem:[%s10319_s1 + $0x11d0] sm:$0xff] }
  0x6c   :  { %4230 = vmatpush1.bf16.msra.mxu0 %v4229_v1  ;;  %v566_v1 = vld [vmem:[%s10319_s1 + $0xfc0] sm:$0xff] }
  0x6d   :  { %4422 = vmatpush1.bf16.msra.mxu1 %v4421_v2  ;;  %4232 = vmatprep.subr.bf16.mxu0 %v4231_v3  ;;  %v560_v2 = vld [vmem:[%s10319_s1 + $0xf90] sm:$0xff]  ;;  %v4443_v3 = vpack.c.bf16 %v569_v60, %v561_v59  ;;  %v4253_v9 = vpack.c.bf16 %v566_v1, %v558_v0  ;;  %v641_v59 = vld [vmem:[%s10319_s1 + $0x1218] sm:$0xff]  ;;  %v638_v0 = vld [vmem:[%s10319_s1 + $0x1200] sm:$0xff] }
  0x6e   :  { %4424 = vmatprep.subr.bf16.mxu1 %v4423_v7  ;;  %v577_v7 = vld [vmem:[%s10319_s1 + $0x1018] sm:$0xff]  ;;  %v4445_v10 = vpack.c.bf16 %v568_v4, %v560_v2  ;;  %v646_v1 = vld [vmem:[%s10319_s1 + $0x1240] sm:$0xff]  ;;  %v640_v2 = vld [vmem:[%s10319_s1 + $0x1210] sm:$0xff] }
  0x6f   :  { %v649_v60 = vld [vmem:[%s10319_s1 + $0x1258] sm:$0xff]  ;;  %v648_v4 = vld [vmem:[%s10319_s1 + $0x1250] sm:$0xff] }
  0x70   :  { %4234 = vmatpush1.bf16.msra.mxu0 %v4233_v13  ;;  %v582_v13 = vld [vmem:[%s10319_s1 + $0x1040] sm:$0xff] }
  0x71   :  { %4426 = vmatpush1.bf16.msra.mxu1 %v4425_v14  ;;  %4236 = vmatprep.subr.bf16.mxu0 %v4235_v15  ;;  %v576_v14 = vld [vmem:[%s10319_s1 + $0x1010] sm:$0xff]  ;;  %v4447_v15 = vpack.c.bf16 %v585_v8, %v577_v7  ;;  %v4257_v22 = vpack.c.bf16 %v582_v13, %v574_v12  ;;  %v657_v7 = vld [vmem:[%s10319_s1 + $0x1298] sm:$0xff]  ;;  %v654_v12 = vld [vmem:[%s10319_s1 + $0x1280] sm:$0xff] }
  0x72   :  { %4428 = vmatprep.subr.bf16.mxu1 %v4427_v19  ;;  %v593_v19 = vld [vmem:[%s10319_s1 + $0x1098] sm:$0xff]  ;;  %v4449_v23 = vpack.c.bf16 %v584_v16, %v576_v14  ;;  %v662_v13 = vld [vmem:[%s10319_s1 + $0x12c0] sm:$0xff]  ;;  %v656_v14 = vld [vmem:[%s10319_s1 + $0x1290] sm:$0xff] }
  0x73   :  { %v4451_v28 = vpack.c.bf16 %v601_v20, %v593_v19  ;;  %v665_v8 = vld [vmem:[%s10319_s1 + $0x12d8] sm:$0xff]  ;;  %v664_v16 = vld [vmem:[%s10319_s1 + $0x12d0] sm:$0xff] }
  0x74   :  { %4238 = vmatpush1.bf16.msra.mxu0 %v4237_v25  ;;  %v590_v25 = vld [vmem:[%s10319_s1 + $0x1080] sm:$0xff]  ;;  %v673_v19 = vld [vmem:[%s10319_s1 + $0x1318] sm:$0xff] }
  0x75   :  { %4430 = vmatpush1.bf16.msra.mxu1 %v4429_v26  ;;  %4240 = vmatprep.subr.bf16.mxu0 %v4239_v27  ;;  %v598_v26 = vld [vmem:[%s10319_s1 + $0x10c0] sm:$0xff]  ;;  %v592_v27 = vld [vmem:[%s10319_s1 + $0x1090] sm:$0xff]  ;;  %v681_v20 = vld [vmem:[%s10319_s1 + $0x1358] sm:$0xff] }
  0x76   :  { %4432 = vmatprep.subr.bf16.mxu1 %v4431_v31  ;;  %v615_v31 = vld [vmem:[%s10319_s1 + $0x1148] sm:$0xff]  ;;  %v4261_v35 = vpack.c.bf16 %v598_v26, %v590_v25  ;;  %v678_v25 = vld [vmem:[%s10319_s1 + $0x1340] sm:$0xff]  ;;  %v672_v26 = vld [vmem:[%s10319_s1 + $0x1310] sm:$0xff] }
  0x78   :  { %4242 = vmatpush1.bf16.msra.mxu0 %v4241_v37  ;;  %v4453_v37 = vpack.c.bf16 %v600_v29, %v592_v27  ;;  %v4471_v27 = vpack.c.bf16 %v681_v20, %v673_v19  ;;  %v687_v29 = vld [vmem:[%s10319_s1 + $0x1388] sm:$0xff]  ;;  %v750_v20 = vld [vmem:[%s10319_s1 + $0x1580] sm:$0xff] }
  0x79   :  { %4434 = vmatpush1.bf16.msra.mxu1 %v4433_v38  ;;  %4244 = vmatprep.subr.bf16.mxu0 %v4243_v39  ;;  %v4263_v38 = vpack.c.bf16 %v615_v31, %v607_v30  ;;  %v606_v39 = vld [vmem:[%s10319_s1 + $0x1100] sm:$0xff]  ;;  %v695_v30 = vld [vmem:[%s10319_s1 + $0x13c8] sm:$0xff]  ;;  %v689_v31 = vld [vmem:[%s10319_s1 + $0x1398] sm:$0xff] }
  0x7a   :  { %4436 = vmatprep.subr.bf16.mxu1 %v4435_v43  ;;  %v616_v43 = vld [vmem:[%s10319_s1 + $0x1150] sm:$0xff] }
  0x7c   :  { %4246 = vmatpush1.bf16.msra.mxu0 %v4245_v49  ;;  %v4265_v49 = vpack.c.bf16 %v614_v40, %v606_v39  ;;  %v4475_v39 = vpack.c.bf16 %v697_v32, %v689_v31  ;;  %v696_v40 = vld [vmem:[%s10319_s1 + $0x13d0] sm:$0xff]  ;;  %v766_v32 = vld [vmem:[%s10319_s1 + $0x1600] sm:$0xff] }
  0x7d   :  { %4438 = vmatpush1.bf16.msra.mxu1 %v4437_v50  ;;  %4248 = vmatprep.subr.bf16.mxu0 %v4247_v51  ;;  %v4457_v50 = vpack.c.bf16 %v616_v43, %v608_v41  ;;  %v4267_v51 = vpack.c.bf16 %v631_v45, %v623_v44  ;;  %v703_v41 = vld [vmem:[%s10319_s1 + $0x1408] sm:$0xff]  ;;  %v705_v43 = vld [vmem:[%s10319_s1 + $0x1418] sm:$0xff] }
  0x7e   :  { %4440 = vmatprep.subr.bf16.mxu1 %v4439_v55  ;;  %v4459_v55 = vpack.c.bf16 %v633_v47, %v625_v46  ;;  %v713_v44 = vld [vmem:[%s10319_s1 + $0x1458] sm:$0xff] }
  0x80   :  { %4250 = vmatpush1.bf16.msra.mxu0 %v4249_v61  ;;  %v4269_v61 = vpack.c.bf16 %v630_v53, %v622_v52  ;;  %v712_v52 = vld [vmem:[%s10319_s1 + $0x1450] sm:$0xff]  ;;  %v719_v53 = vld [vmem:[%s10319_s1 + $0x1488] sm:$0xff] }
  0x81   :  { %4442 = vmatpush1.bf16.msra.mxu1 %v4441_v62  ;;  %4252 = vmatprep.subr.bf16.mxu0 %v4251_v63  ;;  %v4461_v62 = vpack.c.bf16 %v632_v56, %v624_v54  ;;  %v4271_v63 = vpack.c.bf16 %v647_v58, %v639_v57  ;;  %v727_v54 = vld [vmem:[%s10319_s1 + $0x14c8] sm:$0xff]  ;;  %v729_v56 = vld [vmem:[%s10319_s1 + $0x14d8] sm:$0xff] }
  0x82   :  { %4444 = vmatprep.subr.bf16.mxu1 %v4443_v3  ;;  %v4463_v3 = vpack.c.bf16 %v649_v60, %v641_v59  ;;  %v4291_v59 = vpack.c.bf16 %v727_v54, %v719_v53  ;;  %v718_v60 = vld [vmem:[%s10319_s1 + $0x1480] sm:$0xff] }
  0x84   :  { %4254 = vmatpush1.bf16.msra.mxu0 %v4253_v9  ;;  %v4273_v9 = vpack.c.bf16 %v646_v1, %v638_v0  ;;  %v728_v0 = vld [vmem:[%s10319_s1 + $0x14d0] sm:$0xff]  ;;  %v735_v1 = vld [vmem:[%s10319_s1 + $0x1508] sm:$0xff] }
  0x85   :  { %4446 = vmatpush1.bf16.msra.mxu1 %v4445_v10  ;;  %4256 = vmatprep.subr.bf16.mxu0 %v4255_v11  ;;  %v4465_v10 = vpack.c.bf16 %v648_v4, %v640_v2  ;;  %v4275_v11 = vpack.c.bf16 %v663_v6, %v655_v5  ;;  %v743_v2 = vld [vmem:[%s10319_s1 + $0x1548] sm:$0xff]  ;;  %v745_v4 = vld [vmem:[%s10319_s1 + $0x1558] sm:$0xff] }
  0x86   :  { %4448 = vmatprep.subr.bf16.mxu1 %v4447_v15  ;;  %v4467_v15 = vpack.c.bf16 %v665_v8, %v657_v7  ;;  %v4295_v7 = vpack.c.bf16 %v743_v2, %v735_v1  ;;  %v734_v8 = vld [vmem:[%s10319_s1 + $0x1500] sm:$0xff] }
  0x87   :  { %1014 = vmatmul.mubr.f32.vlgmr.msra.gmra.mrb[0].mxu0 %v52_v21 }
  0x88   :  { %4258 = vmatpush1.bf16.msra.mxu0 %v4257_v22  ;;  %1245 = vmatmul.mubr.f32.vlgmr.msra.gmra.mrb[0].mxu1 %v52_v21  ;;  %v4277_v21 = vpack.c.bf16 %v662_v13, %v654_v12  ;;  %v4469_v22 = vpack.c.bf16 %v664_v16, %v656_v14  ;;  %v744_v12 = vld [vmem:[%s10319_s1 + $0x1550] sm:$0xff]  ;;  %v751_v13 = vld [vmem:[%s10319_s1 + $0x1588] sm:$0xff]  ;;  %v761_v16 = vld [vmem:[%s10319_s1 + $0x15d8] sm:$0xff] }
  0x89   :  { %4450 = vmatpush1.bf16.msra.mxu1 %v4449_v23  ;;  %4260 = vmatprep.subr.bf16.mxu0 %v4259_v24  ;;  %v4279_v23 = vpack.c.bf16 %v679_v18, %v671_v17  ;;  %v670_v24 = vld [vmem:[%s10319_s1 + $0x1300] sm:$0xff]  ;;  %v759_v14 = vld [vmem:[%s10319_s1 + $0x15c8] sm:$0xff] }
  0x8a   :  { %4452 = vmatprep.subr.bf16.mxu1 %v4451_v28  ;;  %1019 = vmatprep.mubr.f32.mxu0 %v59_v34  ;;  %v680_v28 = vld [vmem:[%s10319_s1 + $0x1350] sm:$0xff]  ;;  %v4281_v33 = vpack.c.bf16 %v678_v25, %v670_v24  ;;  %v4299_v19 = vpack.c.bf16 %v759_v14, %v751_v13  ;;  %v767_v25 = vld [vmem:[%s10319_s1 + $0x1608] sm:$0xff] }
  0x8b   :  { %1250 = vmatprep.mubr.f32.mxu1 %v59_v34  ;;  %1020 = vmatmul.mubr.f32.gmra.mrb[2].mxu0 %v58_v36  ;;  %v4473_v34 = vpack.c.bf16 %v680_v28, %v672_v26  ;;  %v760_v24 = vld [vmem:[%s10319_s1 + $0x15d0] sm:$0xff]  ;;  %v775_v26 = vld [vmem:[%s10319_s1 + $0x1648] sm:$0xff]  ;;  %v777_v28 = vld [vmem:[%s10319_s1 + $0x1658] sm:$0xff] }
  0x8c   :  { %4262 = vmatpush1.bf16.msra.mxu0 %v4261_v35  ;;  %1251 = vmatmul.mubr.f32.gmra.mrb[2].mxu1 %v58_v36  ;;  %v4283_v35 = vpack.c.bf16 %v695_v30, %v687_v29  ;;  %v686_v36 = vld [vmem:[%s10319_s1 + $0x1380] sm:$0xff]  ;;  %v4303_v31 = vpack.c.bf16 %v775_v26, %v767_v25  ;;  %v61_v25 = vld [vmem:[%s10318_s0 + $0x58] sm:$0xff] }
  0x8d   :  { %4454 = vmatpush1.bf16.msra.mxu1 %v4453_v37  ;;  %4264 = vmatprep.subr.bf16.mxu0 %v4263_v38  ;;  %v694_v37 = vld [vmem:[%s10319_s1 + $0x13c0] sm:$0xff]  ;;  %v688_v38 = vld [vmem:[%s10319_s1 + $0x1390] sm:$0xff]  ;;  %v85_v26 = vld [vmem:[%s10319_s1 + $0xb8] sm:$0xff] }
  0x8e   :  { %4456 = vmatprep.subr.bf16.mxu1 %v4455_v42  ;;  %1090 = vmatprep.mubr.f32.mxu0 %v55_v48  ;;  %v711_v42 = vld [vmem:[%s10319_s1 + $0x1448] sm:$0xff]  ;;  %v4285_v45 = vpack.c.bf16 %v694_v37, %v686_v36  ;;  %v4477_v46 = vpack.c.bf16 %v696_v40, %v688_v38  ;;  %v776_v36 = vld [vmem:[%s10319_s1 + $0x1650] sm:$0xff]  ;;  %v793_v40 = vld [vmem:[%s10319_s1 + $0x16d8] sm:$0xff] }
  0x8f   :  { %1321 = vmatprep.mubr.f32.mxu1 %v55_v48  ;;  %v4287_v47 = vpack.c.bf16 %v711_v42, %v703_v41  ;;  %v702_v48 = vld [vmem:[%s10319_s1 + $0x1400] sm:$0xff]  ;;  %v783_v37 = vld [vmem:[%s10319_s1 + $0x1688] sm:$0xff] }
  0x90   :  { %4266 = vmatpush1.bf16.msra.mxu0 %v4265_v49  ;;  %v710_v49 = vld [vmem:[%s10319_s1 + $0x1440] sm:$0xff]  ;;  %v791_v38 = vld [vmem:[%s10319_s1 + $0x16c8] sm:$0xff] }
  0x91   :  { %4458 = vmatpush1.bf16.msra.mxu1 %v4457_v50  ;;  %4268 = vmatprep.subr.bf16.mxu0 %v4267_v51  ;;  %v704_v50 = vld [vmem:[%s10319_s1 + $0x1410] sm:$0xff]  ;;  %v4479_v51 = vpack.c.bf16 %v713_v44, %v705_v43  ;;  %v4289_v57 = vpack.c.bf16 %v710_v49, %v702_v48  ;;  %v4307_v43 = vpack.c.bf16 %v791_v38, %v783_v37  ;;  %v782_v44 = vld [vmem:[%s10319_s1 + $0x1680] sm:$0xff]  ;;  %v799_v49 = vld [vmem:[%s10319_s1 + $0x1708] sm:$0xff] }
  0x92   :  { %4460 = vmatprep.subr.bf16.mxu1 %v4459_v55  ;;  %v721_v55 = vld [vmem:[%s10319_s1 + $0x1498] sm:$0xff]  ;;  %v4481_v58 = vpack.c.bf16 %v712_v52, %v704_v50  ;;  %v792_v48 = vld [vmem:[%s10319_s1 + $0x16d0] sm:$0xff]  ;;  %v807_v50 = vld [vmem:[%s10319_s1 + $0x1748] sm:$0xff] }
  0x93   :  { %v809_v52 = vld [vmem:[%s10319_s1 + $0x1758] sm:$0xff] }
  0x94   :  { %4270 = vmatpush1.bf16.msra.mxu0 %v4269_v61  ;;  %v726_v61 = vld [vmem:[%s10319_s1 + $0x14c0] sm:$0xff]  ;;  %v101_v37 = vld [vmem:[%s10319_s1 + $0x138] sm:$0xff] }
  0x95   :  { %4462 = vmatpush1.bf16.msra.mxu1 %v4461_v62  ;;  %4272 = vmatprep.subr.bf16.mxu0 %v4271_v63  ;;  %v720_v62 = vld [vmem:[%s10319_s1 + $0x1490] sm:$0xff]  ;;  %v4483_v63 = vpack.c.bf16 %v729_v56, %v721_v55  ;;  %v4293_v5 = vpack.c.bf16 %v726_v61, %v718_v60  ;;  %v4311_v55 = vpack.c.bf16 %v807_v50, %v799_v49  ;;  %v798_v56 = vld [vmem:[%s10319_s1 + $0x1700] sm:$0xff]  ;;  %v815_v61 = vld [vmem:[%s10319_s1 + $0x1788] sm:$0xff] }
  0x96   :  { %4464 = vmatprep.subr.bf16.mxu1 %v4463_v3  ;;  %v737_v3 = vld [vmem:[%s10319_s1 + $0x1518] sm:$0xff]  ;;  %v4485_v6 = vpack.c.bf16 %v728_v0, %v720_v62  ;;  %v808_v60 = vld [vmem:[%s10319_s1 + $0x1750] sm:$0xff]  ;;  %v823_v62 = vld [vmem:[%s10319_s1 + $0x17c8] sm:$0xff] }
  0x97   :  { %v825_v0 = vld [vmem:[%s10319_s1 + $0x17d8] sm:$0xff]  ;;  %v123_v49 = vld [vmem:[%s10319_s1 + $0x1e8] sm:$0xff] }
  0x98   :  { %4274 = vmatpush1.bf16.msra.mxu0 %v4273_v9  ;;  %v742_v9 = vld [vmem:[%s10319_s1 + $0x1540] sm:$0xff]  ;;  %v109_v38 = vld [vmem:[%s10319_s1 + $0x178] sm:$0xff] }
  0x99   :  { %4466 = vmatpush1.bf16.msra.mxu1 %v4465_v10  ;;  %4276 = vmatprep.subr.bf16.mxu0 %v4275_v11  ;;  %v736_v10 = vld [vmem:[%s10319_s1 + $0x1510] sm:$0xff]  ;;  %v4487_v11 = vpack.c.bf16 %v745_v4, %v737_v3  ;;  %v4297_v17 = vpack.c.bf16 %v742_v9, %v734_v8  ;;  %v4315_v3 = vpack.c.bf16 %v823_v62, %v815_v61  ;;  %v814_v4 = vld [vmem:[%s10319_s1 + $0x1780] sm:$0xff]  ;;  %v67_v9 = vld [vmem:[%s10319_s1 + $0x28] sm:$0xff] }
  0x9a   :  { %4468 = vmatprep.subr.bf16.mxu1 %v4467_v15  ;;  %v753_v15 = vld [vmem:[%s10319_s1 + $0x1598] sm:$0xff]  ;;  %v4489_v18 = vpack.c.bf16 %v744_v12, %v736_v10  ;;  %v824_v8 = vld [vmem:[%s10319_s1 + $0x17d0] sm:$0xff]  ;;  %v75_v10 = vld [vmem:[%s10319_s1 + $0x68] sm:$0xff] }
  0x9b   :  { %v77_v12 = vld [vmem:[%s10319_s1 + $0x78] sm:$0xff]  ;;  %v139_v61 = vld [vmem:[%s10319_s1 + $0x268] sm:$0xff] }
  0x9c   :  { %4278 = vmatpush1.bf16.msra.mxu0 %v4277_v21  ;;  %v758_v21 = vld [vmem:[%s10319_s1 + $0x15c0] sm:$0xff]  ;;  %v117_v50 = vld [vmem:[%s10319_s1 + $0x1b8] sm:$0xff]  ;;  %v6147_v62 = vld [vmem:[%s10318_s0 + $0x8] sm:$0xff] }
  0x9d   :  { %4470 = vmatpush1.bf16.msra.mxu1 %v4469_v22  ;;  %4280 = vmatprep.subr.bf16.mxu0 %v4279_v23  ;;  %v752_v22 = vld [vmem:[%s10319_s1 + $0x1590] sm:$0xff]  ;;  %v4491_v23 = vpack.c.bf16 %v761_v16, %v753_v15  ;;  %v4301_v29 = vpack.c.bf16 %v758_v21, %v750_v20  ;;  %v4511_v15 = vpack.c.bf16 %v75_v10, %v67_v9  ;;  %v66_v16 = vld [vmem:[%s10319_s1 + $0x20] sm:$0xff]  ;;  %v147_v9 = vld [vmem:[%s10319_s1 + $0x2a8] sm:$0xff] }
  0x9e   :  { %4472 = vmatprep.subr.bf16.mxu1 %v4471_v27  ;;  %v769_v27 = vld [vmem:[%s10319_s1 + $0x1618] sm:$0xff]  ;;  %v4493_v30 = vpack.c.bf16 %v760_v24, %v752_v22  ;;  %v76_v20 = vld [vmem:[%s10319_s1 + $0x70] sm:$0xff]  ;;  %v54_v21 = vld [vmem:[%s10318_s0 + $0x20] sm:$0xff] }
  0x9f   :  { %v83_v22 = vld [vmem:[%s10319_s1 + $0xa8] sm:$0xff] }
  0xa0   :  { %4282 = vmatpush1.bf16.msra.mxu0 %v4281_v33  ;;  %v774_v33 = vld [vmem:[%s10319_s1 + $0x1640] sm:$0xff]  ;;  %v155_v10 = vld [vmem:[%s10319_s1 + $0x2e8] sm:$0xff] }
  0xa1   :  { %4474 = vmatpush1.bf16.msra.mxu1 %v4473_v34  ;;  %4284 = vmatprep.subr.bf16.mxu0 %v4283_v35  ;;  %v768_v34 = vld [vmem:[%s10319_s1 + $0x1610] sm:$0xff]  ;;  %v4495_v35 = vpack.c.bf16 %v777_v28, %v769_v27  ;;  %v4305_v41 = vpack.c.bf16 %v774_v33, %v766_v32  ;;  %v93_v27 = vld [vmem:[%s10319_s1 + $0xf8] sm:$0xff] }
  0xa2   :  { %4476 = vmatprep.subr.bf16.mxu1 %v4475_v39  ;;  %v785_v39 = vld [vmem:[%s10319_s1 + $0x1698] sm:$0xff]  ;;  %v4497_v42 = vpack.c.bf16 %v776_v36, %v768_v34  ;;  %v92_v33 = vld [vmem:[%s10319_s1 + $0xf0] sm:$0xff]  ;;  %v99_v34 = vld [vmem:[%s10319_s1 + $0x128] sm:$0xff]  ;;  %v4707_v36 = vpack.c.bf16 %v93_v27, %v85_v26 }
  0xa4   :  { %4286 = vmatpush1.bf16.msra.mxu0 %v4285_v45  ;;  %v790_v45 = vld [vmem:[%s10319_s1 + $0x16c0] sm:$0xff] }
  0xa5   :  { %4478 = vmatpush1.bf16.msra.mxu1 %v4477_v46  ;;  %4288 = vmatprep.subr.bf16.mxu0 %v4287_v47  ;;  %v784_v46 = vld [vmem:[%s10319_s1 + $0x1690] sm:$0xff]  ;;  %v4499_v47 = vpack.c.bf16 %v793_v40, %v785_v39  ;;  %v4309_v53 = vpack.c.bf16 %v790_v45, %v782_v44  ;;  %v106_v44 = vld [vmem:[%s10319_s1 + $0x160] sm:$0xff] }
  0xa6   :  { %4480 = vmatprep.subr.bf16.mxu1 %v4479_v51  ;;  %v801_v51 = vld [vmem:[%s10319_s1 + $0x1718] sm:$0xff]  ;;  %v4501_v54 = vpack.c.bf16 %v792_v48, %v784_v46  ;;  %v60_v39 = vld [vmem:[%s10318_s0 + $0x50] sm:$0xff]  ;;  %v4711_v46 = vpack.c.bf16 %v109_v38, %v101_v37  ;;  %v115_v48 = vld [vmem:[%s10319_s1 + $0x1a8] sm:$0xff] }
  0xa7   :  { %v100_v45 = vld [vmem:[%s10319_s1 + $0x130] sm:$0xff] }
  0xa8   :  { %4290 = vmatpush1.bf16.msra.mxu0 %v4289_v57  ;;  %v806_v57 = vld [vmem:[%s10319_s1 + $0x1740] sm:$0xff] }
  0xa9   :  { %4482 = vmatpush1.bf16.msra.mxu1 %v4481_v58  ;;  %4292 = vmatprep.subr.bf16.mxu0 %v4291_v59  ;;  %v800_v58 = vld [vmem:[%s10319_s1 + $0x1710] sm:$0xff]  ;;  %v4503_v59 = vpack.c.bf16 %v809_v52, %v801_v51  ;;  %v4313_v1 = vpack.c.bf16 %v806_v57, %v798_v56  ;;  %v125_v51 = vld [vmem:[%s10319_s1 + $0x1f8] sm:$0xff]  ;;  %v122_v56 = vld [vmem:[%s10319_s1 + $0x1e0] sm:$0xff] }
  0xaa   :  { %4484 = vmatprep.subr.bf16.mxu1 %v4483_v63  ;;  %v817_v63 = vld [vmem:[%s10319_s1 + $0x1798] sm:$0xff]  ;;  %v4505_v2 = vpack.c.bf16 %v808_v60, %v800_v58  ;;  %v116_v57 = vld [vmem:[%s10319_s1 + $0x1b0] sm:$0xff]  ;;  %v4715_v58 = vpack.c.bf16 %v125_v51, %v117_v50  ;;  %v131_v60 = vld [vmem:[%s10319_s1 + $0x228] sm:$0xff] }
  0xac   :  { %4294 = vmatpush1.bf16.msra.mxu0 %v4293_v5  ;;  %v822_v5 = vld [vmem:[%s10319_s1 + $0x17c0] sm:$0xff] }
  0xad   :  { %4486 = vmatpush1.bf16.msra.mxu1 %v4485_v6  ;;  %4296 = vmatprep.subr.bf16.mxu0 %v4295_v7  ;;  %v816_v6 = vld [vmem:[%s10319_s1 + $0x1790] sm:$0xff]  ;;  %v4507_v7 = vpack.c.bf16 %v825_v0, %v817_v63  ;;  %v4317_v13 = vpack.c.bf16 %v822_v5, %v814_v4  ;;  %v133_v63 = vld [vmem:[%s10319_s1 + $0x238] sm:$0xff]  ;;  %v130_v4 = vld [vmem:[%s10319_s1 + $0x220] sm:$0xff] }
  0xae   :  { %4488 = vmatprep.subr.bf16.mxu1 %v4487_v11  ;;  %v69_v11 = vld [vmem:[%s10319_s1 + $0x38] sm:$0xff]  ;;  %v4509_v14 = vpack.c.bf16 %v824_v8, %v816_v6  ;;  %v138_v5 = vld [vmem:[%s10319_s1 + $0x260] sm:$0xff]  ;;  %v132_v6 = vld [vmem:[%s10319_s1 + $0x230] sm:$0xff] }
  0xaf   :  { %v141_v0 = vld [vmem:[%s10319_s1 + $0x278] sm:$0xff]  ;;  %v140_v8 = vld [vmem:[%s10319_s1 + $0x270] sm:$0xff] }
  0xb0   :  { %4298 = vmatpush1.bf16.msra.mxu0 %v4297_v17  ;;  %v74_v17 = vld [vmem:[%s10319_s1 + $0x60] sm:$0xff] }
  0xb1   :  { %4490 = vmatpush1.bf16.msra.mxu1 %v4489_v18  ;;  %4300 = vmatprep.subr.bf16.mxu0 %v4299_v19  ;;  %v4703_v18 = vpack.c.bf16 %v77_v12, %v69_v11  ;;  %v68_v19 = vld [vmem:[%s10319_s1 + $0x30] sm:$0xff]  ;;  %v4513_v24 = vpack.c.bf16 %v74_v17, %v66_v16  ;;  %v149_v11 = vld [vmem:[%s10319_s1 + $0x2b8] sm:$0xff]  ;;  %v146_v16 = vld [vmem:[%s10319_s1 + $0x2a0] sm:$0xff] }
  0xb2   :  { %4492 = vmatprep.subr.bf16.mxu1 %v4491_v23  ;;  %v91_v23 = vld [vmem:[%s10319_s1 + $0xe8] sm:$0xff]  ;;  %v4705_v28 = vpack.c.bf16 %v76_v20, %v68_v19  ;;  %v157_v12 = vld [vmem:[%s10319_s1 + $0x2f8] sm:$0xff]  ;;  %v154_v17 = vld [vmem:[%s10319_s1 + $0x2e0] sm:$0xff] }
  0xb3   :  { %v4515_v32 = vpack.c.bf16 %v91_v23, %v83_v22  ;;  %v4723_v19 = vpack.c.bf16 %v157_v12, %v149_v11  ;;  %v156_v20 = vld [vmem:[%s10319_s1 + $0x2f0] sm:$0xff]  ;;  %v171_v22 = vld [vmem:[%s10319_s1 + $0x368] sm:$0xff]  ;;  %v165_v23 = vld [vmem:[%s10319_s1 + $0x338] sm:$0xff] }
  0xb4   :  { %4302 = vmatpush1.bf16.msra.mxu0 %v4301_v29  ;;  %v82_v29 = vld [vmem:[%s10319_s1 + $0xa0] sm:$0xff] }
  0xb5   :  { %4494 = vmatpush1.bf16.msra.mxu1 %v4493_v30  ;;  %4304 = vmatprep.subr.bf16.mxu0 %v4303_v31  ;;  %v90_v30 = vld [vmem:[%s10319_s1 + $0xe0] sm:$0xff]  ;;  %v84_v31 = vld [vmem:[%s10319_s1 + $0xb0] sm:$0xff] }
  0xb6   :  { %4496 = vmatprep.subr.bf16.mxu1 %v4495_v35  ;;  %v107_v35 = vld [vmem:[%s10319_s1 + $0x168] sm:$0xff]  ;;  %v4517_v40 = vpack.c.bf16 %v90_v30, %v82_v29  ;;  %v170_v29 = vld [vmem:[%s10319_s1 + $0x360] sm:$0xff]  ;;  %v164_v30 = vld [vmem:[%s10319_s1 + $0x330] sm:$0xff] }
  0xb7   :  { %v226_v12 = vld [vmem:[%s10319_s1 + $0x520] sm:$0xff] }
  0xb8   :  { %4306 = vmatpush1.bf16.msra.mxu0 %v4305_v41  ;;  %v4709_v41 = vpack.c.bf16 %v92_v33, %v84_v31  ;;  %v179_v33 = vld [vmem:[%s10319_s1 + $0x3a8] sm:$0xff] }
  0xb9   :  { %4498 = vmatpush1.bf16.msra.mxu1 %v4497_v42  ;;  %4308 = vmatprep.subr.bf16.mxu0 %v4307_v43  ;;  %v4519_v42 = vpack.c.bf16 %v107_v35, %v99_v34  ;;  %v98_v43 = vld [vmem:[%s10319_s1 + $0x120] sm:$0xff]  ;;  %v187_v34 = vld [vmem:[%s10319_s1 + $0x3e8] sm:$0xff]  ;;  %v181_v35 = vld [vmem:[%s10319_s1 + $0x3b8] sm:$0xff] }
  0xba   :  { %4500 = vmatprep.subr.bf16.mxu1 %v4499_v47  ;;  %v108_v47 = vld [vmem:[%s10319_s1 + $0x170] sm:$0xff]  ;;  %v4521_v52 = vpack.c.bf16 %v106_v44, %v98_v43 }
  0xbb   :  { %v188_v44 = vld [vmem:[%s10319_s1 + $0x3f0] sm:$0xff] }
  0xbc   :  { %4310 = vmatpush1.bf16.msra.mxu0 %v4309_v53  ;;  %v4713_v53 = vpack.c.bf16 %v108_v47, %v100_v45  ;;  %v195_v45 = vld [vmem:[%s10319_s1 + $0x428] sm:$0xff]  ;;  %v197_v47 = vld [vmem:[%s10319_s1 + $0x438] sm:$0xff] }
  0xbd   :  { %4502 = vmatpush1.bf16.msra.mxu1 %v4501_v54  ;;  %4312 = vmatprep.subr.bf16.mxu0 %v4311_v55  ;;  %v4523_v54 = vpack.c.bf16 %v123_v49, %v115_v48  ;;  %v114_v55 = vld [vmem:[%s10319_s1 + $0x1a0] sm:$0xff]  ;;  %v205_v48 = vld [vmem:[%s10319_s1 + $0x478] sm:$0xff] }
  0xbe   :  { %4504 = vmatprep.subr.bf16.mxu1 %v4503_v59  ;;  %v124_v59 = vld [vmem:[%s10319_s1 + $0x1f0] sm:$0xff] }
  0xc0   :  { %4314 = vmatpush1.bf16.msra.mxu0 %v4313_v1  ;;  %v4525_v1 = vpack.c.bf16 %v122_v56, %v114_v55  ;;  %v4735_v55 = vpack.c.bf16 %v205_v48, %v197_v47  ;;  %v204_v56 = vld [vmem:[%s10319_s1 + $0x470] sm:$0xff]  ;;  %v274_v48 = vld [vmem:[%s10319_s1 + $0x6a0] sm:$0xff] }
  0xc1   :  { %4506 = vmatpush1.bf16.msra.mxu1 %v4505_v2  ;;  %4316 = vmatprep.subr.bf16.mxu0 %v4315_v3  ;;  %v4717_v2 = vpack.c.bf16 %v124_v59, %v116_v57  ;;  %v4527_v3 = vpack.c.bf16 %v139_v61, %v131_v60  ;;  %v211_v57 = vld [vmem:[%s10319_s1 + $0x4a8] sm:$0xff]  ;;  %v213_v59 = vld [vmem:[%s10319_s1 + $0x4b8] sm:$0xff] }
  0xc2   :  { %4508 = vmatprep.subr.bf16.mxu1 %v4507_v7  ;;  %v4719_v7 = vpack.c.bf16 %v141_v0, %v133_v63  ;;  %v221_v60 = vld [vmem:[%s10319_s1 + $0x4f8] sm:$0xff]  ;;  %v210_v0 = vld [vmem:[%s10319_s1 + $0x4a0] sm:$0xff] }
  0xc4   :  { %4318 = vmatpush1.bf16.msra.mxu0 %v4317_v13  ;;  %v4529_v13 = vpack.c.bf16 %v138_v5, %v130_v4  ;;  %v220_v4 = vld [vmem:[%s10319_s1 + $0x4f0] sm:$0xff]  ;;  %v227_v5 = vld [vmem:[%s10319_s1 + $0x528] sm:$0xff] }
  0xc5   :  { %4510 = vmatpush1.bf16.msra.mxu1 %v4509_v14  ;;  %4512 = vmatprep.subr.bf16.mxu0 %v4511_v15  ;;  %v4721_v14 = vpack.c.bf16 %v140_v8, %v132_v6  ;;  %v4531_v15 = vpack.c.bf16 %v155_v10, %v147_v9  ;;  %v235_v6 = vld [vmem:[%s10319_s1 + $0x568] sm:$0xff]  ;;  %v237_v8 = vld [vmem:[%s10319_s1 + $0x578] sm:$0xff] }
  0xc6   :  { %4704 = vmatprep.subr.bf16.mxu1 %v4703_v18  ;;  %v148_v18 = vld [vmem:[%s10319_s1 + $0x2b0] sm:$0xff]  ;;  %v4551_v11 = vpack.c.bf16 %v235_v6, %v227_v5 }
  0xc7   :  { %1091 = vmatmul.mubr.f32.vlgmr.msra.gmra.mrb[0].mxu0 %v54_v21  ;;  %v4725_v26 = vpack.c.bf16 %v156_v20, %v148_v18  ;;  %v251_v18 = vld [vmem:[%s10319_s1 + $0x5e8] sm:$0xff]  ;;  %v253_v20 = vld [vmem:[%s10319_s1 + $0x5f8] sm:$0xff] }
  0xc8   :  { %1322 = vmatmul.mubr.f32.vlgmr.msra.gmra.mrb[0].mxu1 %v54_v21  ;;  %4514 = vmatpush1.bf16.msra.mxu0 %v4513_v24  ;;  %v163_v21 = vld [vmem:[%s10319_s1 + $0x328] sm:$0xff]  ;;  %v173_v24 = vld [vmem:[%s10319_s1 + $0x378] sm:$0xff] }
  0xc9   :  { %4706 = vmatpush1.bf16.msra.mxu1 %v4705_v28  ;;  %1096 = vmatprep.mubr.f32.mxu0 %v61_v25  ;;  %v4535_v27 = vpack.c.bf16 %v171_v22, %v163_v21  ;;  %v162_v28 = vld [vmem:[%s10319_s1 + $0x320] sm:$0xff]  ;;  %v4727_v31 = vpack.c.bf16 %v173_v24, %v165_v23 }
  0xca   :  { %1327 = vmatprep.mubr.f32.mxu1 %v61_v25  ;;  %4516 = vmatprep.subr.bf16.mxu0 %v4515_v32  ;;  %v4533_v25 = vpack.c.bf16 %v154_v17, %v146_v16  ;;  %v172_v32 = vld [vmem:[%s10319_s1 + $0x370] sm:$0xff]  ;;  %v4537_v37 = vpack.c.bf16 %v170_v29, %v162_v28  ;;  %v243_v17 = vld [vmem:[%s10319_s1 + $0x5a8] sm:$0xff]  ;;  %v242_v24 = vld [vmem:[%s10319_s1 + $0x5a0] sm:$0xff] }
  0xcb   :  { %1097 = vmatmul.mubr.f32.gmra.mrb[2].mxu0 %v60_v39  ;;  %4708 = vmatprep.subr.bf16.mxu1 %v4707_v36  ;;  %v189_v36 = vld [vmem:[%s10319_s1 + $0x3f8] sm:$0xff]  ;;  %v4729_v38 = vpack.c.bf16 %v172_v32, %v164_v30  ;;  %v236_v16 = vld [vmem:[%s10319_s1 + $0x570] sm:$0xff]  ;;  %v4555_v23 = vpack.c.bf16 %v251_v18, %v243_v17  ;;  %v259_v29 = vld [vmem:[%s10319_s1 + $0x628] sm:$0xff] }
  0xcc   :  { %1328 = vmatmul.mubr.f32.gmra.mrb[2].mxu1 %v60_v39  ;;  %4518 = vmatpush1.bf16.msra.mxu0 %v4517_v40  ;;  %v4539_v39 = vpack.c.bf16 %v187_v34, %v179_v33  ;;  %v178_v40 = vld [vmem:[%s10319_s1 + $0x3a0] sm:$0xff]  ;;  %v4731_v43 = vpack.c.bf16 %v189_v36, %v181_v35  ;;  %v252_v28 = vld [vmem:[%s10319_s1 + $0x5f0] sm:$0xff]  ;;  %v267_v30 = vld [vmem:[%s10319_s1 + $0x668] sm:$0xff] }
  0xcd   :  { %4710 = vmatpush1.bf16.msra.mxu1 %v4709_v41  ;;  %4520 = vmatprep.subr.bf16.mxu0 %v4519_v42  ;;  %v186_v41 = vld [vmem:[%s10319_s1 + $0x3e0] sm:$0xff]  ;;  %v180_v42 = vld [vmem:[%s10319_s1 + $0x3b0] sm:$0xff]  ;;  %v269_v32 = vld [vmem:[%s10319_s1 + $0x678] sm:$0xff]  ;;  %v4559_v35 = vpack.c.bf16 %v267_v30, %v259_v29 }
  0xce   :  { %4712 = vmatprep.subr.bf16.mxu1 %v4711_v46  ;;  %1398 = vmatprep.mubr.f32.mxu0 %v6147_v62  ;;  %v203_v46 = vld [vmem:[%s10319_s1 + $0x468] sm:$0xff]  ;;  %v4541_v49 = vpack.c.bf16 %v186_v41, %v178_v40  ;;  %v4733_v50 = vpack.c.bf16 %v188_v44, %v180_v42  ;;  %v258_v36 = vld [vmem:[%s10319_s1 + $0x620] sm:$0xff]  ;;  %v268_v40 = vld [vmem:[%s10319_s1 + $0x670] sm:$0xff] }
  0xcf   :  { %1629 = vmatprep.mubr.f32.mxu1 %v6147_v62  ;;  %v4543_v51 = vpack.c.bf16 %v203_v46, %v195_v45  ;;  %v275_v41 = vld [vmem:[%s10319_s1 + $0x6a8] sm:$0xff]  ;;  %v285_v44 = vld [vmem:[%s10319_s1 + $0x6f8] sm:$0xff] }
  0xd0   :  { %4522 = vmatpush1.bf16.msra.mxu0 %v4521_v52  ;;  %v194_v52 = vld [vmem:[%s10319_s1 + $0x420] sm:$0xff]  ;;  %v283_v42 = vld [vmem:[%s10319_s1 + $0x6e8] sm:$0xff] }
  0xd1   :  { %4714 = vmatpush1.bf16.msra.mxu1 %v4713_v53  ;;  %4524 = vmatprep.subr.bf16.mxu0 %v4523_v54  ;;  %v202_v53 = vld [vmem:[%s10319_s1 + $0x460] sm:$0xff]  ;;  %v196_v54 = vld [vmem:[%s10319_s1 + $0x430] sm:$0xff]  ;;  %v4563_v47 = vpack.c.bf16 %v283_v42, %v275_v41  ;;  %v365_v41 = vld [vmem:[%s10319_s1 + $0x978] sm:$0xff] }
  0xd2   :  { %4716 = vmatprep.subr.bf16.mxu1 %v4715_v58  ;;  %v219_v58 = vld [vmem:[%s10319_s1 + $0x4e8] sm:$0xff]  ;;  %v4545_v61 = vpack.c.bf16 %v202_v53, %v194_v52  ;;  %v4737_v62 = vpack.c.bf16 %v204_v56, %v196_v54  ;;  %v284_v52 = vld [vmem:[%s10319_s1 + $0x6f0] sm:$0xff]  ;;  %v301_v56 = vld [vmem:[%s10319_s1 + $0x778] sm:$0xff] }
  0xd3   :  { %v4547_v63 = vpack.c.bf16 %v219_v58, %v211_v57  ;;  %v291_v53 = vld [vmem:[%s10319_s1 + $0x728] sm:$0xff] }
  0xd4   :  { %4526 = vmatpush1.bf16.msra.mxu0 %v4525_v1  ;;  %v218_v1 = vld [vmem:[%s10319_s1 + $0x4e0] sm:$0xff]  ;;  %v299_v54 = vld [vmem:[%s10319_s1 + $0x768] sm:$0xff] }
  0xd5   :  { %4718 = vmatpush1.bf16.msra.mxu1 %v4717_v2  ;;  %4528 = vmatprep.subr.bf16.mxu0 %v4527_v3  ;;  %v212_v2 = vld [vmem:[%s10319_s1 + $0x4b0] sm:$0xff]  ;;  %v4739_v3 = vpack.c.bf16 %v221_v60, %v213_v59  ;;  %v4549_v9 = vpack.c.bf16 %v218_v1, %v210_v0  ;;  %v4567_v59 = vpack.c.bf16 %v299_v54, %v291_v53  ;;  %v290_v60 = vld [vmem:[%s10319_s1 + $0x720] sm:$0xff]  ;;  %v307_v1 = vld [vmem:[%s10319_s1 + $0x7a8] sm:$0xff] }
  0xd6   :  { %4720 = vmatprep.subr.bf16.mxu1 %v4719_v7  ;;  %v229_v7 = vld [vmem:[%s10319_s1 + $0x538] sm:$0xff]  ;;  %v4741_v10 = vpack.c.bf16 %v220_v4, %v212_v2  ;;  %v300_v0 = vld [vmem:[%s10319_s1 + $0x770] sm:$0xff]  ;;  %v315_v2 = vld [vmem:[%s10319_s1 + $0x7e8] sm:$0xff] }
  0xd7   :  { %v317_v4 = vld [vmem:[%s10319_s1 + $0x7f8] sm:$0xff] }
  0xd8   :  { %4530 = vmatpush1.bf16.msra.mxu0 %v4529_v13  ;;  %v234_v13 = vld [vmem:[%s10319_s1 + $0x560] sm:$0xff]  ;;  %v373_v53 = vld [vmem:[%s10319_s1 + $0x9b8] sm:$0xff] }
  0xd9   :  { %4722 = vmatpush1.bf16.msra.mxu1 %v4721_v14  ;;  %4532 = vmatprep.subr.bf16.mxu0 %v4531_v15  ;;  %v228_v14 = vld [vmem:[%s10319_s1 + $0x530] sm:$0xff]  ;;  %v4743_v15 = vpack.c.bf16 %v237_v8, %v229_v7  ;;  %v4553_v21 = vpack.c.bf16 %v234_v13, %v226_v12  ;;  %v4571_v7 = vpack.c.bf16 %v315_v2, %v307_v1  ;;  %v306_v8 = vld [vmem:[%s10319_s1 + $0x7a0] sm:$0xff]  ;;  %v323_v13 = vld [vmem:[%s10319_s1 + $0x828] sm:$0xff] }
  0xda   :  { %4724 = vmatprep.subr.bf16.mxu1 %v4723_v19  ;;  %v245_v19 = vld [vmem:[%s10319_s1 + $0x5b8] sm:$0xff]  ;;  %v4745_v22 = vpack.c.bf16 %v236_v16, %v228_v14  ;;  %v316_v12 = vld [vmem:[%s10319_s1 + $0x7f0] sm:$0xff]  ;;  %v331_v14 = vld [vmem:[%s10319_s1 + $0x868] sm:$0xff] }
  0xdb   :  { %v333_v16 = vld [vmem:[%s10319_s1 + $0x878] sm:$0xff]  ;;  %v395_v1 = vld [vmem:[%s10319_s1 + $0xa68] sm:$0xff] }
  0xdc   :  { %4534 = vmatpush1.bf16.msra.mxu0 %v4533_v25  ;;  %v250_v25 = vld [vmem:[%s10319_s1 + $0x5e0] sm:$0xff]  ;;  %v381_v54 = vld [vmem:[%s10319_s1 + $0x9f8] sm:$0xff] }
  0xdd   :  { %4726 = vmatpush1.bf16.msra.mxu1 %v4725_v26  ;;  %4536 = vmatprep.subr.bf16.mxu0 %v4535_v27  ;;  %v244_v26 = vld [vmem:[%s10319_s1 + $0x5b0] sm:$0xff]  ;;  %v4747_v27 = vpack.c.bf16 %v253_v20, %v245_v19  ;;  %v4557_v33 = vpack.c.bf16 %v250_v25, %v242_v24  ;;  %v4575_v19 = vpack.c.bf16 %v331_v14, %v323_v13  ;;  %v322_v20 = vld [vmem:[%s10319_s1 + $0x820] sm:$0xff]  ;;  %v339_v25 = vld [vmem:[%s10319_s1 + $0x8a8] sm:$0xff] }
  0xde   :  { %4728 = vmatprep.subr.bf16.mxu1 %v4727_v31  ;;  %v261_v31 = vld [vmem:[%s10319_s1 + $0x638] sm:$0xff]  ;;  %v4749_v34 = vpack.c.bf16 %v252_v28, %v244_v26  ;;  %v332_v24 = vld [vmem:[%s10319_s1 + $0x870] sm:$0xff]  ;;  %v347_v26 = vld [vmem:[%s10319_s1 + $0x8e8] sm:$0xff] }
  0xdf   :  { %v349_v28 = vld [vmem:[%s10319_s1 + $0x8f8] sm:$0xff] }
  0xe0   :  { %4538 = vmatpush1.bf16.msra.mxu0 %v4537_v37  ;;  %v266_v37 = vld [vmem:[%s10319_s1 + $0x660] sm:$0xff]  ;;  %v6151_v2 = vld [vmem:[%s10318_s0 + $0x18] sm:$0xff] }
  0xe1   :  { %4730 = vmatpush1.bf16.msra.mxu1 %v4729_v38  ;;  %4540 = vmatprep.subr.bf16.mxu0 %v4539_v39  ;;  %v260_v38 = vld [vmem:[%s10319_s1 + $0x630] sm:$0xff]  ;;  %v4751_v39 = vpack.c.bf16 %v269_v32, %v261_v31  ;;  %v4561_v45 = vpack.c.bf16 %v266_v37, %v258_v36  ;;  %v4579_v31 = vpack.c.bf16 %v347_v26, %v339_v25  ;;  %v338_v32 = vld [vmem:[%s10319_s1 + $0x8a0] sm:$0xff]  ;;  %v355_v37 = vld [vmem:[%s10319_s1 + $0x928] sm:$0xff] }
  0xe2   :  { %4732 = vmatprep.subr.bf16.mxu1 %v4731_v43  ;;  %v277_v43 = vld [vmem:[%s10319_s1 + $0x6b8] sm:$0xff]  ;;  %v4753_v46 = vpack.c.bf16 %v268_v40, %v260_v38  ;;  %v348_v36 = vld [vmem:[%s10319_s1 + $0x8f0] sm:$0xff]  ;;  %v363_v38 = vld [vmem:[%s10319_s1 + $0x968] sm:$0xff] }
  0xe3   :  { %v357_v40 = vld [vmem:[%s10319_s1 + $0x938] sm:$0xff] }
  0xe4   :  { %4542 = vmatpush1.bf16.msra.mxu0 %v4541_v49  ;;  %v282_v49 = vld [vmem:[%s10319_s1 + $0x6e0] sm:$0xff] }
  0xe5   :  { %4734 = vmatpush1.bf16.msra.mxu1 %v4733_v50  ;;  %4544 = vmatprep.subr.bf16.mxu0 %v4543_v51  ;;  %v276_v50 = vld [vmem:[%s10319_s1 + $0x6b0] sm:$0xff]  ;;  %v4755_v51 = vpack.c.bf16 %v285_v44, %v277_v43  ;;  %v4565_v57 = vpack.c.bf16 %v282_v49, %v274_v48  ;;  %v4583_v44 = vpack.c.bf16 %v363_v38, %v355_v37 }
  0xe6   :  { %4736 = vmatprep.subr.bf16.mxu1 %v4735_v55  ;;  %v293_v55 = vld [vmem:[%s10319_s1 + $0x738] sm:$0xff]  ;;  %v4757_v58 = vpack.c.bf16 %v284_v52, %v276_v50  ;;  %v4775_v48 = vpack.c.bf16 %v365_v41, %v357_v40  ;;  %v364_v49 = vld [vmem:[%s10319_s1 + $0x970] sm:$0xff]  ;;  %v371_v50 = vld [vmem:[%s10319_s1 + $0x9a8] sm:$0xff] }
  0xe7   :  { %v6149_v52 = vld [vmem:[%s10318_s0 + $0x38] sm:$0xff] }
  0xe8   :  { %4546 = vmatpush1.bf16.msra.mxu0 %v4545_v61  ;;  %v298_v61 = vld [vmem:[%s10319_s1 + $0x760] sm:$0xff] }
  0xe9   :  { %4738 = vmatpush1.bf16.msra.mxu1 %v4737_v62  ;;  %4548 = vmatprep.subr.bf16.mxu0 %v4547_v63  ;;  %v292_v62 = vld [vmem:[%s10319_s1 + $0x730] sm:$0xff]  ;;  %v4759_v63 = vpack.c.bf16 %v301_v56, %v293_v55  ;;  %v4569_v5 = vpack.c.bf16 %v298_v61, %v290_v60  ;;  %v378_v60 = vld [vmem:[%s10319_s1 + $0x9e0] sm:$0xff] }
  0xea   :  { %4740 = vmatprep.subr.bf16.mxu1 %v4739_v3  ;;  %v309_v3 = vld [vmem:[%s10319_s1 + $0x7b8] sm:$0xff]  ;;  %v4761_v6 = vpack.c.bf16 %v300_v0, %v292_v62  ;;  %v6150_v55 = vld [vmem:[%s10318_s0 + $0x30] sm:$0xff]  ;;  %v4779_v62 = vpack.c.bf16 %v381_v54, %v373_v53  ;;  %v387_v0 = vld [vmem:[%s10319_s1 + $0xa28] sm:$0xff] }
  0xeb   :  { %v372_v61 = vld [vmem:[%s10319_s1 + $0x9b0] sm:$0xff] }
  0xec   :  { %4550 = vmatpush1.bf16.msra.mxu0 %v4549_v9  ;;  %v314_v9 = vld [vmem:[%s10319_s1 + $0x7e0] sm:$0xff] }
  0xed   :  { %4742 = vmatpush1.bf16.msra.mxu1 %v4741_v10  ;;  %4552 = vmatprep.subr.bf16.mxu0 %v4551_v11  ;;  %v308_v10 = vld [vmem:[%s10319_s1 + $0x7b0] sm:$0xff]  ;;  %v4763_v11 = vpack.c.bf16 %v317_v4, %v309_v3  ;;  %v4573_v17 = vpack.c.bf16 %v314_v9, %v306_v8  ;;  %v389_v3 = vld [vmem:[%s10319_s1 + $0xa38] sm:$0xff] }
  0xee   :  { %4744 = vmatprep.subr.bf16.mxu1 %v4743_v15  ;;  %v325_v15 = vld [vmem:[%s10319_s1 + $0x838] sm:$0xff]  ;;  %v4765_v18 = vpack.c.bf16 %v316_v12, %v308_v10 }
  0xef   :  { %v397_v4 = vld [vmem:[%s10319_s1 + $0xa78] sm:$0xff] }
  0xf0   :  { %4554 = vmatpush1.bf16.msra.mxu0 %v4553_v21  ;;  %v330_v21 = vld [vmem:[%s10319_s1 + $0x860] sm:$0xff] }
  0xf1   :  { %4746 = vmatpush1.bf16.msra.mxu1 %v4745_v22  ;;  %4556 = vmatprep.subr.bf16.mxu0 %v4555_v23  ;;  %v324_v22 = vld [vmem:[%s10319_s1 + $0x830] sm:$0xff]  ;;  %v4767_v23 = vpack.c.bf16 %v333_v16, %v325_v15  ;;  %v4577_v29 = vpack.c.bf16 %v330_v21, %v322_v20 }
  0xf2   :  { %4748 = vmatprep.subr.bf16.mxu1 %v4747_v27  ;;  %v341_v27 = vld [vmem:[%s10319_s1 + $0x8b8] sm:$0xff]  ;;  %v4769_v30 = vpack.c.bf16 %v332_v24, %v324_v22 }
  0xf4   :  { %4558 = vmatpush1.bf16.msra.mxu0 %v4557_v33  ;;  %v346_v33 = vld [vmem:[%s10319_s1 + $0x8e0] sm:$0xff] }
  0xf5   :  { %4750 = vmatpush1.bf16.msra.mxu1 %v4749_v34  ;;  %4560 = vmatprep.subr.bf16.mxu0 %v4559_v35  ;;  %v340_v34 = vld [vmem:[%s10319_s1 + $0x8b0] sm:$0xff]  ;;  %v4771_v35 = vpack.c.bf16 %v349_v28, %v341_v27  ;;  %v4581_v42 = vpack.c.bf16 %v346_v33, %v338_v32 }
  0xf6   :  { %4752 = vmatprep.subr.bf16.mxu1 %v4751_v39  ;;  %v6148_v39 = vld [vmem:[%s10318_s0] sm:$0xff]  ;;  %v4773_v43 = vpack.c.bf16 %v348_v36, %v340_v34 }
  0xf8   :  { %4562 = vmatpush1.bf16.msra.mxu0 %v4561_v45  ;;  %v354_v45 = vld [vmem:[%s10319_s1 + $0x920] sm:$0xff] }
  0xf9   :  { %4754 = vmatpush1.bf16.msra.mxu1 %v4753_v46  ;;  %4564 = vmatprep.subr.bf16.mxu0 %v4563_v47  ;;  %v362_v46 = vld [vmem:[%s10319_s1 + $0x960] sm:$0xff]  ;;  %v356_v47 = vld [vmem:[%s10319_s1 + $0x930] sm:$0xff] }
  0xfa   :  { %4756 = vmatprep.subr.bf16.mxu1 %v4755_v51  ;;  %v379_v51 = vld [vmem:[%s10319_s1 + $0x9e8] sm:$0xff]  ;;  %v4585_v56 = vpack.c.bf16 %v362_v46, %v354_v45 }
  0xfc   :  { %4566 = vmatpush1.bf16.msra.mxu0 %v4565_v57  ;;  %v4777_v57 = vpack.c.bf16 %v364_v49, %v356_v47 }
  0xfd   :  { %4758 = vmatpush1.bf16.msra.mxu1 %v4757_v58  ;;  %4568 = vmatprep.subr.bf16.mxu0 %v4567_v59  ;;  %v4587_v58 = vpack.c.bf16 %v379_v51, %v371_v50  ;;  %v370_v59 = vld [vmem:[%s10319_s1 + $0x9a0] sm:$0xff] }
  0xfe   :  { %4760 = vmatprep.subr.bf16.mxu1 %v4759_v63  ;;  %v380_v63 = vld [vmem:[%s10319_s1 + $0x9f0] sm:$0xff] }
 0x100   :  { %4570 = vmatpush1.bf16.msra.mxu0 %v4569_v5  ;;  %v4589_v5 = vpack.c.bf16 %v378_v60, %v370_v59 }
 0x101   :  { %4762 = vmatpush1.bf16.msra.mxu1 %v4761_v6  ;;  %4572 = vmatprep.subr.bf16.mxu0 %v4571_v7 }
 0x102   :  { %4764 = vmatprep.subr.bf16.mxu1 %v4763_v11 }
 0x104   :  { %4574 = vmatpush1.bf16.msra.mxu0 %v4573_v17 }
 0x105   :  { %4766 = vmatpush1.bf16.msra.mxu1 %v4765_v18  ;;  %4576 = vmatprep.subr.bf16.mxu0 %v4575_v19 }
 0x106   :  { %4768 = vmatprep.subr.bf16.mxu1 %v4767_v23 }
 0x107   :  { %1399 = vmatmul.mubr.f32.vlgmr.msra.gmra.mrb[4].mxu0 %v6148_v39 }
 0x108   :  { %4578 = vmatpush1.bf16.msra.mxu0 %v4577_v29  ;;  %1630 = vmatmul.mubr.f32.vlgmr.msra.gmra.mrb[4].mxu1 %v6148_v39 }
 0x109   :  { %4770 = vmatpush1.bf16.msra.mxu1 %v4769_v30  ;;  %4580 = vmatprep.subr.bf16.mxu0 %v4579_v31 }
 0x10a   :  { %4772 = vmatprep.subr.bf16.mxu1 %v4771_v35  ;;  %1404 = vmatprep.mubr.f32.mxu0 %v6149_v52 }
 0x10b   :  { %1635 = vmatprep.mubr.f32.mxu1 %v6149_v52  ;;  %1405 = vmatmul.mubr.f32.gmra.mrb[6].mxu0 %v6150_v55 }
 0x10c   :  { %4582 = vmatpush1.bf16.msra.mxu0 %v4581_v42  ;;  %1636 = vmatmul.mubr.f32.gmra.mrb[6].mxu1 %v6150_v55 }
 0x10d   :  { %4774 = vmatpush1.bf16.msra.mxu1 %v4773_v43  ;;  %4584 = vmatprep.subr.bf16.mxu0 %v4583_v44 }
 0x10e   :  { %4776 = vmatprep.subr.bf16.mxu1 %v4775_v48  ;;  %1475 = vmatprep.mubr.f32.mxu0 %v6151_v2 }
 0x10f   :  { %1706 = vmatprep.mubr.f32.mxu1 %v6151_v2 }
 0x110   :  { %4586 = vmatpush1.bf16.msra.mxu0 %v4585_v56 }
 0x111   :  { %25 = vsyncpa [#allocation10], 0  ;;  %4778 = vmatpush1.bf16.msra.mxu1 %v4777_v57  ;;  %4588 = vmatprep.subr.bf16.mxu0 %v4587_v58  ;;  %v4781_v6 = vpack.c.bf16 %v380_v63, %v372_v61  ;;  %v4591_v7 = vpack.c.bf16 %v395_v1, %v387_v0  ;;  %v386_v8 = vld [vmem:[%s10319_s1 + $0xa20] sm:$0xff]  ;;  %v388_v10 = vld [vmem:[%s10319_s1 + $0xa30] sm:$0xff]  ;;  %v4783_v11 = vpack.c.bf16 %v397_v4, %v389_v3  ;;  %vm1808_vm0 = vcmask 1041408  }
 0x112   :  { %v394_v9 = vld [vmem:[%s10319_s1 + $0xa60] sm:$0xff]  ;;  %4780 = vmatprep.subr.bf16.mxu1 %v4779_v62  ;;  %v396_v12 = vld [vmem:[%s10319_s1 + $0xa70] sm:$0xff]  ;;  %v403_v13 = vld [vmem:[%s10319_s1 + $0xaa8] sm:$0xff]  ;;  %vm6230_vm2 = vmmov 1   ;;  %vm3924_vm5 = vcmask 58368   ;;  %vm3932_vm6 = vcmask 1024  }
 0x113   :  { %v411_v14 = vld [vmem:[%s10319_s1 + $0xae8] sm:$0xff]  ;;  %v405_v15 = vld [vmem:[%s10319_s1 + $0xab8] sm:$0xff]  ;;  %v4593_v17 = vpack.c.bf16 %v394_v9, %v386_v8  ;;  %v4785_v18 = vpack.c.bf16 %v396_v12, %v388_v10  ;;  %v402_v20 = vld [vmem:[%s10319_s1 + $0xaa0] sm:$0xff]  ;;  %vm3692_vm7 = vcmask 1043456   ;;  %vm3695_vm8 = vcmask 1045504  }
 0x114   :  { %v413_v16 = vld [vmem:[%s10319_s1 + $0xaf8] sm:$0xff]  ;;  %4590 = vmatpush1.bf16.msra.mxu0 %v4589_v5  ;;  %v4595_v19 = vpack.c.bf16 %v411_v14, %v403_v13  ;;  %v410_v21 = vld [vmem:[%s10319_s1 + $0xae0] sm:$0xff]  ;;  %v404_v22 = vld [vmem:[%s10319_s1 + $0xab0] sm:$0xff]  ;;  %vm3971_vm10 = vcmask 0  }
 0x115   :  { %4782 = vmatpush1.bf16.msra.mxu1 %v4781_v6  ;;  %4592 = vmatprep.subr.bf16.mxu0 %v4591_v7  ;;  %v4787_v23 = vpack.c.bf16 %v413_v16, %v405_v15  ;;  %v412_v24 = vld [vmem:[%s10319_s1 + $0xaf0] sm:$0xff]  ;;  %v419_v25 = vld [vmem:[%s10319_s1 + $0xb28] sm:$0xff]  ;;  %v421_v27 = vld [vmem:[%s10319_s1 + $0xb38] sm:$0xff]  ;;  %v4597_v29 = vpack.c.bf16 %v410_v21, %v402_v20 }
 0x116   :  { %4784 = vmatprep.subr.bf16.mxu1 %v4783_v11  ;;  %v427_v26 = vld [vmem:[%s10319_s1 + $0xb68] sm:$0xff]  ;;  %v429_v28 = vld [vmem:[%s10319_s1 + $0xb78] sm:$0xff]  ;;  %v4789_v30 = vpack.c.bf16 %v412_v24, %v404_v22  ;;  %v418_v32 = vld [vmem:[%s10319_s1 + $0xb20] sm:$0xff] }
 0x117   :  { %v4599_v31 = vpack.c.bf16 %v427_v26, %v419_v25  ;;  %v426_v33 = vld [vmem:[%s10319_s1 + $0xb60] sm:$0xff]  ;;  %v420_v34 = vld [vmem:[%s10319_s1 + $0xb30] sm:$0xff]  ;;  %v4791_v35 = vpack.c.bf16 %v429_v28, %v421_v27  ;;  %v435_v37 = vld [vmem:[%s10319_s1 + $0xba8] sm:$0xff] }
 0x118   :  { %4594 = vmatpush1.bf16.msra.mxu0 %v4593_v17  ;;  %v428_v36 = vld [vmem:[%s10319_s1 + $0xb70] sm:$0xff]  ;;  %v443_v38 = vld [vmem:[%s10319_s1 + $0xbe8] sm:$0xff]  ;;  %v437_v39 = vld [vmem:[%s10319_s1 + $0xbb8] sm:$0xff]  ;;  %v4601_v41 = vpack.c.bf16 %v426_v33, %v418_v32 }
 0x119   :  { %4786 = vmatpush1.bf16.msra.mxu1 %v4785_v18  ;;  %4596 = vmatprep.subr.bf16.mxu0 %v4595_v19  ;;  %v445_v40 = vld [vmem:[%s10319_s1 + $0xbf8] sm:$0xff]  ;;  %v4793_v42 = vpack.c.bf16 %v428_v36, %v420_v34  ;;  %v4603_v43 = vpack.c.bf16 %v443_v38, %v435_v37  ;;  %v434_v44 = vld [vmem:[%s10319_s1 + $0xba0] sm:$0xff]  ;;  %v436_v46 = vld [vmem:[%s10319_s1 + $0xbb0] sm:$0xff] }
 0x11a   :  { %4788 = vmatprep.subr.bf16.mxu1 %v4787_v23  ;;  %v442_v45 = vld [vmem:[%s10319_s1 + $0xbe0] sm:$0xff]  ;;  %v4795_v47 = vpack.c.bf16 %v445_v40, %v437_v39  ;;  %v444_v48 = vld [vmem:[%s10319_s1 + $0xbf0] sm:$0xff]  ;;  %v451_v49 = vld [vmem:[%s10319_s1 + $0xc28] sm:$0xff] }
 0x11b   :  { %v459_v50 = vld [vmem:[%s10319_s1 + $0xc68] sm:$0xff]  ;;  %v453_v51 = vld [vmem:[%s10319_s1 + $0xc38] sm:$0xff]  ;;  %v4605_v53 = vpack.c.bf16 %v442_v45, %v434_v44  ;;  %v4797_v54 = vpack.c.bf16 %v444_v48, %v436_v46  ;;  %v450_v56 = vld [vmem:[%s10319_s1 + $0xc20] sm:$0xff] }
 0x11c   :  { %4598 = vmatpush1.bf16.msra.mxu0 %v4597_v29  ;;  %v461_v52 = vld [vmem:[%s10319_s1 + $0xc78] sm:$0xff]  ;;  %v4607_v55 = vpack.c.bf16 %v459_v50, %v451_v49  ;;  %v458_v57 = vld [vmem:[%s10319_s1 + $0xc60] sm:$0xff]  ;;  %v452_v58 = vld [vmem:[%s10319_s1 + $0xc30] sm:$0xff] }
 0x11d   :  { %4790 = vmatpush1.bf16.msra.mxu1 %v4789_v30  ;;  %4600 = vmatprep.subr.bf16.mxu0 %v4599_v31  ;;  %v4799_v59 = vpack.c.bf16 %v461_v52, %v453_v51  ;;  %v460_v60 = vld [vmem:[%s10319_s1 + $0xc70] sm:$0xff]  ;;  %v467_v61 = vld [vmem:[%s10319_s1 + $0xca8] sm:$0xff]  ;;  %v469_v63 = vld [vmem:[%s10319_s1 + $0xcb8] sm:$0xff]  ;;  %v4609_v1 = vpack.c.bf16 %v458_v57, %v450_v56 }
 0x11e   :  { %4792 = vmatprep.subr.bf16.mxu1 %v4791_v35  ;;  %v475_v62 = vld [vmem:[%s10319_s1 + $0xce8] sm:$0xff]  ;;  %v477_v0 = vld [vmem:[%s10319_s1 + $0xcf8] sm:$0xff]  ;;  %v4801_v2 = vpack.c.bf16 %v460_v60, %v452_v58  ;;  %v466_v4 = vld [vmem:[%s10319_s1 + $0xca0] sm:$0xff] }
 0x11f   :  { %v4611_v3 = vpack.c.bf16 %v475_v62, %v467_v61  ;;  %v474_v5 = vld [vmem:[%s10319_s1 + $0xce0] sm:$0xff]  ;;  %v468_v6 = vld [vmem:[%s10319_s1 + $0xcb0] sm:$0xff]  ;;  %v4803_v7 = vpack.c.bf16 %v477_v0, %v469_v63  ;;  %v483_v9 = vld [vmem:[%s10319_s1 + $0xd28] sm:$0xff] }
 0x120   :  { %4602 = vmatpush1.bf16.msra.mxu0 %v4601_v41  ;;  %v476_v8 = vld [vmem:[%s10319_s1 + $0xcf0] sm:$0xff]  ;;  %v491_v10 = vld [vmem:[%s10319_s1 + $0xd68] sm:$0xff]  ;;  %v485_v11 = vld [vmem:[%s10319_s1 + $0xd38] sm:$0xff]  ;;  %v4613_v13 = vpack.c.bf16 %v474_v5, %v466_v4 }
 0x121   :  { %4794 = vmatpush1.bf16.msra.mxu1 %v4793_v42  ;;  %4604 = vmatprep.subr.bf16.mxu0 %v4603_v43  ;;  %v493_v12 = vld [vmem:[%s10319_s1 + $0xd78] sm:$0xff]  ;;  %v4805_v14 = vpack.c.bf16 %v476_v8, %v468_v6  ;;  %v4615_v15 = vpack.c.bf16 %v491_v10, %v483_v9  ;;  %v482_v16 = vld [vmem:[%s10319_s1 + $0xd20] sm:$0xff]  ;;  %v484_v18 = vld [vmem:[%s10319_s1 + $0xd30] sm:$0xff] }
 0x122   :  { %4796 = vmatprep.subr.bf16.mxu1 %v4795_v47  ;;  %v490_v17 = vld [vmem:[%s10319_s1 + $0xd60] sm:$0xff]  ;;  %v4807_v19 = vpack.c.bf16 %v493_v12, %v485_v11  ;;  %v492_v20 = vld [vmem:[%s10319_s1 + $0xd70] sm:$0xff]  ;;  %v499_v21 = vld [vmem:[%s10319_s1 + $0xda8] sm:$0xff] }
 0x123   :  { %v507_v22 = vld [vmem:[%s10319_s1 + $0xde8] sm:$0xff]  ;;  %v501_v23 = vld [vmem:[%s10319_s1 + $0xdb8] sm:$0xff]  ;;  %v4617_v25 = vpack.c.bf16 %v490_v17, %v482_v16  ;;  %v4809_v26 = vpack.c.bf16 %v492_v20, %v484_v18  ;;  %v498_v28 = vld [vmem:[%s10319_s1 + $0xda0] sm:$0xff] }
 0x124   :  { %4606 = vmatpush1.bf16.msra.mxu0 %v4605_v53  ;;  %v509_v24 = vld [vmem:[%s10319_s1 + $0xdf8] sm:$0xff]  ;;  %v4619_v27 = vpack.c.bf16 %v507_v22, %v499_v21  ;;  %v506_v29 = vld [vmem:[%s10319_s1 + $0xde0] sm:$0xff]  ;;  %v500_v30 = vld [vmem:[%s10319_s1 + $0xdb0] sm:$0xff] }
 0x125   :  { %4798 = vmatpush1.bf16.msra.mxu1 %v4797_v54  ;;  %4608 = vmatprep.subr.bf16.mxu0 %v4607_v55  ;;  %v4811_v31 = vpack.c.bf16 %v509_v24, %v501_v23  ;;  %v508_v32 = vld [vmem:[%s10319_s1 + $0xdf0] sm:$0xff]  ;;  %v515_v33 = vld [vmem:[%s10319_s1 + $0xe28] sm:$0xff]  ;;  %v517_v35 = vld [vmem:[%s10319_s1 + $0xe38] sm:$0xff]  ;;  %v4621_v37 = vpack.c.bf16 %v506_v29, %v498_v28 }
 0x126   :  { %4800 = vmatprep.subr.bf16.mxu1 %v4799_v59  ;;  %v523_v34 = vld [vmem:[%s10319_s1 + $0xe68] sm:$0xff]  ;;  %v525_v36 = vld [vmem:[%s10319_s1 + $0xe78] sm:$0xff]  ;;  %v4813_v38 = vpack.c.bf16 %v508_v32, %v500_v30  ;;  %v514_v40 = vld [vmem:[%s10319_s1 + $0xe20] sm:$0xff] }
 0x127   :  { %v4623_v39 = vpack.c.bf16 %v523_v34, %v515_v33  ;;  %v522_v41 = vld [vmem:[%s10319_s1 + $0xe60] sm:$0xff]  ;;  %v516_v42 = vld [vmem:[%s10319_s1 + $0xe30] sm:$0xff]  ;;  %v4815_v43 = vpack.c.bf16 %v525_v36, %v517_v35  ;;  %v531_v45 = vld [vmem:[%s10319_s1 + $0xea8] sm:$0xff] }
 0x128   :  { %4610 = vmatpush1.bf16.msra.mxu0 %v4609_v1  ;;  %v524_v44 = vld [vmem:[%s10319_s1 + $0xe70] sm:$0xff]  ;;  %v539_v46 = vld [vmem:[%s10319_s1 + $0xee8] sm:$0xff]  ;;  %v533_v47 = vld [vmem:[%s10319_s1 + $0xeb8] sm:$0xff]  ;;  %v4625_v49 = vpack.c.bf16 %v522_v41, %v514_v40 }
 0x129   :  { %4802 = vmatpush1.bf16.msra.mxu1 %v4801_v2  ;;  %4612 = vmatprep.subr.bf16.mxu0 %v4611_v3  ;;  %v541_v48 = vld [vmem:[%s10319_s1 + $0xef8] sm:$0xff]  ;;  %v4817_v50 = vpack.c.bf16 %v524_v44, %v516_v42  ;;  %v4627_v51 = vpack.c.bf16 %v539_v46, %v531_v45  ;;  %v530_v52 = vld [vmem:[%s10319_s1 + $0xea0] sm:$0xff]  ;;  %v532_v54 = vld [vmem:[%s10319_s1 + $0xeb0] sm:$0xff] }
 0x12a   :  { %4804 = vmatprep.subr.bf16.mxu1 %v4803_v7  ;;  %v538_v53 = vld [vmem:[%s10319_s1 + $0xee0] sm:$0xff]  ;;  %v4819_v55 = vpack.c.bf16 %v541_v48, %v533_v47  ;;  %v540_v56 = vld [vmem:[%s10319_s1 + $0xef0] sm:$0xff]  ;;  %v547_v57 = vld [vmem:[%s10319_s1 + $0xf28] sm:$0xff] }
 0x12b   :  { %v555_v58 = vld [vmem:[%s10319_s1 + $0xf68] sm:$0xff]  ;;  %v549_v59 = vld [vmem:[%s10319_s1 + $0xf38] sm:$0xff]  ;;  %v4629_v61 = vpack.c.bf16 %v538_v53, %v530_v52  ;;  %v4821_v62 = vpack.c.bf16 %v540_v56, %v532_v54  ;;  %v546_v0 = vld [vmem:[%s10319_s1 + $0xf20] sm:$0xff] }
 0x12c   :  { %4614 = vmatpush1.bf16.msra.mxu0 %v4613_v13  ;;  %v557_v60 = vld [vmem:[%s10319_s1 + $0xf78] sm:$0xff]  ;;  %v4631_v63 = vpack.c.bf16 %v555_v58, %v547_v57  ;;  %v554_v1 = vld [vmem:[%s10319_s1 + $0xf60] sm:$0xff]  ;;  %v548_v2 = vld [vmem:[%s10319_s1 + $0xf30] sm:$0xff] }
 0x12d   :  { %4806 = vmatpush1.bf16.msra.mxu1 %v4805_v14  ;;  %4616 = vmatprep.subr.bf16.mxu0 %v4615_v15  ;;  %v4823_v3 = vpack.c.bf16 %v557_v60, %v549_v59  ;;  %v556_v4 = vld [vmem:[%s10319_s1 + $0xf70] sm:$0xff]  ;;  %v563_v5 = vld [vmem:[%s10319_s1 + $0xfa8] sm:$0xff]  ;;  %v565_v7 = vld [vmem:[%s10319_s1 + $0xfb8] sm:$0xff]  ;;  %v4633_v9 = vpack.c.bf16 %v554_v1, %v546_v0 }
 0x12e   :  { %4808 = vmatprep.subr.bf16.mxu1 %v4807_v19  ;;  %v571_v6 = vld [vmem:[%s10319_s1 + $0xfe8] sm:$0xff]  ;;  %v573_v8 = vld [vmem:[%s10319_s1 + $0xff8] sm:$0xff]  ;;  %v4825_v10 = vpack.c.bf16 %v556_v4, %v548_v2  ;;  %v562_v12 = vld [vmem:[%s10319_s1 + $0xfa0] sm:$0xff] }
 0x12f   :  { %v4635_v11 = vpack.c.bf16 %v571_v6, %v563_v5  ;;  %v570_v13 = vld [vmem:[%s10319_s1 + $0xfe0] sm:$0xff]  ;;  %v564_v14 = vld [vmem:[%s10319_s1 + $0xfb0] sm:$0xff]  ;;  %v4827_v15 = vpack.c.bf16 %v573_v8, %v565_v7  ;;  %v579_v17 = vld [vmem:[%s10319_s1 + $0x1028] sm:$0xff] }
 0x130   :  { %4618 = vmatpush1.bf16.msra.mxu0 %v4617_v25  ;;  %v572_v16 = vld [vmem:[%s10319_s1 + $0xff0] sm:$0xff]  ;;  %v587_v18 = vld [vmem:[%s10319_s1 + $0x1068] sm:$0xff]  ;;  %v581_v19 = vld [vmem:[%s10319_s1 + $0x1038] sm:$0xff]  ;;  %v4637_v21 = vpack.c.bf16 %v570_v13, %v562_v12 }
 0x131   :  { %4810 = vmatpush1.bf16.msra.mxu1 %v4809_v26  ;;  %4620 = vmatprep.subr.bf16.mxu0 %v4619_v27  ;;  %v589_v20 = vld [vmem:[%s10319_s1 + $0x1078] sm:$0xff]  ;;  %v4829_v22 = vpack.c.bf16 %v572_v16, %v564_v14  ;;  %v4639_v23 = vpack.c.bf16 %v587_v18, %v579_v17  ;;  %v578_v24 = vld [vmem:[%s10319_s1 + $0x1020] sm:$0xff]  ;;  %v580_v26 = vld [vmem:[%s10319_s1 + $0x1030] sm:$0xff] }
 0x132   :  { %4812 = vmatprep.subr.bf16.mxu1 %v4811_v31  ;;  %v586_v25 = vld [vmem:[%s10319_s1 + $0x1060] sm:$0xff]  ;;  %v4831_v27 = vpack.c.bf16 %v589_v20, %v581_v19  ;;  %v588_v28 = vld [vmem:[%s10319_s1 + $0x1070] sm:$0xff]  ;;  %v595_v29 = vld [vmem:[%s10319_s1 + $0x10a8] sm:$0xff] }
 0x133   :  { %v603_v30 = vld [vmem:[%s10319_s1 + $0x10e8] sm:$0xff]  ;;  %v597_v31 = vld [vmem:[%s10319_s1 + $0x10b8] sm:$0xff]  ;;  %v4641_v33 = vpack.c.bf16 %v586_v25, %v578_v24  ;;  %v4833_v34 = vpack.c.bf16 %v588_v28, %v580_v26  ;;  %v594_v36 = vld [vmem:[%s10319_s1 + $0x10a0] sm:$0xff] }
 0x134   :  { %4622 = vmatpush1.bf16.msra.mxu0 %v4621_v37  ;;  %v605_v32 = vld [vmem:[%s10319_s1 + $0x10f8] sm:$0xff]  ;;  %v4643_v35 = vpack.c.bf16 %v603_v30, %v595_v29  ;;  %v602_v37 = vld [vmem:[%s10319_s1 + $0x10e0] sm:$0xff]  ;;  %v604_v40 = vld [vmem:[%s10319_s1 + $0x10f0] sm:$0xff] }
 0x135   :  { %4814 = vmatpush1.bf16.msra.mxu1 %v4813_v38  ;;  %4624 = vmatprep.subr.bf16.mxu0 %v4623_v39  ;;  %v596_v38 = vld [vmem:[%s10319_s1 + $0x10b0] sm:$0xff]  ;;  %v4835_v39 = vpack.c.bf16 %v605_v32, %v597_v31  ;;  %v611_v41 = vld [vmem:[%s10319_s1 + $0x1128] sm:$0xff]  ;;  %v613_v44 = vld [vmem:[%s10319_s1 + $0x1138] sm:$0xff]  ;;  %v4645_v46 = vpack.c.bf16 %v602_v37, %v594_v36 }
 0x136   :  { %4816 = vmatprep.subr.bf16.mxu1 %v4815_v43  ;;  %v619_v42 = vld [vmem:[%s10319_s1 + $0x1168] sm:$0xff]  ;;  %v6152_v43 = vld [vmem:[%s10318_s0 + $0x10] sm:$0xff]  ;;  %v621_v45 = vld [vmem:[%s10319_s1 + $0x1178] sm:$0xff]  ;;  %v4837_v47 = vpack.c.bf16 %v604_v40, %v596_v38 }
 0x137   :  { %v4647_v48 = vpack.c.bf16 %v619_v42, %v611_v41  ;;  %v4839_v52 = vpack.c.bf16 %v621_v45, %v613_v44  ;;  %v620_v53 = vld [vmem:[%s10319_s1 + $0x1170] sm:$0xff]  ;;  %v627_v54 = vld [vmem:[%s10319_s1 + $0x11a8] sm:$0xff]  ;;  %v629_v57 = vld [vmem:[%s10319_s1 + $0x11b8] sm:$0xff] }
 0x138   :  { %4626 = vmatpush1.bf16.msra.mxu0 %v4625_v49  ;;  %v610_v49 = vld [vmem:[%s10319_s1 + $0x1120] sm:$0xff]  ;;  %v6153_v56 = vld [vmem:[%s10318_s0 + $0x48] sm:$0xff]  ;;  %v637_v58 = vld [vmem:[%s10319_s1 + $0x11f8] sm:$0xff] }
 0x139   :  { %4818 = vmatpush1.bf16.msra.mxu1 %v4817_v50  ;;  %4628 = vmatprep.subr.bf16.mxu0 %v4627_v51  ;;  %v618_v50 = vld [vmem:[%s10319_s1 + $0x1160] sm:$0xff]  ;;  %v612_v51 = vld [vmem:[%s10319_s1 + $0x1130] sm:$0xff]  ;;  %v4843_v2 = vpack.c.bf16 %v637_v58, %v629_v57  ;;  %v643_v4 = vld [vmem:[%s10319_s1 + $0x1228] sm:$0xff] }
 0x13a   :  { %4820 = vmatprep.subr.bf16.mxu1 %v4819_v55  ;;  %v635_v55 = vld [vmem:[%s10319_s1 + $0x11e8] sm:$0xff]  ;;  %v6154_v59 = vld [vmem:[%s10318_s0 + $0x40] sm:$0xff]  ;;  %v4649_v60 = vpack.c.bf16 %v618_v50, %v610_v49  ;;  %v628_v1 = vld [vmem:[%s10319_s1 + $0x11b0] sm:$0xff] }
 0x13b   :  { %v634_v0 = vld [vmem:[%s10319_s1 + $0x11e0] sm:$0xff]  ;;  %v651_v5 = vld [vmem:[%s10319_s1 + $0x1268] sm:$0xff]  ;;  %v645_v7 = vld [vmem:[%s10319_s1 + $0x1238] sm:$0xff] }
 0x13c   :  { %4630 = vmatpush1.bf16.msra.mxu0 %v4629_v61  ;;  %v4841_v61 = vpack.c.bf16 %v620_v53, %v612_v51  ;;  %v6155_v6 = vld [vmem:[%s10318_s0 + $0x28] sm:$0xff]  ;;  %v653_v8 = vld [vmem:[%s10319_s1 + $0x1278] sm:$0xff]  ;;  %v642_v12 = vld [vmem:[%s10319_s1 + $0x1220] sm:$0xff] }
 0x13d   :  { %4822 = vmatpush1.bf16.msra.mxu1 %v4821_v62  ;;  %4632 = vmatprep.subr.bf16.mxu0 %v4631_v63  ;;  %v4651_v62 = vpack.c.bf16 %v635_v55, %v627_v54  ;;  %v626_v63 = vld [vmem:[%s10319_s1 + $0x11a0] sm:$0xff]  ;;  %v644_v14 = vld [vmem:[%s10319_s1 + $0x1230] sm:$0xff]  ;;  %v659_v17 = vld [vmem:[%s10319_s1 + $0x12a8] sm:$0xff] }
 0x13e   :  { %4824 = vmatprep.subr.bf16.mxu1 %v4823_v3  ;;  %v636_v3 = vld [vmem:[%s10319_s1 + $0x11f0] sm:$0xff]  ;;  %v650_v13 = vld [vmem:[%s10319_s1 + $0x1260] sm:$0xff]  ;;  %v667_v18 = vld [vmem:[%s10319_s1 + $0x12e8] sm:$0xff] }
 0x13f   :  { %v652_v16 = vld [vmem:[%s10319_s1 + $0x1270] sm:$0xff]  ;;  %v661_v19 = vld [vmem:[%s10319_s1 + $0x12b8] sm:$0xff]  ;;  %v658_v24 = vld [vmem:[%s10319_s1 + $0x12a0] sm:$0xff] }
 0x140   :  { %4634 = vmatpush1.bf16.msra.mxu0 %v4633_v9  ;;  %v4653_v9 = vpack.c.bf16 %v634_v0, %v626_v63  ;;  %v669_v20 = vld [vmem:[%s10319_s1 + $0x12f8] sm:$0xff]  ;;  %v666_v25 = vld [vmem:[%s10319_s1 + $0x12e0] sm:$0xff]  ;;  %v660_v26 = vld [vmem:[%s10319_s1 + $0x12b0] sm:$0xff] }
 0x141   :  { %4826 = vmatpush1.bf16.msra.mxu1 %v4825_v10  ;;  %4636 = vmatprep.subr.bf16.mxu0 %v4635_v11  ;;  %v4845_v10 = vpack.c.bf16 %v636_v3, %v628_v1  ;;  %v4655_v11 = vpack.c.bf16 %v651_v5, %v643_v4  ;;  %v668_v28 = vld [vmem:[%s10319_s1 + $0x12f0] sm:$0xff]  ;;  %v675_v29 = vld [vmem:[%s10319_s1 + $0x1328] sm:$0xff]  ;;  %v677_v31 = vld [vmem:[%s10319_s1 + $0x1338] sm:$0xff] }
 0x142   :  { %4828 = vmatprep.subr.bf16.mxu1 %v4827_v15  ;;  %v4847_v15 = vpack.c.bf16 %v653_v8, %v645_v7  ;;  %v683_v30 = vld [vmem:[%s10319_s1 + $0x1368] sm:$0xff]  ;;  %v685_v32 = vld [vmem:[%s10319_s1 + $0x1378] sm:$0xff]  ;;  %v674_v36 = vld [vmem:[%s10319_s1 + $0x1320] sm:$0xff] }
 0x143   :  { %v682_v37 = vld [vmem:[%s10319_s1 + $0x1360] sm:$0xff]  ;;  %v676_v38 = vld [vmem:[%s10319_s1 + $0x1330] sm:$0xff]  ;;  %v691_v41 = vld [vmem:[%s10319_s1 + $0x13a8] sm:$0xff] }
 0x144   :  { %4638 = vmatpush1.bf16.msra.mxu0 %v4637_v21  ;;  %v4657_v21 = vpack.c.bf16 %v650_v13, %v642_v12  ;;  %v684_v40 = vld [vmem:[%s10319_s1 + $0x1370] sm:$0xff]  ;;  %v699_v42 = vld [vmem:[%s10319_s1 + $0x13e8] sm:$0xff]  ;;  %v701_v44 = vld [vmem:[%s10319_s1 + $0x13f8] sm:$0xff]  ;;  %v4665_v45 = vpack.c.bf16 %v682_v37, %v674_v36 }
 0x145   :  { %4830 = vmatpush1.bf16.msra.mxu1 %v4829_v22  ;;  %4640 = vmatprep.subr.bf16.mxu0 %v4639_v23  ;;  %v4849_v22 = vpack.c.bf16 %v652_v16, %v644_v14  ;;  %v4659_v23 = vpack.c.bf16 %v667_v18, %v659_v17  ;;  %v698_v49 = vld [vmem:[%s10319_s1 + $0x13e0] sm:$0xff]  ;;  %v692_v50 = vld [vmem:[%s10319_s1 + $0x13b0] sm:$0xff]  ;;  %v707_v53 = vld [vmem:[%s10319_s1 + $0x1428] sm:$0xff] }
 0x146   :  { %4832 = vmatprep.subr.bf16.mxu1 %v4831_v27  ;;  %v4851_v27 = vpack.c.bf16 %v669_v20, %v661_v19  ;;  %v715_v54 = vld [vmem:[%s10319_s1 + $0x1468] sm:$0xff]  ;;  %v709_v55 = vld [vmem:[%s10319_s1 + $0x1438] sm:$0xff]  ;;  %v716_v0 = vld [vmem:[%s10319_s1 + $0x1470] sm:$0xff] }
 0x147   :  { %1476 = vmatmul.mubr.f32.vlgmr.msra.gmra.mrb[4].mxu0 %v6152_v43  ;;  %v723_v1 = vld [vmem:[%s10319_s1 + $0x14a8] sm:$0xff]  ;;  %v725_v3 = vld [vmem:[%s10319_s1 + $0x14b8] sm:$0xff]  ;;  %v722_v8 = vld [vmem:[%s10319_s1 + $0x14a0] sm:$0xff] }
 0x148   :  { %4642 = vmatpush1.bf16.msra.mxu0 %v4641_v33  ;;  %1707 = vmatmul.mubr.f32.vlgmr.msra.gmra.mrb[4].mxu1 %v6152_v43  ;;  %v4661_v33 = vpack.c.bf16 %v666_v25, %v658_v24  ;;  %v693_v43 = vld [vmem:[%s10319_s1 + $0x13b8] sm:$0xff]  ;;  %v732_v12 = vld [vmem:[%s10319_s1 + $0x14f0] sm:$0xff]  ;;  %v739_v13 = vld [vmem:[%s10319_s1 + $0x1528] sm:$0xff] }
 0x149   :  { %4834 = vmatpush1.bf16.msra.mxu1 %v4833_v34  ;;  %4644 = vmatprep.subr.bf16.mxu0 %v4643_v35  ;;  %v4853_v34 = vpack.c.bf16 %v668_v28, %v660_v26  ;;  %v4663_v35 = vpack.c.bf16 %v683_v30, %v675_v29  ;;  %v4859_v51 = vpack.c.bf16 %v701_v44, %v693_v43  ;;  %v733_v4 = vld [vmem:[%s10319_s1 + $0x14f8] sm:$0xff]  ;;  %v747_v14 = vld [vmem:[%s10319_s1 + $0x1568] sm:$0xff]  ;;  %v738_v20 = vld [vmem:[%s10319_s1 + $0x1520] sm:$0xff] }
 0x14a   :  { %4836 = vmatprep.subr.bf16.mxu1 %v4835_v39  ;;  %1481 = vmatprep.mubr.f32.mxu0 %v6153_v56  ;;  %v4855_v39 = vpack.c.bf16 %v685_v32, %v677_v31  ;;  %v749_v16 = vld [vmem:[%s10319_s1 + $0x1578] sm:$0xff]  ;;  %v4679_v19 = vpack.c.bf16 %v747_v14, %v739_v13  ;;  %v748_v24 = vld [vmem:[%s10319_s1 + $0x1570] sm:$0xff]  ;;  %v755_v25 = vld [vmem:[%s10319_s1 + $0x15a8] sm:$0xff] }
 0x14b   :  { %1712 = vmatprep.mubr.f32.mxu1 %v6153_v56  ;;  %1482 = vmatmul.mubr.f32.gmra.mrb[6].mxu0 %v6154_v59  ;;  %v717_v56 = vld [vmem:[%s10319_s1 + $0x1478] sm:$0xff]  ;;  %v763_v26 = vld [vmem:[%s10319_s1 + $0x15e8] sm:$0xff]  ;;  %v754_v32 = vld [vmem:[%s10319_s1 + $0x15a0] sm:$0xff] }
 0x14c   :  { %4646 = vmatpush1.bf16.msra.mxu0 %v4645_v46  ;;  %1713 = vmatmul.mubr.f32.gmra.mrb[6].mxu1 %v6154_v59  ;;  %v4857_v46 = vpack.c.bf16 %v684_v40, %v676_v38  ;;  %v4671_v59 = vpack.c.bf16 %v715_v54, %v707_v53  ;;  %v4863_v63 = vpack.c.bf16 %v717_v56, %v709_v55  ;;  %v765_v28 = vld [vmem:[%s10319_s1 + $0x15f8] sm:$0xff]  ;;  %v764_v36 = vld [vmem:[%s10319_s1 + $0x15f0] sm:$0xff]  ;;  %v771_v37 = vld [vmem:[%s10319_s1 + $0x1628] sm:$0xff] }
 0x14d   :  { %4838 = vmatpush1.bf16.msra.mxu1 %v4837_v47  ;;  %4648 = vmatprep.subr.bf16.mxu0 %v4647_v48  ;;  %v4667_v47 = vpack.c.bf16 %v699_v42, %v691_v41  ;;  %v690_v48 = vld [vmem:[%s10319_s1 + $0x13a0] sm:$0xff]  ;;  %v4683_v31 = vpack.c.bf16 %v763_v26, %v755_v25  ;;  %v779_v38 = vld [vmem:[%s10319_s1 + $0x1668] sm:$0xff]  ;;  %v781_v40 = vld [vmem:[%s10319_s1 + $0x1678] sm:$0xff] }
 0x14e   :  { %4840 = vmatprep.subr.bf16.mxu1 %v4839_v52  ;;  %1552 = vmatprep.mubr.f32.mxu0 %v6155_v6  ;;  %v700_v52 = vld [vmem:[%s10319_s1 + $0x13f0] sm:$0xff]  ;;  %v4669_v57 = vpack.c.bf16 %v698_v49, %v690_v48  ;;  %v4687_v43 = vpack.c.bf16 %v779_v38, %v771_v37  ;;  %v770_v44 = vld [vmem:[%s10319_s1 + $0x1620] sm:$0xff]  ;;  %v787_v49 = vld [vmem:[%s10319_s1 + $0x16a8] sm:$0xff] }
 0x14f   :  { %1783 = vmatprep.mubr.f32.mxu1 %v6155_v6  ;;  %v4861_v58 = vpack.c.bf16 %v700_v52, %v692_v50  ;;  %v780_v48 = vld [vmem:[%s10319_s1 + $0x1670] sm:$0xff]  ;;  %v795_v50 = vld [vmem:[%s10319_s1 + $0x16e8] sm:$0xff]  ;;  %v797_v52 = vld [vmem:[%s10319_s1 + $0x16f8] sm:$0xff] }
 0x150   :  { %4650 = vmatpush1.bf16.msra.mxu0 %v4649_v60  ;;  %v706_v60 = vld [vmem:[%s10319_s1 + $0x1420] sm:$0xff]  ;;  %v4691_v55 = vpack.c.bf16 %v795_v50, %v787_v49  ;;  %v2043_v37 = vld [vmem:[%s10321_s3 + $0x78] sm:$0xff] }
 0x151   :  { %4842 = vmatpush1.bf16.msra.mxu1 %v4841_v61  ;;  %4652 = vmatprep.subr.bf16.mxu0 %v4651_v62  ;;  %v714_v61 = vld [vmem:[%s10319_s1 + $0x1460] sm:$0xff]  ;;  %v708_v62 = vld [vmem:[%s10319_s1 + $0x1430] sm:$0xff]  ;;  %v2051_v49 = vld [vmem:[%s10321_s3 + $0xb8] sm:$0xff] }
 0x152   :  { %4844 = vmatprep.subr.bf16.mxu1 %v4843_v2  ;;  %v731_v2 = vld [vmem:[%s10319_s1 + $0x14e8] sm:$0xff]  ;;  %v4673_v5 = vpack.c.bf16 %v714_v61, %v706_v60  ;;  %v4865_v6 = vpack.c.bf16 %v716_v0, %v708_v62  ;;  %v786_v56 = vld [vmem:[%s10319_s1 + $0x16a0] sm:$0xff]  ;;  %v796_v60 = vld [vmem:[%s10319_s1 + $0x16f0] sm:$0xff] }
 0x153   :  { %v4675_v7 = vpack.c.bf16 %v731_v2, %v723_v1  ;;  %v803_v61 = vld [vmem:[%s10319_s1 + $0x1728] sm:$0xff]  ;;  %v813_v0 = vld [vmem:[%s10319_s1 + $0x1778] sm:$0xff] }
 0x154   :  { %4654 = vmatpush1.bf16.msra.mxu0 %v4653_v9  ;;  %v730_v9 = vld [vmem:[%s10319_s1 + $0x14e0] sm:$0xff]  ;;  %v811_v62 = vld [vmem:[%s10319_s1 + $0x1768] sm:$0xff] }
 0x155   :  { %4846 = vmatpush1.bf16.msra.mxu1 %v4845_v10  ;;  %4656 = vmatprep.subr.bf16.mxu0 %v4655_v11  ;;  %v724_v10 = vld [vmem:[%s10319_s1 + $0x14b0] sm:$0xff]  ;;  %v4867_v11 = vpack.c.bf16 %v733_v4, %v725_v3  ;;  %v4677_v17 = vpack.c.bf16 %v730_v9, %v722_v8  ;;  %v4695_v3 = vpack.c.bf16 %v811_v62, %v803_v61  ;;  %v802_v4 = vld [vmem:[%s10319_s1 + $0x1720] sm:$0xff]  ;;  %v819_v9 = vld [vmem:[%s10319_s1 + $0x17a8] sm:$0xff] }
 0x156   :  { %4848 = vmatprep.subr.bf16.mxu1 %v4847_v15  ;;  %v741_v15 = vld [vmem:[%s10319_s1 + $0x1538] sm:$0xff]  ;;  %v4869_v18 = vpack.c.bf16 %v732_v12, %v724_v10  ;;  %v812_v8 = vld [vmem:[%s10319_s1 + $0x1770] sm:$0xff]  ;;  %v827_v10 = vld [vmem:[%s10319_s1 + $0x17e8] sm:$0xff] }
 0x157   :  { %v829_v12 = vld [vmem:[%s10319_s1 + $0x17f8] sm:$0xff]  ;;  %v6158_v61 = vld [vmem:[%s10318_s0 + $0x50] sm:$0xff] }
 0x158   :  { %4658 = vmatpush1.bf16.msra.mxu0 %v4657_v21  ;;  %v746_v21 = vld [vmem:[%s10319_s1 + $0x1560] sm:$0xff]  ;;  %v2055_v62 = vld [vmem:[%s10321_s3 + $0xd8] sm:$0xff] }
 0x159   :  { %4850 = vmatpush1.bf16.msra.mxu1 %v4849_v22  ;;  %4660 = vmatprep.subr.bf16.mxu0 %v4659_v23  ;;  %v740_v22 = vld [vmem:[%s10319_s1 + $0x1530] sm:$0xff]  ;;  %v4871_v23 = vpack.c.bf16 %v749_v16, %v741_v15  ;;  %v4681_v29 = vpack.c.bf16 %v746_v21, %v738_v20  ;;  %v4699_v15 = vpack.c.bf16 %v827_v10, %v819_v9  ;;  %v818_v16 = vld [vmem:[%s10319_s1 + $0x17a0] sm:$0xff]  ;;  %v2029_v21 = vld [vmem:[%s10321_s3 + $0x8] sm:$0xff]  ;;  %v10333_v10 = vmov 0.0  }
 0x15a   :  { %4852 = vmatprep.subr.bf16.mxu1 %v4851_v27  ;;  %v757_v27 = vld [vmem:[%s10319_s1 + $0x15b8] sm:$0xff]  ;;  %v4873_v30 = vpack.c.bf16 %v748_v24, %v740_v22  ;;  %v828_v20 = vld [vmem:[%s10319_s1 + $0x17f0] sm:$0xff]  ;;  %v2033_v22 = vld [vmem:[%s10321_s3 + $0x28] sm:$0xff] }
 0x15b   :  { %v2035_v24 = vld [vmem:[%s10321_s3 + $0x38] sm:$0xff]  ;;  %v2065_v9 = vld [vmem:[%s10321_s3 + $0x128] sm:$0xff] }
 0x15c   :  { %4662 = vmatpush1.bf16.msra.mxu0 %v4661_v33  ;;  %v762_v33 = vld [vmem:[%s10319_s1 + $0x15e0] sm:$0xff] }
 0x15d   :  { %4854 = vmatpush1.bf16.msra.mxu1 %v4853_v34  ;;  %4664 = vmatprep.subr.bf16.mxu0 %v4663_v35  ;;  %v756_v34 = vld [vmem:[%s10319_s1 + $0x15b0] sm:$0xff]  ;;  %v4875_v35 = vpack.c.bf16 %v765_v28, %v757_v27  ;;  %v4685_v41 = vpack.c.bf16 %v762_v33, %v754_v32  ;;  %v8697_v27 = vpack.c.bf16 %v2033_v22, %v2029_v21  ;;  %v2028_v28 = vld [vmem:[%s10321_s3] sm:$0xff]  ;;  %v2037_v33 = vld [vmem:[%s10321_s3 + $0x48] sm:$0xff] }
 0x15e   :  { %4856 = vmatprep.subr.bf16.mxu1 %v4855_v39  ;;  %v773_v39 = vld [vmem:[%s10319_s1 + $0x1638] sm:$0xff]  ;;  %v4877_v42 = vpack.c.bf16 %v764_v36, %v756_v34  ;;  %v2034_v32 = vld [vmem:[%s10321_s3 + $0x30] sm:$0xff]  ;;  %v2041_v34 = vld [vmem:[%s10321_s3 + $0x68] sm:$0xff] }
 0x15f   :  { %10467 = vst [vmem:[#allocation14_spill] sm:$0xff] %v8697_v27  ;;  %v2039_v36 = vld [vmem:[%s10321_s3 + $0x58] sm:$0xff]  ;;  %v2066_v21 = vld [vmem:[%s10321_s3 + $0x130] sm:$0xff]  ;;  %v2069_v22 = vld [vmem:[%s10321_s3 + $0x148] sm:$0xff] }
 0x160   :  { %4666 = vmatpush1.bf16.msra.mxu0 %v4665_v45  ;;  %v778_v45 = vld [vmem:[%s10319_s1 + $0x1660] sm:$0xff] }
 0x161   :  { %4858 = vmatpush1.bf16.msra.mxu1 %v4857_v46  ;;  %4668 = vmatprep.subr.bf16.mxu0 %v4667_v47  ;;  %v772_v46 = vld [vmem:[%s10319_s1 + $0x1630] sm:$0xff]  ;;  %v4879_v47 = vpack.c.bf16 %v781_v40, %v773_v39  ;;  %v4689_v53 = vpack.c.bf16 %v778_v45, %v770_v44  ;;  %v2036_v39 = vld [vmem:[%s10321_s3 + $0x40] sm:$0xff]  ;;  %v2045_v44 = vld [vmem:[%s10321_s3 + $0x88] sm:$0xff] }
 0x162   :  { %4860 = vmatprep.subr.bf16.mxu1 %v4859_v51  ;;  %v789_v51 = vld [vmem:[%s10319_s1 + $0x16b8] sm:$0xff]  ;;  %v4881_v54 = vpack.c.bf16 %v780_v48, %v772_v46  ;;  %v2040_v40 = vld [vmem:[%s10321_s3 + $0x60] sm:$0xff]  ;;  %v2049_v45 = vld [vmem:[%s10321_s3 + $0xa8] sm:$0xff] }
 0x163   :  { %v6156_v46 = vld [vmem:[%s10318_s0 + $0x20] sm:$0xff]  ;;  %v2047_v48 = vld [vmem:[%s10321_s3 + $0x98] sm:$0xff]  ;;  %v8763_v50 = vpack.c.bf16 %v2040_v40, %v2036_v39  ;;  %v2077_v39 = vld [vmem:[%s10321_s3 + $0x188] sm:$0xff] }
 0x164   :  { %4670 = vmatpush1.bf16.msra.mxu0 %v4669_v57  ;;  %v794_v57 = vld [vmem:[%s10319_s1 + $0x16e0] sm:$0xff]  ;;  %v2081_v40 = vld [vmem:[%s10321_s3 + $0x1a8] sm:$0xff] }
 0x165   :  { %4862 = vmatpush1.bf16.msra.mxu1 %v4861_v58  ;;  %4672 = vmatprep.subr.bf16.mxu0 %v4671_v59  ;;  %v788_v58 = vld [vmem:[%s10319_s1 + $0x16b0] sm:$0xff]  ;;  %v4883_v59 = vpack.c.bf16 %v797_v52, %v789_v51  ;;  %v4693_v1 = vpack.c.bf16 %v794_v57, %v786_v56  ;;  %v6157_v51 = vld [vmem:[%s10318_s0 + $0x58] sm:$0xff]  ;;  %v8783_v57 = vpack.c.bf16 %v2051_v49, %v2047_v48  ;;  %v2076_v49 = vld [vmem:[%s10321_s3 + $0x180] sm:$0xff] }
 0x166   :  { %4864 = vmatprep.subr.bf16.mxu1 %v4863_v63  ;;  %v805_v63 = vld [vmem:[%s10319_s1 + $0x1738] sm:$0xff]  ;;  %v4885_v2 = vpack.c.bf16 %v796_v60, %v788_v58  ;;  %v2046_v56 = vld [vmem:[%s10321_s3 + $0x90] sm:$0xff]  ;;  %v2057_v60 = vld [vmem:[%s10321_s3 + $0xe8] sm:$0xff]  ;;  %v8924_v48 = vpack.c.bf16 %v2081_v40, %v2077_v39 }
 0x167   :  { %v2050_v58 = vld [vmem:[%s10321_s3 + $0xb0] sm:$0xff] }
 0x168   :  { %4674 = vmatpush1.bf16.msra.mxu0 %v4673_v5  ;;  %v810_v5 = vld [vmem:[%s10319_s1 + $0x1760] sm:$0xff]  ;;  %10476 = vst [vmem:[#allocation23_spill] sm:$0xff] %v8924_v48 }
 0x169   :  { %4866 = vmatpush1.bf16.msra.mxu1 %v4865_v6  ;;  %4676 = vmatprep.subr.bf16.mxu0 %v4675_v7  ;;  %v804_v6 = vld [vmem:[%s10319_s1 + $0x1730] sm:$0xff]  ;;  %v4887_v7 = vpack.c.bf16 %v813_v0, %v805_v63  ;;  %v4697_v13 = vpack.c.bf16 %v810_v5, %v802_v4  ;;  %v2059_v63 = vld [vmem:[%s10321_s3 + $0xf8] sm:$0xff]  ;;  %v2056_v4 = vld [vmem:[%s10321_s3 + $0xe0] sm:$0xff] }
 0x16a   :  { %4868 = vmatprep.subr.bf16.mxu1 %v4867_v11  ;;  %v821_v11 = vld [vmem:[%s10319_s1 + $0x17b8] sm:$0xff]  ;;  %v4889_v14 = vpack.c.bf16 %v812_v8, %v804_v6  ;;  %v2054_v5 = vld [vmem:[%s10321_s3 + $0xd0] sm:$0xff]  ;;  %v8823_v6 = vpack.c.bf16 %v2059_v63, %v2055_v62  ;;  %v2061_v8 = vld [vmem:[%s10321_s3 + $0x108] sm:$0xff] }
 0x16b   :  { %v2089_v62 = vld [vmem:[%s10321_s3 + $0x1e8] sm:$0xff]  ;;  %v8954_v63 = vld [vmem:[%s10320_s2] sm:$0xff] }
 0x16c   :  { %4678 = vmatpush1.bf16.msra.mxu0 %v4677_v17  ;;  %v826_v17 = vld [vmem:[%s10319_s1 + $0x17e0] sm:$0xff]  ;;  %10479 = vst [vmem:[#allocation26_spill] sm:$0xff] %v8954_v63 }
 0x16d   :  { %4870 = vmatpush1.bf16.msra.mxu1 %v4869_v18  ;;  %4680 = vmatprep.subr.bf16.mxu0 %v4679_v19  ;;  %v820_v18 = vld [vmem:[%s10319_s1 + $0x17b0] sm:$0xff]  ;;  %v4891_v19 = vpack.c.bf16 %v829_v12, %v821_v11  ;;  %v4701_v25 = vpack.c.bf16 %v826_v17, %v818_v16  ;;  %v2063_v11 = vld [vmem:[%s10321_s3 + $0x118] sm:$0xff]  ;;  %v2060_v16 = vld [vmem:[%s10321_s3 + $0x100] sm:$0xff] }
 0x16e   :  { %4872 = vmatprep.subr.bf16.mxu1 %v4871_v23  ;;  %v2031_v23 = vld [vmem:[%s10321_s3 + $0x18] sm:$0xff]  ;;  %v4893_v26 = vpack.c.bf16 %v828_v20, %v820_v18  ;;  %v2064_v17 = vld [vmem:[%s10321_s3 + $0x120] sm:$0xff]  ;;  %v2062_v18 = vld [vmem:[%s10321_s3 + $0x110] sm:$0xff] }
 0x16f   :  { %v2067_v12 = vld [vmem:[%s10321_s3 + $0x138] sm:$0xff] }
 0x170   :  { %4682 = vmatpush1.bf16.msra.mxu0 %v4681_v29  ;;  %v2032_v29 = vld [vmem:[%s10321_s3 + $0x20] sm:$0xff]  ;;  %v8861_v20 = vpack.c.bf16 %v2067_v12, %v2063_v11 }
 0x171   :  { %4874 = vmatpush1.bf16.msra.mxu1 %v4873_v30  ;;  %4684 = vmatprep.subr.bf16.mxu0 %v4683_v31  ;;  %v8705_v30 = vpack.c.bf16 %v2035_v24, %v2031_v23  ;;  %v2030_v31 = vld [vmem:[%s10321_s3 + $0x10] sm:$0xff]  ;;  %v2073_v23 = vld [vmem:[%s10321_s3 + $0x168] sm:$0xff]  ;;  %v2071_v24 = vld [vmem:[%s10321_s3 + $0x158] sm:$0xff] }
 0x172   :  { %4876 = vmatprep.subr.bf16.mxu1 %v4875_v35  ;;  %v8719_v35 = vpack.c.bf16 %v2032_v29, %v2028_v28  ;;  %v8728_v38 = vpack.c.bf16 %v2034_v32, %v2030_v31  ;;  %v8883_v28 = vpack.c.bf16 %v2066_v21, %v2062_v18  ;;  %v8887_v31 = vpack.c.bf16 %v2073_v23, %v2069_v22  ;;  %v2068_v32 = vld [vmem:[%s10321_s3 + $0x140] sm:$0xff] }
 0x173   :  { %10468 = vst [vmem:[#allocation15_spill] sm:$0xff] %v8705_v30  ;;  %v2088_v18 = vld [vmem:[%s10321_s3 + $0x1e0] sm:$0xff] }
 0x174   :  { %4686 = vmatpush1.bf16.msra.mxu0 %v4685_v41  ;;  %v2038_v41 = vld [vmem:[%s10321_s3 + $0x50] sm:$0xff]  ;;  %10470 = vst [vmem:[#allocation17_spill] sm:$0xff] %v8883_v28  ;;  %10472 = vst [vmem:[#allocation19_spill] sm:$0xff] %v8887_v31 }
 0x175   :  { %4878 = vmatpush1.bf16.msra.mxu1 %v4877_v42  ;;  %4688 = vmatprep.subr.bf16.mxu0 %v4687_v43  ;;  %v8740_v42 = vpack.c.bf16 %v2041_v34, %v2037_v33  ;;  %v2042_v43 = vld [vmem:[%s10321_s3 + $0x70] sm:$0xff]  ;;  %v2072_v33 = vld [vmem:[%s10321_s3 + $0x160] sm:$0xff] }
 0x176   :  { %4880 = vmatprep.subr.bf16.mxu1 %v4879_v47  ;;  %v8754_v47 = vpack.c.bf16 %v2043_v37, %v2039_v36  ;;  %v8769_v52 = vpack.c.bf16 %v2042_v43, %v2038_v41  ;;  %v2070_v34 = vld [vmem:[%s10321_s3 + $0x150] sm:$0xff]  ;;  %v2079_v41 = vld [vmem:[%s10321_s3 + $0x198] sm:$0xff] }
 0x177   :  { %v2074_v37 = vld [vmem:[%s10321_s3 + $0x170] sm:$0xff]  ;;  %v2083_v43 = vld [vmem:[%s10321_s3 + $0x1b8] sm:$0xff] }
 0x178   :  { %4690 = vmatpush1.bf16.msra.mxu0 %v4689_v53  ;;  %v8771_v53 = vpack.c.bf16 %v2049_v45, %v2045_v44  ;;  %v8917_v44 = vpack.c.bf16 %v2072_v33, %v2068_v32  ;;  %v2090_v32 = vld [vmem:[%s10321_s3 + $0x1f0] sm:$0xff]  ;;  %v2093_v33 = vld [vmem:[%s10321_s3 + $0x208] sm:$0xff] }
 0x179   :  { %4882 = vmatpush1.bf16.msra.mxu1 %v4881_v54  ;;  %4692 = vmatprep.subr.bf16.mxu0 %v4691_v55  ;;  %v2044_v54 = vld [vmem:[%s10321_s3 + $0x80] sm:$0xff] }
 0x17a   :  { %4884 = vmatprep.subr.bf16.mxu1 %v4883_v59  ;;  %v2048_v55 = vld [vmem:[%s10321_s3 + $0xa0] sm:$0xff]  ;;  %v2053_v59 = vld [vmem:[%s10321_s3 + $0xc8] sm:$0xff]  ;;  %10474 = vst [vmem:[#allocation21_spill] sm:$0xff] %v8917_v44 }
 0x17b   :  { %v8805_v0 = vpack.c.bf16 %v2048_v55, %v2044_v54  ;;  %v2078_v54 = vld [vmem:[%s10321_s3 + $0x190] sm:$0xff] }
 0x17c   :  { %4694 = vmatpush1.bf16.msra.mxu0 %v4693_v1  ;;  %v8809_v1 = vpack.c.bf16 %v2050_v58, %v2046_v56 }
 0x17d   :  { %4886 = vmatpush1.bf16.msra.mxu1 %v4885_v2  ;;  %4696 = vmatprep.subr.bf16.mxu0 %v4695_v3  ;;  %v8811_v2 = vpack.c.bf16 %v2057_v60, %v2053_v59  ;;  %v2052_v3 = vld [vmem:[%s10321_s3 + $0xc0] sm:$0xff]  ;;  %v8940_v59 = vpack.c.bf16 %v2083_v43, %v2079_v41  ;;  %v2082_v60 = vld [vmem:[%s10321_s3 + $0x1b0] sm:$0xff]  ;;  %v2095_v41 = vld [vmem:[%s10321_s3 + $0x218] sm:$0xff] }
 0x17e   :  { %4888 = vmatprep.subr.bf16.mxu1 %v4887_v7  ;;  %v2058_v7 = vld [vmem:[%s10321_s3 + $0xf0] sm:$0xff]  ;;  %v8974_v12 = vpack.c.bf16 %v2082_v60, %v2078_v54  ;;  %v2099_v43 = vld [vmem:[%s10321_s3 + $0x238] sm:$0xff] }
 0x17f   :  { %10478 = vst [vmem:[#allocation25_spill] sm:$0xff] %v8940_v59 }
 0x180   :  { %4698 = vmatpush1.bf16.msra.mxu0 %v4697_v13  ;;  %v8843_v13 = vpack.c.bf16 %v2056_v4, %v2052_v3  ;;  %10484 = vst [vmem:[#allocation31_spill] sm:$0xff] %v8974_v12 }
 0x181   :  { %4890 = vmatpush1.bf16.msra.mxu1 %v4889_v14  ;;  %4700 = vmatprep.subr.bf16.mxu0 %v4699_v15  ;;  %v8847_v14 = vpack.c.bf16 %v2058_v7, %v2054_v5  ;;  %v8849_v15 = vpack.c.bf16 %v2065_v9, %v2061_v8  ;;  %v2087_v7 = vld [vmem:[%s10321_s3 + $0x1d8] sm:$0xff] }
 0x182   :  { %4892 = vmatprep.subr.bf16.mxu1 %v4891_v19  ;;  %v832_v19 = vlaneseq  ;;  %v2091_v8 = vld [vmem:[%s10321_s3 + $0x1f8] sm:$0xff] }
 0x184   :  { %4702 = vmatpush1.bf16.msra.mxu0 %v4701_v25  ;;  %v2075_v25 = vld [vmem:[%s10321_s3 + $0x178] sm:$0xff]  ;;  %v8885_v29 = vshrl.u32 %v832_v19, 7  ;;  %v2086_v19 = vld [vmem:[%s10321_s3 + $0x1d0] sm:$0xff] }
 0x185   :  { %4894 = vmatpush1.bf16.msra.mxu1 %v4893_v26  ;;  %4896 = vmatprep.subr.bf16.mxu0 %v8697_v27  ;;  %v8879_v26 = vpack.c.bf16 %v2064_v17, %v2060_v16  ;;  %v8899_v36 = vpack.c.bf16 %v2075_v25, %v2071_v24  ;;  %v2084_v17 = vld [vmem:[%s10321_s3 + $0x1c0] sm:$0xff]  ;;  %v8997_v25 = vpack.c.bf16 %v2091_v8, %v2087_v7  ;;  %v2094_v7 = vld [vmem:[%s10321_s3 + $0x210] sm:$0xff] }
 0x186   :  { %4960 = vmatprep.subr.bf16.mxu1 %v8705_v30  ;;  %10471 = vst [vmem:[#allocation18_spill] sm:$0xff] %v8885_v29  ;;  %v834_v45 = vsub.s32 0, %v8885_v29  ;;  %v842_v56 = vsub.s32 2, %v8885_v29  ;;  %v838_v58 = vsub.s32 1, %v8885_v29  ;;  %v846_v5 = vsub.s32 3, %v8885_v29 }
 0x187   :  { %1553 = vmatmul.mubr.f32.vlgmr.msra.gmra.mrb[4].mxu0 %v6156_v46  ;;  %10469 = vst [vmem:[#allocation16_spill] sm:$0xff] %v8879_v26  ;;  %10473 = vst [vmem:[#allocation20_spill] sm:$0xff] %v8899_v36  ;;  %v9034_v60 = vpack.c.bf16 %v2090_v32, %v2086_v19  ;;  %v9048_v8 = vpack.c.bf16 %v2099_v43, %v2095_v41  ;;  %v2105_v19 = vld [vmem:[%s10321_s3 + $0x268] sm:$0xff]  ;;  %v2107_v32 = vld [vmem:[%s10321_s3 + $0x278] sm:$0xff] }
 0x188   :  { %1784 = vmatmul.mubr.f32.vlgmr.msra.gmra.mrb[4].mxu1 %v6156_v46  ;;  %4898 = vmatpush1.bf16.msra.mxu0 %v8719_v35  ;;  %v8922_v46 = vpack.c.bf16 %v2074_v37, %v2070_v34  ;;  %v8988_v21 = vrot.slane %v8954_v63, %v834_v45  ;;  %v8991_v22 = vrot.slane %v8954_v63, %v842_v56  ;;  %v2097_v34 = vld [vmem:[%s10321_s3 + $0x228] sm:$0xff]  ;;  %v2104_v41 = vld [vmem:[%s10321_s3 + $0x260] sm:$0xff]  ;;  %v2102_v43 = vld [vmem:[%s10321_s3 + $0x250] sm:$0xff] }
 0x189   :  { %4962 = vmatpush1.bf16.msra.mxu1 %v8728_v38  ;;  %1558 = vmatprep.mubr.f32.mxu0 %v6157_v51  ;;  %v8994_v23 = vrot.slane %v8954_v63, %v838_v58  ;;  %10489 = vst [vmem:[#allocation36_spill] sm:$0xff] %v8997_v25  ;;  %v9009_v37 = vrot.slane %v8954_v63, %v846_v5  ;;  %10496 = vst [vmem:[#allocation43_spill] sm:$0xff] %v9034_v60  ;;  %v2096_v5 = vld [vmem:[%s10321_s3 + $0x220] sm:$0xff] }
 0x18a   :  { %1789 = vmatprep.mubr.f32.mxu1 %v6157_v51  ;;  %4900 = vmatprep.subr.bf16.mxu0 %v8740_v42  ;;  %10475 = vst [vmem:[#allocation22_spill] sm:$0xff] %v8922_v46  ;;  %v2080_v51 = vld [vmem:[%s10321_s3 + $0x1a0] sm:$0xff]  ;;  %10486 = vst [vmem:[#allocation33_spill] sm:$0xff] %v8988_v21  ;;  %v9027_v56 = vpack.c.bf16 %v2088_v18, %v2084_v17  ;;  %v2098_v17 = vld [vmem:[%s10321_s3 + $0x230] sm:$0xff] }
 0x18b   :  { %1559 = vmatmul.mubr.f32.gmra.mrb[6].mxu0 %v6158_v61  ;;  %4964 = vmatprep.subr.bf16.mxu1 %v8754_v47  ;;  %v8970_v11 = vpack.c.bf16 %v2080_v51, %v2076_v49  ;;  %10487 = vst [vmem:[#allocation34_spill] sm:$0xff] %v8991_v22  ;;  %10488 = vst [vmem:[#allocation35_spill] sm:$0xff] %v8994_v23  ;;  %v2101_v18 = vld [vmem:[%s10321_s3 + $0x248] sm:$0xff]  ;;  %v2120_v63 = vld [vmem:[%s10321_s3 + $0x2e0] sm:$0xff] }
 0x18c   :  { %1790 = vmatmul.mubr.f32.gmra.mrb[6].mxu1 %v6158_v61  ;;  %4902 = vmatpush1.bf16.msra.mxu0 %v8763_v50  ;;  %v2085_v61 = vld [vmem:[%s10321_s3 + $0x1c8] sm:$0xff]  ;;  %10490 = vst [vmem:[#allocation37_spill] sm:$0xff] %v9009_v37  ;;  %10494 = vst [vmem:[#allocation41_spill] sm:$0xff] %v9027_v56 }
 0x18d   :  { %4966 = vmatpush1.bf16.msra.mxu1 %v8769_v52  ;;  %4904 = vmatprep.subr.bf16.mxu0 %v8771_v53  ;;  %10483 = vst [vmem:[#allocation30_spill] sm:$0xff] %v8970_v11  ;;  %v8976_v16 = vpack.c.bf16 %v2089_v62, %v2085_v61  ;;  %v9036_v61 = vpack.c.bf16 %v2097_v34, %v2093_v33  ;;  %v2092_v62 = vld [vmem:[%s10321_s3 + $0x200] sm:$0xff]  ;;  %10498 = vst [vmem:[#allocation45_spill] sm:$0xff] %v9048_v8 }
 0x18e   :  { %4968 = vmatprep.subr.bf16.mxu1 %v8783_v57  ;;  %2236 = vmatprep.mubr.f32.mxu0 %v10333_v10  ;;  %v9066_v33 = vpack.c.bf16 %v2096_v5, %v2092_v62  ;;  %v9070_v34 = vpack.c.bf16 %v2098_v17, %v2094_v7  ;;  %v2106_v62 = vld [vmem:[%s10321_s3 + $0x270] sm:$0xff]  ;;  %v2109_v5 = vld [vmem:[%s10321_s3 + $0x288] sm:$0xff]  ;;  %v2111_v17 = vld [vmem:[%s10321_s3 + $0x298] sm:$0xff] }
 0x18f   :  { %2307 = vmatprep.mubr.f32.mxu1 %v10333_v10  ;;  %10485 = vst [vmem:[#allocation32_spill] sm:$0xff] %v8976_v16  ;;  %10497 = vst [vmem:[#allocation44_spill] sm:$0xff] %v9036_v61  ;;  %v2113_v7 = vld [vmem:[%s10321_s3 + $0x2a8] sm:$0xff]  ;;  %v2108_v10 = vld [vmem:[%s10321_s3 + $0x280] sm:$0xff] }
 0x190   :  { %4906 = vmatpush1.bf16.msra.mxu0 %v8805_v0  ;;  %10499 = vst [vmem:[#allocation46_spill] sm:$0xff] %v9066_v33  ;;  %10500 = vst [vmem:[#allocation47_spill] sm:$0xff] %v9070_v34 }
 0x191   :  { %4970 = vmatpush1.bf16.msra.mxu1 %v8809_v1  ;;  %4908 = vmatprep.subr.bf16.mxu0 %v8811_v2 }
 0x192   :  { %4972 = vmatprep.subr.bf16.mxu1 %v8823_v6 }
 0x194   :  { %4910 = vmatpush1.bf16.msra.mxu0 %v8843_v13 }
 0x195   :  { %4974 = vmatpush1.bf16.msra.mxu1 %v8847_v14  ;;  %4912 = vmatprep.subr.bf16.mxu0 %v8849_v15 }
 0x196   :  { %4976 = vmatprep.subr.bf16.mxu1 %v8861_v20 }
 0x198   :  { %4914 = vmatpush1.bf16.msra.mxu0 %v8879_v26 }
 0x199   :  { %4978 = vmatpush1.bf16.msra.mxu1 %v8883_v28  ;;  %4916 = vmatprep.subr.bf16.mxu0 %v8887_v31 }
 0x19a   :  { %v8935_v55 = vpop.f32.mrb[0].mxu0  ;;  %4980 = vmatprep.subr.bf16.mxu1 %v8899_v36 }
 0x19b   :  { %10477 = vst [vmem:[#allocation24_spill] sm:$0xff] %v8935_v55  ;;  %v8956_v3 = vpop.f32.mrb[0].mxu1  ;;  %v8958_v4 = vpop.f32.mrb[1].mxu0  ;;  %v2132_v55 = vld [vmem:[%s10321_s3 + $0x340] sm:$0xff] }
 0x19c   :  { %10480 = vst [vmem:[#allocation27_spill] sm:$0xff] %v8956_v3  ;;  %10481 = vst [vmem:[#allocation28_spill] sm:$0xff] %v8958_v4  ;;  %v8967_v9 = vpop.f32.mrb[1].mxu1  ;;  %4918 = vmatpush1.bf16.msra.mxu0 %v8917_v44  ;;  %v2124_v4 = vld [vmem:[%s10321_s3 + $0x300] sm:$0xff] }
 0x19d   :  { %10482 = vst [vmem:[#allocation29_spill] sm:$0xff] %v8967_v9  ;;  %4982 = vmatpush1.bf16.msra.mxu1 %v8922_v46  ;;  %4920 = vmatprep.subr.bf16.mxu0 %v8924_v48 }
 0x19e   :  { %v1098_v24 = vpop.f32.mrb[2].mxu0  ;;  %4984 = vmatprep.subr.bf16.mxu1 %v8940_v59 }
 0x19f   :  { %v1329_v39 = vpop.f32.mrb[2].mxu1  ;;  %v1100_v40 = vpop.f32.mrb[3].mxu0  ;;  %v9018_v45 = vadd.f32 %v1098_v24, %v8988_v21  ;;  %v2103_v24 = vld [vmem:[%s10321_s3 + $0x258] sm:$0xff]  ;;  %v2136_v21 = vld [vmem:[%s10321_s3 + $0x360] sm:$0xff] }
 0x1a0   :  { %v9021_v49 = vadd.f32 %v1329_v39, %v8991_v22  ;;  %v9024_v51 = vadd.f32 %v1100_v40, %v8994_v23  ;;  %v1331_v54 = vpop.f32.mrb[3].mxu1  ;;  %4922 = vmatpush1.bf16.msra.mxu0 %v8970_v11  ;;  %v9072_v39 = vpack.c.bf16 %v2105_v19, %v2101_v18  ;;  %v2100_v40 = vld [vmem:[%s10321_s3 + $0x240] sm:$0xff]  ;;  %v2115_v18 = vld [vmem:[%s10321_s3 + $0x2b8] sm:$0xff] }
 0x1a1   :  { %10491 = vst [vmem:[#allocation38_spill] sm:$0xff] %v9018_v45  ;;  %v9030_v58 = vadd.f32 %v1331_v54, %v9009_v37  ;;  %4986 = vmatpush1.bf16.msra.mxu1 %v8974_v12  ;;  %4924 = vmatprep.subr.bf16.mxu0 %v8976_v16  ;;  %v9084_v54 = vpack.c.bf16 %v2107_v32, %v2103_v24  ;;  %v2116_v45 = vld [vmem:[%s10321_s3 + $0x2c0] sm:$0xff] }
 0x1a2   :  { %10492 = vst [vmem:[#allocation39_spill] sm:$0xff] %v9021_v49  ;;  %10493 = vst [vmem:[#allocation40_spill] sm:$0xff] %v9024_v51  ;;  %4988 = vmatprep.subr.bf16.mxu1 %v8997_v25  ;;  %v9102_v19 = vpack.c.bf16 %v2104_v41, %v2100_v40  ;;  %v9106_v24 = vpack.c.bf16 %v2106_v62, %v2102_v43  ;;  %v9108_v32 = vpack.c.bf16 %v2113_v7, %v2109_v5  ;;  %v2110_v40 = vld [vmem:[%s10321_s3 + $0x290] sm:$0xff]  ;;  %v2117_v62 = vld [vmem:[%s10321_s3 + $0x2c8] sm:$0xff] }
 0x1a3   :  { %10495 = vst [vmem:[#allocation42_spill] sm:$0xff] %v9030_v58  ;;  %10501 = vst [vmem:[#allocation48_spill] sm:$0xff] %v9072_v39  ;;  %v2112_v58 = vld [vmem:[%s10321_s3 + $0x2a0] sm:$0xff]  ;;  %v9120_v41 = vpack.c.bf16 %v2115_v18, %v2111_v17  ;;  %v2114_v43 = vld [vmem:[%s10321_s3 + $0x2b0] sm:$0xff] }
 0x1a4   :  { %4926 = vmatpush1.bf16.msra.mxu0 %v9027_v56  ;;  %10502 = vst [vmem:[#allocation49_spill] sm:$0xff] %v9084_v54  ;;  %10503 = vst [vmem:[#allocation50_spill] sm:$0xff] %v9102_v19  ;;  %v2121_v5 = vld [vmem:[%s10321_s3 + $0x2e8] sm:$0xff]  ;;  %v2119_v7 = vld [vmem:[%s10321_s3 + $0x2d8] sm:$0xff]  ;;  %v9138_v18 = vpack.c.bf16 %v2112_v58, %v2108_v10  ;;  %v9142_v51 = vpack.c.bf16 %v2114_v43, %v2110_v40 }
 0x1a5   :  { %4990 = vmatpush1.bf16.msra.mxu1 %v9034_v60  ;;  %4928 = vmatprep.subr.bf16.mxu0 %v9036_v61  ;;  %10504 = vst [vmem:[#allocation51_spill] sm:$0xff] %v9106_v24  ;;  %10505 = vst [vmem:[#allocation52_spill] sm:$0xff] %v9108_v32  ;;  %v2123_v17 = vld [vmem:[%s10321_s3 + $0x2f8] sm:$0xff]  ;;  %v9144_v49 = vpack.c.bf16 %v2121_v5, %v2117_v62  ;;  %v2118_v10 = vld [vmem:[%s10321_s3 + $0x2d0] sm:$0xff] }
 0x1a6   :  { %4992 = vmatprep.subr.bf16.mxu1 %v9048_v8  ;;  %10506 = vst [vmem:[#allocation53_spill] sm:$0xff] %v9120_v41  ;;  %10507 = vst [vmem:[#allocation54_spill] sm:$0xff] %v9138_v18  ;;  %v9156_v58 = vpack.c.bf16 %v2123_v17, %v2119_v7  ;;  %v2122_v40 = vld [vmem:[%s10321_s3 + $0x2f0] sm:$0xff]  ;;  %v2125_v43 = vld [vmem:[%s10321_s3 + $0x308] sm:$0xff]  ;;  %v9174_v17 = vpack.c.bf16 %v2120_v63, %v2116_v45 }
 0x1a7   :  { %10508 = vst [vmem:[#allocation55_spill] sm:$0xff] %v9142_v51  ;;  %10509 = vst [vmem:[#allocation56_spill] sm:$0xff] %v9144_v49  ;;  %v2129_v62 = vld [vmem:[%s10321_s3 + $0x328] sm:$0xff]  ;;  %v2127_v5 = vld [vmem:[%s10321_s3 + $0x318] sm:$0xff]  ;;  %v9178_v9 = vpack.c.bf16 %v2122_v40, %v2118_v10 }
 0x1a8   :  { %4930 = vmatpush1.bf16.msra.mxu0 %v9066_v33  ;;  %10510 = vst [vmem:[#allocation57_spill] sm:$0xff] %v9156_v58  ;;  %v2131_v7 = vld [vmem:[%s10321_s3 + $0x338] sm:$0xff]  ;;  %10511 = vst [vmem:[#allocation58_spill] sm:$0xff] %v9174_v17  ;;  %v9180_v37 = vpack.c.bf16 %v2129_v62, %v2125_v43  ;;  %v2128_v23 = vld [vmem:[%s10321_s3 + $0x320] sm:$0xff] }
 0x1a9   :  { %4994 = vmatpush1.bf16.msra.mxu1 %v9070_v34  ;;  %4932 = vmatprep.subr.bf16.mxu0 %v9072_v39  ;;  %10512 = vst [vmem:[#allocation59_spill] sm:$0xff] %v9178_v9  ;;  %v2126_v63 = vld [vmem:[%s10321_s3 + $0x310] sm:$0xff]  ;;  %v9192_v45 = vpack.c.bf16 %v2131_v7, %v2127_v5  ;;  %v2133_v40 = vld [vmem:[%s10321_s3 + $0x348] sm:$0xff]  ;;  %v2135_v62 = vld [vmem:[%s10321_s3 + $0x358] sm:$0xff]  ;;  %v9210_v7 = vpack.c.bf16 %v2128_v23, %v2124_v4 }
 0x1aa   :  { %4996 = vmatprep.subr.bf16.mxu1 %v9084_v54  ;;  %10513 = vst [vmem:[#allocation60_spill] sm:$0xff] %v9180_v37  ;;  %v2130_v10 = vld [vmem:[%s10321_s3 + $0x330] sm:$0xff]  ;;  %v2137_v43 = vld [vmem:[%s10321_s3 + $0x368] sm:$0xff]  ;;  %v2139_v5 = vld [vmem:[%s10321_s3 + $0x378] sm:$0xff] }
 0x1ab   :  { %10514 = vst [vmem:[#allocation61_spill] sm:$0xff] %v9192_v45  ;;  %10515 = vst [vmem:[#allocation62_spill] sm:$0xff] %v9210_v7  ;;  %v9214_v3 = vpack.c.bf16 %v2130_v10, %v2126_v63  ;;  %v9216_v22 = vpack.c.bf16 %v2137_v43, %v2133_v40  ;;  %v2134_v4 = vld [vmem:[%s10321_s3 + $0x350] sm:$0xff]  ;;  %v9228_v23 = vpack.c.bf16 %v2139_v5, %v2135_v62  ;;  %v2141_v10 = vld [vmem:[%s10321_s3 + $0x388] sm:$0xff] }
 0x1ac   :  { %4934 = vmatpush1.bf16.msra.mxu0 %v9102_v19  ;;  %v2138_v63 = vld [vmem:[%s10321_s3 + $0x370] sm:$0xff]  ;;  %v2145_v40 = vld [vmem:[%s10321_s3 + $0x3a8] sm:$0xff]  ;;  %v2143_v43 = vld [vmem:[%s10321_s3 + $0x398] sm:$0xff]  ;;  %v9246_v5 = vpack.c.bf16 %v2136_v21, %v2132_v55 }
 0x1ad   :  { %4998 = vmatpush1.bf16.msra.mxu1 %v9106_v24  ;;  %4936 = vmatprep.subr.bf16.mxu0 %v9108_v32  ;;  %10516 = vst [vmem:[#allocation63_spill] sm:$0xff] %v9214_v3  ;;  %10517 = vst [vmem:[#allocation64_spill] sm:$0xff] %v9216_v22  ;;  %v2147_v62 = vld [vmem:[%s10321_s3 + $0x3b8] sm:$0xff]  ;;  %v9250_v29 = vpack.c.bf16 %v2138_v63, %v2134_v4  ;;  %v2142_v55 = vld [vmem:[%s10321_s3 + $0x390] sm:$0xff] }
 0x1ae   :  { %5000 = vmatprep.subr.bf16.mxu1 %v9120_v41  ;;  %10518 = vst [vmem:[#allocation65_spill] sm:$0xff] %v9228_v23  ;;  %10519 = vst [vmem:[#allocation66_spill] sm:$0xff] %v9246_v5  ;;  %v9264_v21 = vpack.c.bf16 %v2147_v62, %v2143_v43  ;;  %v2146_v4 = vld [vmem:[%s10321_s3 + $0x3b0] sm:$0xff]  ;;  %v2149_v63 = vld [vmem:[%s10321_s3 + $0x3c8] sm:$0xff] }
 0x1af   :  { %10520 = vst [vmem:[#allocation67_spill] sm:$0xff] %v9250_v29  ;;  %v2155_v43 = vld [vmem:[%s10321_s3 + $0x3f8] sm:$0xff] }
 0x1b0   :  { %4938 = vmatpush1.bf16.msra.mxu0 %v9138_v18  ;;  %10522 = vst [vmem:[#allocation69_spill] sm:$0xff] %v9264_v21 }
 0x1b1   :  { %5002 = vmatpush1.bf16.msra.mxu1 %v9142_v51  ;;  %4940 = vmatprep.subr.bf16.mxu0 %v9144_v49 }
 0x1b2   :  { %5004 = vmatprep.subr.bf16.mxu1 %v9156_v58 }
 0x1b4   :  { %4942 = vmatpush1.bf16.msra.mxu0 %v9174_v17 }
 0x1b5   :  { %5006 = vmatpush1.bf16.msra.mxu1 %v9178_v9  ;;  %4944 = vmatprep.subr.bf16.mxu0 %v9180_v37  ;;  %v2140_v37 = vld [vmem:[%s10321_s3 + $0x380] sm:$0xff] }
 0x1b6   :  { %5008 = vmatprep.subr.bf16.mxu1 %v9192_v45  ;;  %v9252_v45 = vpack.c.bf16 %v2145_v40, %v2141_v10  ;;  %v2144_v9 = vld [vmem:[%s10321_s3 + $0x3a0] sm:$0xff]  ;;  %v2153_v10 = vld [vmem:[%s10321_s3 + $0x3e8] sm:$0xff]  ;;  %v2151_v40 = vld [vmem:[%s10321_s3 + $0x3d8] sm:$0xff] }
 0x1b7   :  { %v9282_v62 = vpack.c.bf16 %v2144_v9, %v2140_v37  ;;  %v9297_v9 = vpack.c.bf16 %v2155_v43, %v2151_v40  ;;  %v2150_v37 = vld [vmem:[%s10321_s3 + $0x3d0] sm:$0xff] }
 0x1b8   :  { %4946 = vmatpush1.bf16.msra.mxu0 %v9210_v7  ;;  %10521 = vst [vmem:[#allocation68_spill] sm:$0xff] %v9252_v45  ;;  %v2152_v7 = vld [vmem:[%s10321_s3 + $0x3e0] sm:$0xff]  ;;  %v10532_v40 = vld [vmem:[#allocation61_spill] sm:$0xff]  ;;  %v10533_v43 = vld [vmem:[#allocation62_spill] sm:$0xff] }
 0x1b9   :  { %5010 = vmatpush1.bf16.msra.mxu1 %v9214_v3  ;;  %4948 = vmatprep.subr.bf16.mxu0 %v9216_v22  ;;  %10523 = vst [vmem:[#allocation70_spill] sm:$0xff] %v9282_v62  ;;  %v9288_v22 = vpack.c.bf16 %v2153_v10, %v2149_v63  ;;  %v2148_v3 = vld [vmem:[%s10321_s3 + $0x3c0] sm:$0xff]  ;;  %10526 = vst [vmem:[#allocation73_spill] sm:$0xff] %v9297_v9  ;;  %v10529_v10 = vmov 0.0  }
 0x1ba   :  { %5012 = vmatprep.subr.bf16.mxu1 %v9228_v23  ;;  %v9286_v23 = vpack.c.bf16 %v2146_v4, %v2142_v55  ;;  %v2154_v55 = vld [vmem:[%s10321_s3 + $0x3f0] sm:$0xff]  ;;  %v9306_v4 = vpack.c.bf16 %v2152_v7, %v2148_v3  ;;  %v10530_v3 = vld [vmem:[#allocation59_spill] sm:$0xff]  ;;  %v10531_v7 = vld [vmem:[#allocation60_spill] sm:$0xff] }
 0x1bb   :  { %10525 = vst [vmem:[#allocation72_spill] sm:$0xff] %v9288_v22  ;;  %v9310_v63 = vpack.c.bf16 %v2154_v55, %v2150_v37  ;;  %v10534_v37 = vld [vmem:[#allocation63_spill] sm:$0xff]  ;;  %v10535_v55 = vld [vmem:[#allocation64_spill] sm:$0xff] }
 0x1bc   :  { %4950 = vmatpush1.bf16.msra.mxu0 %v9246_v5  ;;  %10524 = vst [vmem:[#allocation71_spill] sm:$0xff] %v9286_v23  ;;  %10527 = vst [vmem:[#allocation74_spill] sm:$0xff] %v9306_v4 }
 0x1bd   :  { %5014 = vmatpush1.bf16.msra.mxu1 %v9250_v29  ;;  %4952 = vmatprep.subr.bf16.mxu0 %v9252_v45  ;;  %10528 = vst [vmem:[#allocation75_spill] sm:$0xff] %v9310_v63 }
 0x1be   :  { %5016 = vmatprep.subr.bf16.mxu1 %v9264_v21 }
 0x1c0   :  { %4954 = vmatpush1.bf16.msra.mxu0 %v9282_v62 }
 0x1c1   :  { %5018 = vmatpush1.bf16.msra.mxu1 %v9286_v23  ;;  %4956 = vmatprep.subr.bf16.mxu0 %v9288_v22 }
 0x1c2   :  { %5020 = vmatprep.subr.bf16.mxu1 %v9297_v9 }
 0x1c4   :  { %4958 = vmatpush1.bf16.msra.mxu0 %v9306_v4 }
 0x1c5   :  { %5022 = vmatpush1.bf16.msra.mxu1 %v9310_v63  ;;  %5024 = vmatprep.subr.bf16.mxu0 %v8697_v27 }
 0x1c6   :  { %5088 = vmatprep.subr.bf16.mxu1 %v8705_v30 }
 0x1c7   :  { %2237 = vmatmul.mubr.f32.vlgmr.msra.gmra.mrb[8].mxu0 %v10529_v10 }
 0x1c8   :  { %2308 = vmatmul.mubr.f32.vlgmr.msra.gmra.mrb[8].mxu1 %v10529_v10  ;;  %5026 = vmatpush1.bf16.msra.mxu0 %v8719_v35 }
 0x1c9   :  { %5090 = vmatpush1.bf16.msra.mxu1 %v8728_v38  ;;  %5028 = vmatprep.subr.bf16.mxu0 %v8740_v42 }
 0x1ca   :  { %5092 = vmatprep.subr.bf16.mxu1 %v8754_v47 }
 0x1cc   :  { %5030 = vmatpush1.bf16.msra.mxu0 %v8763_v50 }
 0x1cd   :  { %5094 = vmatpush1.bf16.msra.mxu1 %v8769_v52  ;;  %5032 = vmatprep.subr.bf16.mxu0 %v8771_v53 }
 0x1ce   :  { %5096 = vmatprep.subr.bf16.mxu1 %v8783_v57 }
 0x1d0   :  { %5034 = vmatpush1.bf16.msra.mxu0 %v8805_v0 }
 0x1d1   :  { %5098 = vmatpush1.bf16.msra.mxu1 %v8809_v1  ;;  %5036 = vmatprep.subr.bf16.mxu0 %v8811_v2 }
 0x1d2   :  { %5100 = vmatprep.subr.bf16.mxu1 %v8823_v6 }
 0x1d4   :  { %5038 = vmatpush1.bf16.msra.mxu0 %v8843_v13 }
 0x1d5   :  { %5102 = vmatpush1.bf16.msra.mxu1 %v8847_v14  ;;  %5040 = vmatprep.subr.bf16.mxu0 %v8849_v15 }
 0x1d6   :  { %5104 = vmatprep.subr.bf16.mxu1 %v8861_v20 }
 0x1d8   :  { %5042 = vmatpush1.bf16.msra.mxu0 %v8879_v26 }
 0x1d9   :  { %5106 = vmatpush1.bf16.msra.mxu1 %v8883_v28  ;;  %5044 = vmatprep.subr.bf16.mxu0 %v8887_v31 }
 0x1da   :  { %5108 = vmatprep.subr.bf16.mxu1 %v8899_v36 }
 0x1dc   :  { %5046 = vmatpush1.bf16.msra.mxu0 %v8917_v44 }
 0x1dd   :  { %5110 = vmatpush1.bf16.msra.mxu1 %v8922_v46  ;;  %5048 = vmatprep.subr.bf16.mxu0 %v8924_v48 }
 0x1de   :  { %5112 = vmatprep.subr.bf16.mxu1 %v8940_v59 }
 0x1e0   :  { %5050 = vmatpush1.bf16.msra.mxu0 %v8970_v11 }
 0x1e1   :  { %5114 = vmatpush1.bf16.msra.mxu1 %v8974_v12  ;;  %5052 = vmatprep.subr.bf16.mxu0 %v8976_v16 }
 0x1e2   :  { %5116 = vmatprep.subr.bf16.mxu1 %v8997_v25 }
 0x1e4   :  { %5054 = vmatpush1.bf16.msra.mxu0 %v9027_v56 }
 0x1e5   :  { %5118 = vmatpush1.bf16.msra.mxu1 %v9034_v60  ;;  %5056 = vmatprep.subr.bf16.mxu0 %v9036_v61 }
 0x1e6   :  { %5120 = vmatprep.subr.bf16.mxu1 %v9048_v8 }
 0x1e8   :  { %5058 = vmatpush1.bf16.msra.mxu0 %v9066_v33 }
 0x1e9   :  { %5122 = vmatpush1.bf16.msra.mxu1 %v9070_v34  ;;  %5060 = vmatprep.subr.bf16.mxu0 %v9072_v39 }
 0x1ea   :  { %5124 = vmatprep.subr.bf16.mxu1 %v9084_v54 }
 0x1ec   :  { %5062 = vmatpush1.bf16.msra.mxu0 %v9102_v19 }
 0x1ed   :  { %5126 = vmatpush1.bf16.msra.mxu1 %v9106_v24  ;;  %5064 = vmatprep.subr.bf16.mxu0 %v9108_v32 }
 0x1ee   :  { %5128 = vmatprep.subr.bf16.mxu1 %v9120_v41 }
 0x1f0   :  { %5066 = vmatpush1.bf16.msra.mxu0 %v9138_v18  ;;  %v10536_v18 = vld [vmem:[#allocation65_spill] sm:$0xff] }
 0x1f1   :  { %5130 = vmatpush1.bf16.msra.mxu1 %v9142_v51  ;;  %5068 = vmatprep.subr.bf16.mxu0 %v9144_v49  ;;  %v10548_v49 = vld [vmem:[#allocation39_spill] sm:$0xff]  ;;  %v10549_v51 = vld [vmem:[#allocation40_spill] sm:$0xff] }
 0x1f2   :  { %5132 = vmatprep.subr.bf16.mxu1 %v9156_v58 }
 0x1f4   :  { %5070 = vmatpush1.bf16.msra.mxu0 %v9174_v17  ;;  %v10547_v17 = vld [vmem:[#allocation38_spill] sm:$0xff] }
 0x1f5   :  { %5134 = vmatpush1.bf16.msra.mxu1 %v10530_v3  ;;  %5072 = vmatprep.subr.bf16.mxu0 %v10531_v7 }
 0x1f6   :  { %5136 = vmatprep.subr.bf16.mxu1 %v10532_v40 }
 0x1f8   :  { %5074 = vmatpush1.bf16.msra.mxu0 %v10533_v43 }
 0x1f9   :  { %5138 = vmatpush1.bf16.msra.mxu1 %v10534_v37  ;;  %5076 = vmatprep.subr.bf16.mxu0 %v10535_v55 }
 0x1fa   :  { %5140 = vmatprep.subr.bf16.mxu1 %v10536_v18 }
 0x1fc   :  { %5078 = vmatpush1.bf16.msra.mxu0 %v9246_v5  ;;  %v10538_v5 = vld [vmem:[#allocation33_spill] sm:$0xff] }
 0x1fd   :  { %5142 = vmatpush1.bf16.msra.mxu1 %v9250_v29  ;;  %5080 = vmatprep.subr.bf16.mxu0 %v9252_v45  ;;  %v10537_v29 = vld [vmem:[#allocation18_spill] sm:$0xff] }
 0x1fe   :  { %5144 = vmatprep.subr.bf16.mxu1 %v9264_v21  ;;  %v850_v45 = vsub.s32 4, %v10537_v29  ;;  %v10539_v21 = vld [vmem:[#allocation24_spill] sm:$0xff]  ;;  %v858_v40 = vsub.s32 6, %v10537_v29  ;;  %v854_v7 = vsub.s32 5, %v10537_v29  ;;  %vm2161_vm1 = vcmp.lt.s32.totalorder %v10537_v29, 2 }
 0x1ff   :  { %v9386_v18 = vadd.f32 %v10539_v21, %v10538_v5  ;;  %vm2164_vm3 = vmxor %vm2161_vm1, %vm6230_vm2 }
 0x200   :  { %5082 = vmatpush1.bf16.msra.mxu0 %v9282_v62  ;;  %v10540_v62 = vld [vmem:[#allocation34_spill] sm:$0xff]  ;;  %vm2166_vm4 = vmxor %vm2164_vm3, %vm6230_vm2 }
 0x201   :  { %5146 = vmatpush1.bf16.msra.mxu1 %v9286_v23  ;;  %5084 = vmatprep.subr.bf16.mxu0 %v9288_v22  ;;  %v10541_v23 = vld [vmem:[#allocation27_spill] sm:$0xff]  ;;  %v10554_v48 = vrot.slane %v9386_v18, 2 }
 0x202   :  { %5148 = vmatprep.subr.bf16.mxu1 %v9297_v9  ;;  %v9390_v55 = vadd.f32 %v10541_v23, %v10540_v62  ;;  %v10542_v22 = vld [vmem:[#allocation35_spill] sm:$0xff]  ;;  %v10543_v9 = vld [vmem:[#allocation28_spill] sm:$0xff]  ;;  %v862_v62 = vsub.s32 7, %v10537_v29 }
 0x203   :  { %v9394_v37 = vadd.f32 %v10543_v9, %v10542_v22  ;;  %v10603_v29 = vld [vmem:[#allocation16_spill] sm:$0xff] }
 0x204   :  { %5086 = vmatpush1.bf16.msra.mxu0 %v9306_v4  ;;  %v10544_v4 = vld [vmem:[#allocation37_spill] sm:$0xff] }
 0x205   :  { %5150 = vmatpush1.bf16.msra.mxu1 %v9310_v63  ;;  %5152 = vmatprep.subr.bf16.mxu0 %v8697_v27  ;;  %v10545_v63 = vld [vmem:[#allocation29_spill] sm:$0xff]  ;;  %v10546_v27 = vld [vmem:[#allocation26_spill] sm:$0xff]  ;;  %v10555_v31 = vrot.slane %v9394_v37, 2 }
 0x206   :  { %5216 = vmatprep.subr.bf16.mxu1 %v8705_v30  ;;  %v9398_v43 = vadd.f32 %v10545_v63, %v10544_v4  ;;  %v851_v30 = vrot.slane %v10546_v27, %v850_v45  ;;  %v859_v22 = vrot.slane %v10546_v27, %v858_v40  ;;  %v855_v9 = vrot.slane %v10546_v27, %v854_v7  ;;  %v10550_v7 = vld [vmem:[#allocation42_spill] sm:$0xff] }
 0x207   :  { %v863_v3 = vrot.slane %v10546_v27, %v862_v62 }
 0x25a   :  { %v1554_v41 = vpop.f32.mrb[4].mxu0 }
 0x25b   :  { %v9430_v45 = vadd.f32 %v1554_v41, %v851_v30  ;;  %v1785_v63 = vpop.f32.mrb[4].mxu1  ;;  %v1556_v24 = vpop.f32.mrb[5].mxu0 }
 0x25c   :  { %v9433_v62 = vadd.f32 %v1785_v63, %v859_v22  ;;  %v9435_v21 = vadd.f32 %v1556_v24, %v855_v9  ;;  %v1787_v5 = vpop.f32.mrb[5].mxu1 }
 0x25d   :  { %v1916_v58 = vrot.slane %v9430_v45, 4  ;;  %v1951_v40 = vrot.slane %v9430_v45, 2  ;;  %v9440_v23 = vadd.f32 %v1787_v5, %v863_v3 }
 0x25e   :  { %v1918_v41 = vrot.slane %v9433_v62, 4  ;;  %v1953_v4 = vrot.slane %v9433_v62, 2  ;;  %v1917_v63 = vrot.slane %v9435_v21, 4  ;;  %v1560_v24 = vpop.f32.mrb[6].mxu0  ;;  %v1952_v19 = vrot.slane %v9435_v21, 2 }
 0x25f   :  { %v1919_v39 = vrot.slane %v9440_v23, 4  ;;  %v1954_v34 = vrot.slane %v9440_v23, 2  ;;  %v1791_v32 = vpop.f32.mrb[6].mxu1  ;;  %v1562_v5 = vpop.f32.mrb[7].mxu0  ;;  %v5993_v8 = vadd.f32 %v1560_v24, %v851_v30  ;;  %v9453_v25 = vsel %vm1808_vm0, %v10547_v17, %v1916_v58 }
 0x260   :  { %v5997_v61 = vadd.f32 %v1791_v32, %v859_v22  ;;  %v5994_v60 = vadd.f32 %v1562_v5, %v855_v9  ;;  %v1793_v56 = vpop.f32.mrb[7].mxu1  ;;  %10551 = vst [vmem:[#allocation18_spill] sm:$0xff] %v9453_v25  ;;  %v9457_v54 = vsel %vm1808_vm0, %v10549_v51, %v1917_v63  ;;  %v9461_v16 = vsel %vm1808_vm0, %v10548_v49, %v1918_v41  ;;  %v10635_v25 = vld [vmem:[#allocation62_spill] sm:$0xff] }
 0x261   :  { %v5998_v27 = vadd.f32 %v1793_v56, %v863_v3  ;;  %10552 = vst [vmem:[#allocation33_spill] sm:$0xff] %v9457_v54  ;;  %10553 = vst [vmem:[#allocation24_spill] sm:$0xff] %v9461_v16  ;;  %v1800_v12 = vrot.slane %v5993_v8, 4  ;;  %v1835_v11 = vrot.slane %v5993_v8, 2  ;;  %v1889_v33 = vrot.slane %v5993_v8, 6  ;;  %v10633_v16 = vld [vmem:[#allocation60_spill] sm:$0xff] }
 0x262   :  { %v1802_v30 = vrot.slane %v5997_v61, 4  ;;  %v1837_v32 = vrot.slane %v5997_v61, 2  ;;  %v1891_v22 = vrot.slane %v5997_v61, 6  ;;  %v1801_v9 = vrot.slane %v5994_v60, 4  ;;  %v10634_v54 = vld [vmem:[#allocation61_spill] sm:$0xff] }
 0x263   :  { %v1836_v56 = vrot.slane %v5994_v60, 2  ;;  %v1890_v3 = vrot.slane %v5994_v60, 6  ;;  %v1803_v24 = vrot.slane %v5998_v27, 4  ;;  %v1838_v58 = vrot.slane %v5998_v27, 2 }
 0x264   :  { %v1892_v5 = vrot.slane %v5998_v27, 6  ;;  %v1809_v63 = vsel %vm1808_vm0, %v9386_v18, %v1800_v12  ;;  %v1810_v59 = vsel %vm1808_vm0, %v9394_v37, %v1801_v9  ;;  %v1811_v41 = vsel %vm1808_vm0, %v9390_v55, %v1802_v30 }
 0x265   :  { %v9472_v46 = vsel %vm1808_vm0, %v10554_v48, %v1835_v11  ;;  %v1817_v44 = vcombine.low %v1809_v63, %v1810_v59  ;;  %v1812_v36 = vsel %vm1808_vm0, %v9398_v43, %v1803_v24  ;;  %v9479_v28 = vsel %vm1808_vm0, %v10555_v31, %v1836_v56 }
 0x266   :  { %v10556_v12 = vrot.slane %v9390_v55, 2  ;;  %v1818_v30 = vcombine.low %v1811_v41, %v1812_v36  ;;  %v10557_v48 = vrot.slane %v9398_v43, 2  ;;  %v10558_v11 = vrot.slane %v9386_v18, 4 }
 0x267   :  { %v10562_v56 = vrot.slane %v9390_v55, 4 }
 0x268   :  { %v9484_v9 = vsel %vm1808_vm0, %v10556_v12, %v1837_v32  ;;  %v9491_v59 = vsel %vm1808_vm0, %v10557_v48, %v1838_v58  ;;  %v9496_v24 = vsel %vm1808_vm0, %v10558_v11, %v5993_v8  ;;  %v10560_v32 = vrot.slane %v9394_v37, 4 }
 0x269   :  { %10559 = vst [vmem:[#allocation34_spill] sm:$0xff] %v9496_v24  ;;  %v9508_v63 = vsel %vm1808_vm0, %v10562_v56, %v5997_v61  ;;  %v10564_v58 = vrot.slane %v9398_v43, 4  ;;  %v10566_v48 = vrot.slane %v9386_v18, 6  ;;  %v10568_v11 = vrot.slane %v9394_v37, 6  ;;  %v10643_v24 = vld [vmem:[#allocation70_spill] sm:$0xff] }
 0x26a   :  { %v9503_v36 = vsel %vm1808_vm0, %v10560_v32, %v5994_v60  ;;  %10563 = vst [vmem:[#allocation35_spill] sm:$0xff] %v9508_v63  ;;  %v10570_v32 = vrot.slane %v9390_v55, 6  ;;  %v10575_v55 = vrot.slane %v10547_v17, 2  ;;  %v10594_v37 = vrot.slane %v9435_v21, 6  ;;  %v10641_v63 = vld [vmem:[#allocation68_spill] sm:$0xff] }
 0x26b   :  { %10561 = vst [vmem:[#allocation27_spill] sm:$0xff] %v9503_v36  ;;  %v9513_v41 = vsel %vm1808_vm0, %v10564_v58, %v5998_v27  ;;  %v9522_v60 = vsel %vm1808_vm0, %v10566_v48, %v1889_v33  ;;  %v9527_v61 = vsel %vm1808_vm0, %v10568_v11, %v1890_v3  ;;  %v10572_v58 = vrot.slane %v9398_v43, 6  ;;  %v10642_v36 = vld [vmem:[#allocation69_spill] sm:$0xff] }
 0x26c   :  { %10565 = vst [vmem:[#allocation28_spill] sm:$0xff] %v9513_v41  ;;  %10567 = vst [vmem:[#allocation37_spill] sm:$0xff] %v9522_v60  ;;  %v9534_v56 = vsel %vm1808_vm0, %v10570_v32, %v1891_v22  ;;  %v9547_v3 = vsel %vm1808_vm0, %v10550_v7, %v1919_v39  ;;  %v9552_v22 = vsel %vm1808_vm0, %v10575_v55, %v1951_v40  ;;  %v10577_v43 = vrot.slane %v10549_v51, 2  ;;  %v10639_v60 = vld [vmem:[#allocation66_spill] sm:$0xff]  ;;  %v10640_v41 = vld [vmem:[#allocation67_spill] sm:$0xff] }
 0x26d   :  { %10569 = vst [vmem:[#allocation29_spill] sm:$0xff] %v9527_v61  ;;  %10571 = vst [vmem:[#allocation26_spill] sm:$0xff] %v9534_v56  ;;  %v9539_v18 = vsel %vm1808_vm0, %v10572_v58, %v1892_v5  ;;  %v10579_v32 = vrot.slane %v10548_v49, 2  ;;  %v10581_v58 = vrot.slane %v10550_v7, 2  ;;  %v10583_v55 = vrot.slane %v10547_v17, 4  ;;  %v10637_v56 = vld [vmem:[#allocation64_spill] sm:$0xff] }
 0x26e   :  { %10573 = vst [vmem:[#allocation38_spill] sm:$0xff] %v9539_v18  ;;  %10574 = vst [vmem:[#allocation39_spill] sm:$0xff] %v9547_v3  ;;  %v9557_v5 = vsel %vm1808_vm0, %v10577_v43, %v1952_v19  ;;  %v10585_v11 = vrot.slane %v10549_v51, 4  ;;  %v10589_v19 = vrot.slane %v10550_v7, 4  ;;  %v10591_v48 = vrot.slane %v9430_v45, 6  ;;  %v10632_v3 = vld [vmem:[#allocation59_spill] sm:$0xff] }
 0x26f   :  { %10576 = vst [vmem:[#allocation40_spill] sm:$0xff] %v9552_v22  ;;  %10578 = vst [vmem:[#allocation42_spill] sm:$0xff] %v9557_v5  ;;  %v9566_v39 = vsel %vm1808_vm0, %v10579_v32, %v1953_v4  ;;  %v9571_v40 = vsel %vm1808_vm0, %v10581_v58, %v1954_v34  ;;  %v9579_v43 = vsel %vm1808_vm0, %v10583_v55, %v9430_v45  ;;  %v10587_v32 = vrot.slane %v10548_v49, 4  ;;  %v10630_v5 = vld [vmem:[#allocation57_spill] sm:$0xff]  ;;  %v10631_v22 = vld [vmem:[#allocation58_spill] sm:$0xff] }
 0x270   :  { %10580 = vst [vmem:[#allocation76_spill] sm:$0xff] %v9566_v39  ;;  %10582 = vst [vmem:[#allocation77_spill] sm:$0xff] %v9571_v40  ;;  %v9585_v4 = vsel %vm1808_vm0, %v10585_v11, %v9435_v21  ;;  %v9599_v55 = vsel %vm1808_vm0, %v10589_v19, %v9440_v23  ;;  %v10592_v11 = vrot.slane %v10547_v17, 6  ;;  %v10597_v45 = vrot.slane %v9433_v62, 6  ;;  %v10628_v40 = vld [vmem:[#allocation55_spill] sm:$0xff]  ;;  %v10629_v39 = vld [vmem:[#allocation56_spill] sm:$0xff] }
 0x271   :  { %10584 = vst [vmem:[#allocation78_spill] sm:$0xff] %v9579_v43  ;;  %10586 = vst [vmem:[#allocation79_spill] sm:$0xff] %v9585_v4  ;;  %v9591_v34 = vsel %vm1808_vm0, %v10587_v32, %v9433_v62  ;;  %v10595_v32 = vrot.slane %v10549_v51, 6  ;;  %v10598_v17 = vrot.slane %v10548_v49, 6  ;;  %v10600_v21 = vrot.slane %v9440_v23, 6  ;;  %v10626_v4 = vld [vmem:[#allocation53_spill] sm:$0xff] }
 0x272   :  { %10588 = vst [vmem:[#allocation80_spill] sm:$0xff] %v9591_v34  ;;  %10590 = vst [vmem:[#allocation81_spill] sm:$0xff] %v9599_v55  ;;  %v9606_v33 = vsel %vm1808_vm0, %v10592_v11, %v10591_v48  ;;  %v10601_v51 = vrot.slane %v10550_v7, 6  ;;  %v10624_v55 = vld [vmem:[#allocation51_spill] sm:$0xff]  ;;  %v10625_v34 = vld [vmem:[#allocation52_spill] sm:$0xff] }
 0x273   :  { %10593 = vst [vmem:[#allocation82_spill] sm:$0xff] %v9606_v33  ;;  %v9613_v27 = vsel %vm1808_vm0, %v10595_v32, %v10594_v37  ;;  %v9624_v48 = vsel %vm1808_vm0, %v10598_v17, %v10597_v45  ;;  %v10623_v33 = vld [vmem:[#allocation50_spill] sm:$0xff]  ;;  %v10636_v18 = vld [vmem:[#allocation63_spill] sm:$0xff]  ;;  %v10638_v61 = vld [vmem:[#allocation65_spill] sm:$0xff] }
 0x274   :  { %10596 = vst [vmem:[#allocation83_spill] sm:$0xff] %v9613_v27  ;;  %10599 = vst [vmem:[#allocation84_spill] sm:$0xff] %v9624_v48  ;;  %v9631_v37 = vsel %vm1808_vm0, %v10601_v51, %v10600_v21  ;;  %v10627_v43 = vld [vmem:[#allocation54_spill] sm:$0xff] }
 0x275   :  { %10602 = vst [vmem:[#allocation85_spill] sm:$0xff] %v9631_v37 }
 0x29a   :  { %v2238_v32 = vpop.f32.mrb[8].mxu0 }
 0x29b   :  { %v2309_v58 = vpop.f32.mrb[8].mxu1  ;;  %v2240_v19 = vpop.f32.mrb[9].mxu0 }
 0x29c   :  { %v2318_v12 = vcombine.low %v2238_v32, %v2240_v19  ;;  %v2311_v62 = vpop.f32.mrb[9].mxu1 }
 0x29d   :  { %v2319_v8 = vcombine.low %v2309_v58, %v2311_v62  ;;  %v10605_v58 = vld [vmem:[#allocation19_spill] sm:$0xff] }
 0x29e   :  { %v2322_v49 = vadd.f32 %v2318_v12, %v1817_v44  ;;  %v10609_v62 = vld [vmem:[#allocation23_spill] sm:$0xff] }
 0x29f   :  { %v2323_v31 = vadd.f32 %v2319_v8, %v1818_v30  ;;  %v9640_v30 = vsel %vm2166_vm4, 1.0, %v10529_v10 }
 0x2a0   :  { %v4018_v45 = vmul.f32 -1.442695, %v2322_v49  ;;  %v10610_v49 = vld [vmem:[#allocation25_spill] sm:$0xff] }
 0x2a1   :  { %v4019_v17 = vmul.f32 -1.442695, %v2323_v31  ;;  %v2337_v23 = vrot.slane %v2323_v31, 4  ;;  %v9643_v31 = vsel %vm2164_vm3, 1.0, %v10529_v10  ;;  %v10604_v10 = vld [vmem:[#allocation17_spill] sm:$0xff] }
 0x2a2   :  { %6047 = vpow2.f32 %v4018_v45  ;;  %v10611_v45 = vld [vmem:[#allocation30_spill] sm:$0xff] }
 0x2a3   :  { %6049 = vpow2.f32 %v4019_v17  ;;  %v10612_v17 = vld [vmem:[#allocation31_spill] sm:$0xff] }
 0x2a4   :  { %6051 = vtanh.f32 %v2337_v23  ;;  %v10613_v23 = vld [vmem:[#allocation32_spill] sm:$0xff] }
 0x2ac   :  { %v6048_v26 = vpop.eup %6047 }
 0x2ad   :  { %v2330_v7 = vadd.f32 1.0, %v6048_v26  ;;  %v6050_v21 = vpop.eup %6049 }
 0x2ae   :  { %v6052_v51 = vpop.eup %6051  ;;  %v2331_v27 = vadd.f32 1.0, %v6050_v21  ;;  %v10615_v21 = vld [vmem:[#allocation41_spill] sm:$0xff] }
 0x2af   :  { %6053 = vrcp.f32 %v2330_v7  ;;  %v10614_v7 = vld [vmem:[#allocation36_spill] sm:$0xff] }
 0x2b0   :  { %6055 = vrcp.f32 %v2331_v27 }
 0x2b9   :  { %v6054_v11 = vpop.eup %6053 }
 0x2ba   :  { %v2341_v37 = vrot.slane %v6054_v11, 4  ;;  %v2344_v48 = vmul.f32 %v6054_v11, %v6052_v51  ;;  %v6056_v26 = vpop.eup %6055  ;;  %v10608_v11 = vld [vmem:[#allocation22_spill] sm:$0xff]  ;;  %v10616_v51 = vld [vmem:[#allocation43_spill] sm:$0xff] }
 0x2bc   :  { %v2343_v19 = vmul.f32 0.0, %v2341_v37  ;;  %v10607_v37 = vld [vmem:[#allocation21_spill] sm:$0xff] }
 0x2be   :  { %v9635_v32 = vadd.f32 %v2344_v48, %v2343_v19  ;;  %v10606_v48 = vld [vmem:[#allocation20_spill] sm:$0xff] }
 0x2bf   :  { %v10617_v19 = vld [vmem:[#allocation44_spill] sm:$0xff] }
 0x2c0   :  { %6057 = vtanh.f32 %v9635_v32 }
 0x2ca   :  { %v6058_v44 = vpop.eup %6057 }
 0x2cb   :  { %v2347_v8 = vmul.f32 %v6058_v44, %v6056_v26  ;;  %v10618_v26 = vld [vmem:[#allocation45_spill] sm:$0xff]  ;;  %v10619_v44 = vld [vmem:[#allocation46_spill] sm:$0xff] }
 0x2cd   :  { %2348 = vst [vmem:[#allocation3] sm:$0x3] %v2347_v8  ;;  %2349 = vst [vmem:[#allocation4 - $0x2] sm:$0xc] %v2347_v8  ;;  %v2351_v12 = vmul.f32 %v2347_v8, %v9643_v31  ;;  %v2350_v27 = vmul.f32 %v2347_v8, %v9640_v30  ;;  %v10620_v8 = vld [vmem:[#allocation47_spill] sm:$0xff] }
 0x2cf   :  { %2418 = vmatprep.mubr.f32.mxu0 %v2351_v12  ;;  %2489 = vmatprep.mubr.f32.mxu1 %v2351_v12  ;;  %v10621_v12 = vld [vmem:[#allocation48_spill] sm:$0xff] }
 0x2d0   :  { %2419 = vmatmul.mubr.f32.vlgmr.msra.gmra.mrb[10].mxu0 %v2350_v27  ;;  %2490 = vmatmul.mubr.f32.vlgmr.msra.gmra.mrb[10].mxu1 %v2350_v27  ;;  %v10622_v27 = vld [vmem:[#allocation49_spill] sm:$0xff] }
 0x2d1   :  { %5154 = vmatpush1.bf16.msra.mxu0 %v8719_v35  ;;  %5218 = vmatpush1.bf16.msra.mxu1 %v8728_v38 }
 0x2d2   :  { %5156 = vmatprep.subr.bf16.mxu0 %v8740_v42  ;;  %5220 = vmatprep.subr.bf16.mxu1 %v8754_v47 }
 0x2d5   :  { %5158 = vmatpush1.bf16.msra.mxu0 %v8763_v50  ;;  %5222 = vmatpush1.bf16.msra.mxu1 %v8769_v52 }
 0x2d6   :  { %5160 = vmatprep.subr.bf16.mxu0 %v8771_v53  ;;  %5224 = vmatprep.subr.bf16.mxu1 %v8783_v57 }
 0x2d9   :  { %5162 = vmatpush1.bf16.msra.mxu0 %v8805_v0  ;;  %5226 = vmatpush1.bf16.msra.mxu1 %v8809_v1 }
 0x2da   :  { %5164 = vmatprep.subr.bf16.mxu0 %v8811_v2  ;;  %5228 = vmatprep.subr.bf16.mxu1 %v8823_v6 }
 0x2dd   :  { %5166 = vmatpush1.bf16.msra.mxu0 %v8843_v13  ;;  %5230 = vmatpush1.bf16.msra.mxu1 %v8847_v14 }
 0x2de   :  { %5168 = vmatprep.subr.bf16.mxu0 %v8849_v15  ;;  %5232 = vmatprep.subr.bf16.mxu1 %v8861_v20 }
 0x2e1   :  { %5170 = vmatpush1.bf16.msra.mxu0 %v10603_v29  ;;  %5234 = vmatpush1.bf16.msra.mxu1 %v10604_v10 }
 0x2e2   :  { %5172 = vmatprep.subr.bf16.mxu0 %v10605_v58  ;;  %5236 = vmatprep.subr.bf16.mxu1 %v10606_v48 }
 0x2e5   :  { %5174 = vmatpush1.bf16.msra.mxu0 %v10607_v37  ;;  %5238 = vmatpush1.bf16.msra.mxu1 %v10608_v11 }
 0x2e6   :  { %5176 = vmatprep.subr.bf16.mxu0 %v10609_v62  ;;  %5240 = vmatprep.subr.bf16.mxu1 %v10610_v49 }
 0x2e9   :  { %5178 = vmatpush1.bf16.msra.mxu0 %v10611_v45  ;;  %5242 = vmatpush1.bf16.msra.mxu1 %v10612_v17 }
 0x2ea   :  { %5180 = vmatprep.subr.bf16.mxu0 %v10613_v23  ;;  %5244 = vmatprep.subr.bf16.mxu1 %v10614_v7 }
 0x2ed   :  { %5182 = vmatpush1.bf16.msra.mxu0 %v10615_v21  ;;  %5246 = vmatpush1.bf16.msra.mxu1 %v10616_v51 }
 0x2ee   :  { %5184 = vmatprep.subr.bf16.mxu0 %v10617_v19  ;;  %5248 = vmatprep.subr.bf16.mxu1 %v10618_v26 }
 0x2f1   :  { %5186 = vmatpush1.bf16.msra.mxu0 %v10619_v44  ;;  %5250 = vmatpush1.bf16.msra.mxu1 %v10620_v8 }
 0x2f2   :  { %5188 = vmatprep.subr.bf16.mxu0 %v10621_v12  ;;  %5252 = vmatprep.subr.bf16.mxu1 %v10622_v27 }
 0x2f5   :  { %5190 = vmatpush1.bf16.msra.mxu0 %v10623_v33  ;;  %5254 = vmatpush1.bf16.msra.mxu1 %v10624_v55 }
 0x2f6   :  { %5192 = vmatprep.subr.bf16.mxu0 %v10625_v34  ;;  %5256 = vmatprep.subr.bf16.mxu1 %v10626_v4 }
 0x2f9   :  { %5194 = vmatpush1.bf16.msra.mxu0 %v10627_v43  ;;  %5258 = vmatpush1.bf16.msra.mxu1 %v10628_v40 }
 0x2fa   :  { %5196 = vmatprep.subr.bf16.mxu0 %v10629_v39  ;;  %5260 = vmatprep.subr.bf16.mxu1 %v10630_v5 }
 0x2fd   :  { %5198 = vmatpush1.bf16.msra.mxu0 %v10631_v22  ;;  %5262 = vmatpush1.bf16.msra.mxu1 %v10632_v3 }
 0x2fe   :  { %5200 = vmatprep.subr.bf16.mxu0 %v10633_v16  ;;  %5264 = vmatprep.subr.bf16.mxu1 %v10634_v54  ;;  %v10644_v16 = vld [vmem:[#allocation71_spill] sm:$0xff]  ;;  %v10645_v54 = vld [vmem:[#allocation72_spill] sm:$0xff] }
 0x301   :  { %5202 = vmatpush1.bf16.msra.mxu0 %v10635_v25  ;;  %5266 = vmatpush1.bf16.msra.mxu1 %v10636_v18  ;;  %v10646_v25 = vld [vmem:[#allocation73_spill] sm:$0xff]  ;;  %v10647_v18 = vld [vmem:[#allocation74_spill] sm:$0xff] }
 0x302   :  { %5204 = vmatprep.subr.bf16.mxu0 %v10637_v56  ;;  %5268 = vmatprep.subr.bf16.mxu1 %v10638_v61  ;;  %v10648_v56 = vld [vmem:[#allocation75_spill] sm:$0xff]  ;;  %v10649_v61 = vld [vmem:[#allocation14_spill] sm:$0xff] }
 0x305   :  { %5206 = vmatpush1.bf16.msra.mxu0 %v10639_v60  ;;  %5270 = vmatpush1.bf16.msra.mxu1 %v10640_v41  ;;  %v10650_v60 = vld [vmem:[#allocation15_spill] sm:$0xff] }
 0x306   :  { %5208 = vmatprep.subr.bf16.mxu0 %v10641_v63  ;;  %5272 = vmatprep.subr.bf16.mxu1 %v10642_v36 }
 0x309   :  { %5210 = vmatpush1.bf16.msra.mxu0 %v10643_v24  ;;  %5274 = vmatpush1.bf16.msra.mxu1 %v10644_v16  ;;  %v10651_v16 = vcombine.low %v9472_v46, %v9479_v28 }
 0x30a   :  { %5212 = vmatprep.subr.bf16.mxu0 %v10645_v54  ;;  %5276 = vmatprep.subr.bf16.mxu1 %v10646_v25  ;;  %v10652_v25 = vcombine.low %v9484_v9, %v9491_v59 }
 0x30d   :  { %5214 = vmatpush1.bf16.msra.mxu0 %v10647_v18  ;;  %5278 = vmatpush1.bf16.msra.mxu1 %v10648_v56 }
 0x30e   :  { %5280 = vmatprep.subr.bf16.mxu0 %v10649_v61  ;;  %5344 = vmatprep.subr.bf16.mxu1 %v10650_v60 }
 0x3a3   :  { %v2420_v41 = vpop.f32.mrb[10].mxu0  ;;  %v2491_v63 = vpop.f32.mrb[10].mxu1 }
 0x3a4   :  { %v2422_v3 = vpop.f32.mrb[11].mxu0  ;;  %v2493_v36 = vpop.f32.mrb[11].mxu1 }
 0x3a5   :  { %v2500_v22 = vcombine.low %v2420_v41, %v2422_v3  ;;  %v2501_v24 = vcombine.low %v2491_v63, %v2493_v36 }
 0x3a7   :  { %v2504_v54 = vadd.f32 %v2500_v22, %v10651_v16  ;;  %v2505_v18 = vadd.f32 %v2501_v24, %v10652_v25  ;;  %v10657_v22 = vld [vmem:[#allocation59_spill] sm:$0xff] }
 0x3a9   :  { %v4020_v5 = vmul.f32 -1.442695, %v2504_v54  ;;  %v4021_v56 = vmul.f32 -1.442695, %v2505_v18  ;;  %v2519_v61 = vrot.slane %v2505_v18, 4  ;;  %v10656_v18 = vld [vmem:[#allocation58_spill] sm:$0xff] }
 0x3ab   :  { %6059 = vpow2.f32 %v4020_v5  ;;  %v10658_v5 = vld [vmem:[#allocation60_spill] sm:$0xff] }
 0x3ac   :  { %6061 = vpow2.f32 %v4021_v56  ;;  %v10655_v56 = vld [vmem:[#allocation57_spill] sm:$0xff] }
 0x3ad   :  { %6063 = vtanh.f32 %v2519_v61  ;;  %v10654_v61 = vld [vmem:[#allocation56_spill] sm:$0xff] }
 0x3b5   :  { %v6060_v39 = vpop.eup %6059 }
 0x3b6   :  { %v2512_v60 = vadd.f32 1.0, %v6060_v39  ;;  %v6062_v40 = vpop.eup %6061  ;;  %v10659_v39 = vld [vmem:[#allocation61_spill] sm:$0xff] }
 0x3b7   :  { %v6064_v41 = vpop.eup %6063  ;;  %v2513_v28 = vadd.f32 1.0, %v6062_v40  ;;  %v10660_v40 = vld [vmem:[#allocation62_spill] sm:$0xff] }
 0x3b8   :  { %6065 = vrcp.f32 %v2512_v60  ;;  %v10653_v60 = vld [vmem:[#allocation55_spill] sm:$0xff] }
 0x3b9   :  { %6067 = vrcp.f32 %v2513_v28  ;;  %v10666_v28 = vld [vmem:[#allocation68_spill] sm:$0xff] }
 0x3c2   :  { %v6066_v36 = vpop.eup %6065 }
 0x3c3   :  { %v2523_v63 = vrot.slane %v6066_v36, 4  ;;  %v2526_v3 = vmul.f32 %v6066_v36, %v6064_v41  ;;  %v6068_v25 = vpop.eup %6067  ;;  %v10662_v41 = vld [vmem:[#allocation64_spill] sm:$0xff]  ;;  %v10663_v36 = vld [vmem:[#allocation65_spill] sm:$0xff] }
 0x3c5   :  { %v2525_v46 = vmul.f32 %v2523_v63, %v9635_v32  ;;  %v10661_v32 = vld [vmem:[#allocation63_spill] sm:$0xff]  ;;  %v10664_v63 = vld [vmem:[#allocation66_spill] sm:$0xff] }
 0x3c7   :  { %v9718_v16 = vadd.f32 %v2526_v3, %v2525_v46  ;;  %v10665_v3 = vld [vmem:[#allocation67_spill] sm:$0xff]  ;;  %v10667_v46 = vld [vmem:[#allocation69_spill] sm:$0xff] }
 0x3c9   :  { %6069 = vtanh.f32 %v9718_v16 }
 0x3d3   :  { %v6070_v54 = vpop.eup %6069 }
 0x3d4   :  { %v2529_v9 = vmul.f32 %v6070_v54, %v6068_v25  ;;  %v10668_v25 = vld [vmem:[#allocation70_spill] sm:$0xff]  ;;  %v10669_v54 = vld [vmem:[#allocation71_spill] sm:$0xff] }
 0x3d6   :  { %2531 = vst [vmem:[#allocation3 + $0x2] sm:$0x3] %v2529_v9  ;;  %2533 = vst [vmem:[#allocation4] sm:$0xc] %v2529_v9  ;;  %v2535_v59 = vmul.f32 %v2529_v9, %v9643_v31  ;;  %v2534_v24 = vmul.f32 %v2529_v9, %v9640_v30  ;;  %v10670_v9 = vld [vmem:[#allocation72_spill] sm:$0xff] }
 0x3d8   :  { %2602 = vmatprep.mubr.f32.mxu0 %v2535_v59  ;;  %2673 = vmatprep.mubr.f32.mxu1 %v2535_v59  ;;  %v10671_v59 = vld [vmem:[#allocation73_spill] sm:$0xff] }
 0x3d9   :  { %2603 = vmatmul.mubr.f32.vlgmr.msra.gmra.mrb[12].mxu0 %v2534_v24  ;;  %2674 = vmatmul.mubr.f32.vlgmr.msra.gmra.mrb[12].mxu1 %v2534_v24  ;;  %v10672_v24 = vld [vmem:[#allocation74_spill] sm:$0xff] }
 0x3da   :  { %5282 = vmatpush1.bf16.msra.mxu0 %v8719_v35  ;;  %5346 = vmatpush1.bf16.msra.mxu1 %v8728_v38 }
 0x3db   :  { %5284 = vmatprep.subr.bf16.mxu0 %v8740_v42  ;;  %5348 = vmatprep.subr.bf16.mxu1 %v8754_v47 }
 0x3de   :  { %5286 = vmatpush1.bf16.msra.mxu0 %v8763_v50  ;;  %5350 = vmatpush1.bf16.msra.mxu1 %v8769_v52 }
 0x3df   :  { %5288 = vmatprep.subr.bf16.mxu0 %v8771_v53  ;;  %5352 = vmatprep.subr.bf16.mxu1 %v8783_v57 }
 0x3e2   :  { %5290 = vmatpush1.bf16.msra.mxu0 %v8805_v0  ;;  %5354 = vmatpush1.bf16.msra.mxu1 %v8809_v1 }
 0x3e3   :  { %5292 = vmatprep.subr.bf16.mxu0 %v8811_v2  ;;  %5356 = vmatprep.subr.bf16.mxu1 %v8823_v6 }
 0x3e6   :  { %5294 = vmatpush1.bf16.msra.mxu0 %v8843_v13  ;;  %5358 = vmatpush1.bf16.msra.mxu1 %v8847_v14 }
 0x3e7   :  { %5296 = vmatprep.subr.bf16.mxu0 %v8849_v15  ;;  %5360 = vmatprep.subr.bf16.mxu1 %v8861_v20 }
 0x3ea   :  { %5298 = vmatpush1.bf16.msra.mxu0 %v10603_v29  ;;  %5362 = vmatpush1.bf16.msra.mxu1 %v10604_v10 }
 0x3eb   :  { %5300 = vmatprep.subr.bf16.mxu0 %v10605_v58  ;;  %5364 = vmatprep.subr.bf16.mxu1 %v10606_v48 }
 0x3ee   :  { %5302 = vmatpush1.bf16.msra.mxu0 %v10607_v37  ;;  %5366 = vmatpush1.bf16.msra.mxu1 %v10608_v11 }
 0x3ef   :  { %5304 = vmatprep.subr.bf16.mxu0 %v10609_v62  ;;  %5368 = vmatprep.subr.bf16.mxu1 %v10610_v49 }
 0x3f2   :  { %5306 = vmatpush1.bf16.msra.mxu0 %v10611_v45  ;;  %5370 = vmatpush1.bf16.msra.mxu1 %v10612_v17 }
 0x3f3   :  { %5308 = vmatprep.subr.bf16.mxu0 %v10613_v23  ;;  %5372 = vmatprep.subr.bf16.mxu1 %v10614_v7 }
 0x3f6   :  { %5310 = vmatpush1.bf16.msra.mxu0 %v10615_v21  ;;  %5374 = vmatpush1.bf16.msra.mxu1 %v10616_v51 }
 0x3f7   :  { %5312 = vmatprep.subr.bf16.mxu0 %v10617_v19  ;;  %5376 = vmatprep.subr.bf16.mxu1 %v10618_v26 }
 0x3fa   :  { %5314 = vmatpush1.bf16.msra.mxu0 %v10619_v44  ;;  %5378 = vmatpush1.bf16.msra.mxu1 %v10620_v8 }
 0x3fb   :  { %5316 = vmatprep.subr.bf16.mxu0 %v10621_v12  ;;  %5380 = vmatprep.subr.bf16.mxu1 %v10622_v27 }
 0x3fe   :  { %5318 = vmatpush1.bf16.msra.mxu0 %v10623_v33  ;;  %5382 = vmatpush1.bf16.msra.mxu1 %v10624_v55 }
 0x3ff   :  { %5320 = vmatprep.subr.bf16.mxu0 %v10625_v34  ;;  %5384 = vmatprep.subr.bf16.mxu1 %v10626_v4 }
 0x402   :  { %5322 = vmatpush1.bf16.msra.mxu0 %v10627_v43  ;;  %5386 = vmatpush1.bf16.msra.mxu1 %v10653_v60 }
 0x403   :  { %5324 = vmatprep.subr.bf16.mxu0 %v10654_v61  ;;  %5388 = vmatprep.subr.bf16.mxu1 %v10655_v56 }
 0x406   :  { %5326 = vmatpush1.bf16.msra.mxu0 %v10656_v18  ;;  %5390 = vmatpush1.bf16.msra.mxu1 %v10657_v22  ;;  %v10679_v22 = vld [vmem:[#allocation35_spill] sm:$0xff] }
 0x407   :  { %5328 = vmatprep.subr.bf16.mxu0 %v10658_v5  ;;  %5392 = vmatprep.subr.bf16.mxu1 %v10659_v39  ;;  %v10676_v39 = vld [vmem:[#allocation34_spill] sm:$0xff] }
 0x40a   :  { %5330 = vmatpush1.bf16.msra.mxu0 %v10660_v40  ;;  %5394 = vmatpush1.bf16.msra.mxu1 %v10661_v32 }
 0x40b   :  { %5332 = vmatprep.subr.bf16.mxu0 %v10662_v41  ;;  %5396 = vmatprep.subr.bf16.mxu1 %v10663_v36  ;;  %v10673_v41 = vld [vmem:[#allocation75_spill] sm:$0xff]  ;;  %v10674_v36 = vld [vmem:[#allocation14_spill] sm:$0xff] }
 0x40e   :  { %5334 = vmatpush1.bf16.msra.mxu0 %v10664_v63  ;;  %5398 = vmatpush1.bf16.msra.mxu1 %v10665_v3  ;;  %v10675_v63 = vld [vmem:[#allocation15_spill] sm:$0xff] }
 0x40f   :  { %5336 = vmatprep.subr.bf16.mxu0 %v10666_v28  ;;  %5400 = vmatprep.subr.bf16.mxu1 %v10667_v46 }
 0x412   :  { %5338 = vmatpush1.bf16.msra.mxu0 %v10668_v25  ;;  %5402 = vmatpush1.bf16.msra.mxu1 %v10669_v54  ;;  %v10677_v54 = vld [vmem:[#allocation27_spill] sm:$0xff] }
 0x413   :  { %5340 = vmatprep.subr.bf16.mxu0 %v10670_v9  ;;  %5404 = vmatprep.subr.bf16.mxu1 %v10671_v59  ;;  %v10678_v5 = vcombine.low %v10676_v39, %v10677_v54  ;;  %v10680_v59 = vld [vmem:[#allocation28_spill] sm:$0xff] }
 0x414   :  { %v10681_v18 = vcombine.low %v10679_v22, %v10680_v59  ;;  %v10687_v54 = vld [vmem:[#allocation60_spill] sm:$0xff]  ;;  %v10689_v59 = vld [vmem:[#allocation62_spill] sm:$0xff] }
 0x416   :  { %5342 = vmatpush1.bf16.msra.mxu0 %v10672_v24  ;;  %5406 = vmatpush1.bf16.msra.mxu1 %v10673_v41 }
 0x417   :  { %5408 = vmatprep.subr.bf16.mxu0 %v10674_v36  ;;  %5472 = vmatprep.subr.bf16.mxu1 %v10675_v63 }
 0x4ac   :  { %v2604_v3 = vpop.f32.mrb[12].mxu0  ;;  %v2675_v28 = vpop.f32.mrb[12].mxu1 }
 0x4ad   :  { %v2606_v32 = vpop.f32.mrb[13].mxu0  ;;  %v2677_v46 = vpop.f32.mrb[13].mxu1 }
 0x4ae   :  { %v2684_v40 = vcombine.low %v2604_v3, %v2606_v32  ;;  %v2685_v25 = vcombine.low %v2675_v28, %v2677_v46 }
 0x4b0   :  { %v2688_v9 = vadd.f32 %v2684_v40, %v10678_v5  ;;  %v2689_v24 = vadd.f32 %v2685_v25, %v10681_v18  ;;  %v10686_v25 = vld [vmem:[#allocation59_spill] sm:$0xff] }
 0x4b2   :  { %v4022_v56 = vmul.f32 -1.442695, %v2688_v9  ;;  %v4023_v41 = vmul.f32 -1.442695, %v2689_v24  ;;  %v2703_v36 = vrot.slane %v2689_v24, 4  ;;  %v10688_v9 = vld [vmem:[#allocation61_spill] sm:$0xff] }
 0x4b3   :  { %v10690_v24 = vld [vmem:[#allocation63_spill] sm:$0xff] }
 0x4b4   :  { %6071 = vpow2.f32 %v4022_v56 }
 0x4b5   :  { %6073 = vpow2.f32 %v4023_v41 }
 0x4b6   :  { %6075 = vtanh.f32 %v2703_v36  ;;  %v10684_v36 = vld [vmem:[#allocation57_spill] sm:$0xff] }
 0x4be   :  { %v6072_v61 = vpop.eup %6071 }
 0x4bf   :  { %v2696_v63 = vadd.f32 1.0, %v6072_v61  ;;  %v6074_v60 = vpop.eup %6073 }
 0x4c0   :  { %v6076_v32 = vpop.eup %6075  ;;  %v2697_v39 = vadd.f32 1.0, %v6074_v60  ;;  %v10683_v60 = vld [vmem:[#allocation56_spill] sm:$0xff] }
 0x4c1   :  { %6077 = vrcp.f32 %v2696_v63  ;;  %v10685_v63 = vld [vmem:[#allocation58_spill] sm:$0xff] }
 0x4c2   :  { %6079 = vrcp.f32 %v2697_v39  ;;  %v10695_v39 = vld [vmem:[#allocation68_spill] sm:$0xff] }
 0x4cb   :  { %v6078_v3 = vpop.eup %6077 }
 0x4cc   :  { %v2707_v28 = vrot.slane %v6078_v3, 4  ;;  %v2710_v46 = vmul.f32 %v6078_v3, %v6076_v32  ;;  %v6080_v56 = vpop.eup %6079  ;;  %v10691_v32 = vld [vmem:[#allocation64_spill] sm:$0xff]  ;;  %v10692_v3 = vld [vmem:[#allocation65_spill] sm:$0xff] }
 0x4ce   :  { %v2709_v5 = vmul.f32 %v2707_v28, %v9718_v16  ;;  %v10682_v16 = vld [vmem:[#allocation55_spill] sm:$0xff]  ;;  %v10693_v28 = vld [vmem:[#allocation66_spill] sm:$0xff] }
 0x4d0   :  { %v9794_v40 = vadd.f32 %v2710_v46, %v2709_v5  ;;  %v10694_v46 = vld [vmem:[#allocation67_spill] sm:$0xff]  ;;  %v10696_v5 = vld [vmem:[#allocation69_spill] sm:$0xff] }
 0x4d2   :  { %6081 = vtanh.f32 %v9794_v40 }
 0x4dc   :  { %v6082_v18 = vpop.eup %6081 }
 0x4dd   :  { %v2713_v22 = vmul.f32 %v6082_v18, %v6080_v56  ;;  %v10697_v56 = vld [vmem:[#allocation70_spill] sm:$0xff]  ;;  %v10698_v18 = vld [vmem:[#allocation71_spill] sm:$0xff] }
 0x4df   :  { %2715 = vst [vmem:[#allocation3 + $0x4] sm:$0x3] %v2713_v22  ;;  %2717 = vst [vmem:[#allocation4 + $0x2] sm:$0xc] %v2713_v22  ;;  %v2719_v61 = vmul.f32 %v2713_v22, %v9643_v31  ;;  %v2718_v41 = vmul.f32 %v2713_v22, %v9640_v30  ;;  %v10699_v22 = vld [vmem:[#allocation72_spill] sm:$0xff] }
 0x4e1   :  { %2786 = vmatprep.mubr.f32.mxu0 %v2719_v61  ;;  %2857 = vmatprep.mubr.f32.mxu1 %v2719_v61  ;;  %v10700_v61 = vld [vmem:[#allocation73_spill] sm:$0xff] }
 0x4e2   :  { %2787 = vmatmul.mubr.f32.vlgmr.msra.gmra.mrb[14].mxu0 %v2718_v41  ;;  %2858 = vmatmul.mubr.f32.vlgmr.msra.gmra.mrb[14].mxu1 %v2718_v41  ;;  %v10701_v41 = vld [vmem:[#allocation74_spill] sm:$0xff] }
 0x4e3   :  { %5410 = vmatpush1.bf16.msra.mxu0 %v8719_v35  ;;  %5474 = vmatpush1.bf16.msra.mxu1 %v8728_v38 }
 0x4e4   :  { %5412 = vmatprep.subr.bf16.mxu0 %v8740_v42  ;;  %5476 = vmatprep.subr.bf16.mxu1 %v8754_v47 }
 0x4e7   :  { %5414 = vmatpush1.bf16.msra.mxu0 %v8763_v50  ;;  %5478 = vmatpush1.bf16.msra.mxu1 %v8769_v52 }
 0x4e8   :  { %5416 = vmatprep.subr.bf16.mxu0 %v8771_v53  ;;  %5480 = vmatprep.subr.bf16.mxu1 %v8783_v57 }
 0x4eb   :  { %5418 = vmatpush1.bf16.msra.mxu0 %v8805_v0  ;;  %5482 = vmatpush1.bf16.msra.mxu1 %v8809_v1 }
 0x4ec   :  { %5420 = vmatprep.subr.bf16.mxu0 %v8811_v2  ;;  %5484 = vmatprep.subr.bf16.mxu1 %v8823_v6 }
 0x4ef   :  { %5422 = vmatpush1.bf16.msra.mxu0 %v8843_v13  ;;  %5486 = vmatpush1.bf16.msra.mxu1 %v8847_v14 }
 0x4f0   :  { %5424 = vmatprep.subr.bf16.mxu0 %v8849_v15  ;;  %5488 = vmatprep.subr.bf16.mxu1 %v8861_v20 }
 0x4f3   :  { %5426 = vmatpush1.bf16.msra.mxu0 %v10603_v29  ;;  %5490 = vmatpush1.bf16.msra.mxu1 %v10604_v10 }
 0x4f4   :  { %5428 = vmatprep.subr.bf16.mxu0 %v10605_v58  ;;  %5492 = vmatprep.subr.bf16.mxu1 %v10606_v48 }
 0x4f7   :  { %5430 = vmatpush1.bf16.msra.mxu0 %v10607_v37  ;;  %5494 = vmatpush1.bf16.msra.mxu1 %v10608_v11 }
 0x4f8   :  { %5432 = vmatprep.subr.bf16.mxu0 %v10609_v62  ;;  %5496 = vmatprep.subr.bf16.mxu1 %v10610_v49 }
 0x4fb   :  { %5434 = vmatpush1.bf16.msra.mxu0 %v10611_v45  ;;  %5498 = vmatpush1.bf16.msra.mxu1 %v10612_v17 }
 0x4fc   :  { %5436 = vmatprep.subr.bf16.mxu0 %v10613_v23  ;;  %5500 = vmatprep.subr.bf16.mxu1 %v10614_v7 }
 0x4ff   :  { %5438 = vmatpush1.bf16.msra.mxu0 %v10615_v21  ;;  %5502 = vmatpush1.bf16.msra.mxu1 %v10616_v51 }
 0x500   :  { %5440 = vmatprep.subr.bf16.mxu0 %v10617_v19  ;;  %5504 = vmatprep.subr.bf16.mxu1 %v10618_v26 }
 0x503   :  { %5442 = vmatpush1.bf16.msra.mxu0 %v10619_v44  ;;  %5506 = vmatpush1.bf16.msra.mxu1 %v10620_v8 }
 0x504   :  { %5444 = vmatprep.subr.bf16.mxu0 %v10621_v12  ;;  %5508 = vmatprep.subr.bf16.mxu1 %v10622_v27 }
 0x507   :  { %5446 = vmatpush1.bf16.msra.mxu0 %v10623_v33  ;;  %5510 = vmatpush1.bf16.msra.mxu1 %v10624_v55 }
 0x508   :  { %5448 = vmatprep.subr.bf16.mxu0 %v10625_v34  ;;  %5512 = vmatprep.subr.bf16.mxu1 %v10626_v4 }
 0x50b   :  { %5450 = vmatpush1.bf16.msra.mxu0 %v10627_v43  ;;  %5514 = vmatpush1.bf16.msra.mxu1 %v10682_v16 }
 0x50c   :  { %5452 = vmatprep.subr.bf16.mxu0 %v10683_v60  ;;  %5516 = vmatprep.subr.bf16.mxu1 %v10684_v36 }
 0x50f   :  { %5454 = vmatpush1.bf16.msra.mxu0 %v10685_v63  ;;  %5518 = vmatpush1.bf16.msra.mxu1 %v10686_v25  ;;  %v10708_v25 = vld [vmem:[#allocation26_spill] sm:$0xff] }
 0x510   :  { %5456 = vmatprep.subr.bf16.mxu0 %v10687_v54  ;;  %5520 = vmatprep.subr.bf16.mxu1 %v10688_v9  ;;  %v10705_v9 = vld [vmem:[#allocation37_spill] sm:$0xff] }
 0x513   :  { %5458 = vmatpush1.bf16.msra.mxu0 %v10689_v59  ;;  %5522 = vmatpush1.bf16.msra.mxu1 %v10690_v24 }
 0x514   :  { %5460 = vmatprep.subr.bf16.mxu0 %v10691_v32  ;;  %5524 = vmatprep.subr.bf16.mxu1 %v10692_v3  ;;  %v10702_v32 = vld [vmem:[#allocation75_spill] sm:$0xff]  ;;  %v10703_v3 = vld [vmem:[#allocation14_spill] sm:$0xff] }
 0x517   :  { %5462 = vmatpush1.bf16.msra.mxu0 %v10693_v28  ;;  %5526 = vmatpush1.bf16.msra.mxu1 %v10694_v46  ;;  %v10704_v28 = vld [vmem:[#allocation15_spill] sm:$0xff] }
 0x518   :  { %5464 = vmatprep.subr.bf16.mxu0 %v10695_v39  ;;  %5528 = vmatprep.subr.bf16.mxu1 %v10696_v5 }
 0x51b   :  { %5466 = vmatpush1.bf16.msra.mxu0 %v10697_v56  ;;  %5530 = vmatpush1.bf16.msra.mxu1 %v10698_v18  ;;  %v10706_v18 = vld [vmem:[#allocation29_spill] sm:$0xff] }
 0x51c   :  { %5468 = vmatprep.subr.bf16.mxu0 %v10699_v22  ;;  %5532 = vmatprep.subr.bf16.mxu1 %v10700_v61  ;;  %v10707_v54 = vcombine.low %v10705_v9, %v10706_v18  ;;  %v10709_v61 = vld [vmem:[#allocation38_spill] sm:$0xff]  ;;  %v10716_v18 = vld [vmem:[#allocation60_spill] sm:$0xff] }
 0x51d   :  { %v10710_v63 = vcombine.low %v10708_v25, %v10709_v61  ;;  %v10718_v61 = vld [vmem:[#allocation62_spill] sm:$0xff] }
 0x51f   :  { %5470 = vmatpush1.bf16.msra.mxu0 %v10701_v41  ;;  %5534 = vmatpush1.bf16.msra.mxu1 %v10702_v32 }
 0x520   :  { %5536 = vmatprep.subr.bf16.mxu0 %v10703_v3  ;;  %5600 = vmatprep.subr.bf16.mxu1 %v10704_v28 }
 0x5b5   :  { %v2788_v46 = vpop.f32.mrb[14].mxu0  ;;  %v2859_v39 = vpop.f32.mrb[14].mxu1 }
 0x5b6   :  { %v2790_v24 = vpop.f32.mrb[15].mxu0  ;;  %v2861_v5 = vpop.f32.mrb[15].mxu1 }
 0x5b7   :  { %v2868_v59 = vcombine.low %v2788_v46, %v2790_v24  ;;  %v2869_v56 = vcombine.low %v2859_v39, %v2861_v5 }
 0x5b9   :  { %v2872_v22 = vadd.f32 %v2868_v59, %v10707_v54  ;;  %v2873_v41 = vadd.f32 %v2869_v56, %v10710_v63  ;;  %v10715_v56 = vld [vmem:[#allocation59_spill] sm:$0xff] }
 0x5bb   :  { %v4024_v36 = vmul.f32 -1.442695, %v2872_v22  ;;  %v4025_v32 = vmul.f32 -1.442695, %v2873_v41  ;;  %v2887_v3 = vrot.slane %v2873_v41, 4  ;;  %v10717_v22 = vld [vmem:[#allocation61_spill] sm:$0xff] }
 0x5bc   :  { %v10719_v41 = vld [vmem:[#allocation63_spill] sm:$0xff] }
 0x5bd   :  { %6083 = vpow2.f32 %v4024_v36 }
 0x5be   :  { %6085 = vpow2.f32 %v4025_v32 }
 0x5bf   :  { %6087 = vtanh.f32 %v2887_v3  ;;  %v10713_v3 = vld [vmem:[#allocation57_spill] sm:$0xff] }
 0x5c7   :  { %v6084_v60 = vpop.eup %6083 }
 0x5c8   :  { %v2880_v28 = vadd.f32 1.0, %v6084_v60  ;;  %v6086_v16 = vpop.eup %6085 }
 0x5c9   :  { %v6088_v24 = vpop.eup %6087  ;;  %v2881_v9 = vadd.f32 1.0, %v6086_v16  ;;  %v10712_v16 = vld [vmem:[#allocation56_spill] sm:$0xff] }
 0x5ca   :  { %6089 = vrcp.f32 %v2880_v28  ;;  %v10714_v28 = vld [vmem:[#allocation58_spill] sm:$0xff] }
 0x5cb   :  { %6091 = vrcp.f32 %v2881_v9  ;;  %v10724_v9 = vld [vmem:[#allocation68_spill] sm:$0xff] }
 0x5d4   :  { %v6090_v46 = vpop.eup %6089 }
 0x5d5   :  { %v2891_v39 = vrot.slane %v6090_v46, 4  ;;  %v2894_v5 = vmul.f32 %v6090_v46, %v6088_v24  ;;  %v6092_v36 = vpop.eup %6091  ;;  %v10720_v24 = vld [vmem:[#allocation64_spill] sm:$0xff]  ;;  %v10721_v46 = vld [vmem:[#allocation65_spill] sm:$0xff] }
 0x5d7   :  { %v2893_v54 = vmul.f32 %v2891_v39, %v9794_v40  ;;  %v10711_v40 = vld [vmem:[#allocation55_spill] sm:$0xff]  ;;  %v10722_v39 = vld [vmem:[#allocation66_spill] sm:$0xff] }
 0x5d9   :  { %v9870_v59 = vadd.f32 %v2894_v5, %v2893_v54  ;;  %v10723_v5 = vld [vmem:[#allocation67_spill] sm:$0xff]  ;;  %v10725_v54 = vld [vmem:[#allocation69_spill] sm:$0xff] }
 0x5db   :  { %6093 = vtanh.f32 %v9870_v59 }
 0x5e5   :  { %v6094_v63 = vpop.eup %6093 }
 0x5e6   :  { %v2897_v25 = vmul.f32 %v6094_v63, %v6092_v36  ;;  %v10726_v36 = vld [vmem:[#allocation70_spill] sm:$0xff]  ;;  %v10727_v63 = vld [vmem:[#allocation71_spill] sm:$0xff] }
 0x5e8   :  { %2899 = vst [vmem:[#allocation3 + $0x6] sm:$0x3] %v2897_v25  ;;  %2901 = vst [vmem:[#allocation4 + $0x4] sm:$0xc] %v2897_v25  ;;  %v2903_v60 = vmul.f32 %v2897_v25, %v9643_v31  ;;  %v2902_v32 = vmul.f32 %v2897_v25, %v9640_v30  ;;  %v10728_v25 = vld [vmem:[#allocation72_spill] sm:$0xff] }
 0x5ea   :  { %2970 = vmatprep.mubr.f32.mxu0 %v2903_v60  ;;  %3041 = vmatprep.mubr.f32.mxu1 %v2903_v60  ;;  %v10729_v60 = vld [vmem:[#allocation73_spill] sm:$0xff] }
 0x5eb   :  { %2971 = vmatmul.mubr.f32.vlgmr.msra.gmra.mrb[16].mxu0 %v2902_v32  ;;  %3042 = vmatmul.mubr.f32.vlgmr.msra.gmra.mrb[16].mxu1 %v2902_v32  ;;  %v10730_v32 = vld [vmem:[#allocation74_spill] sm:$0xff] }
 0x5ec   :  { %5538 = vmatpush1.bf16.msra.mxu0 %v8719_v35  ;;  %5602 = vmatpush1.bf16.msra.mxu1 %v8728_v38 }
 0x5ed   :  { %5540 = vmatprep.subr.bf16.mxu0 %v8740_v42  ;;  %5604 = vmatprep.subr.bf16.mxu1 %v8754_v47 }
 0x5f0   :  { %5542 = vmatpush1.bf16.msra.mxu0 %v8763_v50  ;;  %5606 = vmatpush1.bf16.msra.mxu1 %v8769_v52 }
 0x5f1   :  { %5544 = vmatprep.subr.bf16.mxu0 %v8771_v53  ;;  %5608 = vmatprep.subr.bf16.mxu1 %v8783_v57 }
 0x5f4   :  { %5546 = vmatpush1.bf16.msra.mxu0 %v8805_v0  ;;  %5610 = vmatpush1.bf16.msra.mxu1 %v8809_v1 }
 0x5f5   :  { %5548 = vmatprep.subr.bf16.mxu0 %v8811_v2  ;;  %5612 = vmatprep.subr.bf16.mxu1 %v8823_v6 }
 0x5f8   :  { %5550 = vmatpush1.bf16.msra.mxu0 %v8843_v13  ;;  %5614 = vmatpush1.bf16.msra.mxu1 %v8847_v14 }
 0x5f9   :  { %5552 = vmatprep.subr.bf16.mxu0 %v8849_v15  ;;  %5616 = vmatprep.subr.bf16.mxu1 %v8861_v20 }
 0x5fc   :  { %5554 = vmatpush1.bf16.msra.mxu0 %v10603_v29  ;;  %5618 = vmatpush1.bf16.msra.mxu1 %v10604_v10 }
 0x5fd   :  { %5556 = vmatprep.subr.bf16.mxu0 %v10605_v58  ;;  %5620 = vmatprep.subr.bf16.mxu1 %v10606_v48 }
 0x600   :  { %5558 = vmatpush1.bf16.msra.mxu0 %v10607_v37  ;;  %5622 = vmatpush1.bf16.msra.mxu1 %v10608_v11 }
 0x601   :  { %5560 = vmatprep.subr.bf16.mxu0 %v10609_v62  ;;  %5624 = vmatprep.subr.bf16.mxu1 %v10610_v49 }
 0x604   :  { %5562 = vmatpush1.bf16.msra.mxu0 %v10611_v45  ;;  %5626 = vmatpush1.bf16.msra.mxu1 %v10612_v17 }
 0x605   :  { %5564 = vmatprep.subr.bf16.mxu0 %v10613_v23  ;;  %5628 = vmatprep.subr.bf16.mxu1 %v10614_v7 }
 0x608   :  { %5566 = vmatpush1.bf16.msra.mxu0 %v10615_v21  ;;  %5630 = vmatpush1.bf16.msra.mxu1 %v10616_v51 }
 0x609   :  { %5568 = vmatprep.subr.bf16.mxu0 %v10617_v19  ;;  %5632 = vmatprep.subr.bf16.mxu1 %v10618_v26 }
 0x60c   :  { %5570 = vmatpush1.bf16.msra.mxu0 %v10619_v44  ;;  %5634 = vmatpush1.bf16.msra.mxu1 %v10620_v8 }
 0x60d   :  { %5572 = vmatprep.subr.bf16.mxu0 %v10621_v12  ;;  %5636 = vmatprep.subr.bf16.mxu1 %v10622_v27 }
 0x610   :  { %5574 = vmatpush1.bf16.msra.mxu0 %v10623_v33  ;;  %5638 = vmatpush1.bf16.msra.mxu1 %v10624_v55 }
 0x611   :  { %5576 = vmatprep.subr.bf16.mxu0 %v10625_v34  ;;  %5640 = vmatprep.subr.bf16.mxu1 %v10626_v4 }
 0x614   :  { %5578 = vmatpush1.bf16.msra.mxu0 %v10627_v43  ;;  %5642 = vmatpush1.bf16.msra.mxu1 %v10711_v40 }
 0x615   :  { %5580 = vmatprep.subr.bf16.mxu0 %v10712_v16  ;;  %5644 = vmatprep.subr.bf16.mxu1 %v10713_v3 }
 0x618   :  { %5582 = vmatpush1.bf16.msra.mxu0 %v10714_v28  ;;  %5646 = vmatpush1.bf16.msra.mxu1 %v10715_v56  ;;  %v10737_v56 = vld [vmem:[#allocation24_spill] sm:$0xff] }
 0x619   :  { %5584 = vmatprep.subr.bf16.mxu0 %v10716_v18  ;;  %5648 = vmatprep.subr.bf16.mxu1 %v10717_v22  ;;  %v10734_v22 = vld [vmem:[#allocation18_spill] sm:$0xff] }
 0x61c   :  { %5586 = vmatpush1.bf16.msra.mxu0 %v10718_v61  ;;  %5650 = vmatpush1.bf16.msra.mxu1 %v10719_v41 }
 0x61d   :  { %5588 = vmatprep.subr.bf16.mxu0 %v10720_v24  ;;  %5652 = vmatprep.subr.bf16.mxu1 %v10721_v46  ;;  %v10731_v24 = vld [vmem:[#allocation75_spill] sm:$0xff]  ;;  %v10732_v46 = vld [vmem:[#allocation14_spill] sm:$0xff] }
 0x620   :  { %5590 = vmatpush1.bf16.msra.mxu0 %v10722_v39  ;;  %5654 = vmatpush1.bf16.msra.mxu1 %v10723_v5  ;;  %v10733_v39 = vld [vmem:[#allocation15_spill] sm:$0xff] }
 0x621   :  { %5592 = vmatprep.subr.bf16.mxu0 %v10724_v9  ;;  %5656 = vmatprep.subr.bf16.mxu1 %v10725_v54 }
 0x624   :  { %5594 = vmatpush1.bf16.msra.mxu0 %v10726_v36  ;;  %5658 = vmatpush1.bf16.msra.mxu1 %v10727_v63  ;;  %v10735_v63 = vld [vmem:[#allocation33_spill] sm:$0xff] }
 0x625   :  { %5596 = vmatprep.subr.bf16.mxu0 %v10728_v25  ;;  %5660 = vmatprep.subr.bf16.mxu1 %v10729_v60  ;;  %v10736_v18 = vcombine.low %v10734_v22, %v10735_v63  ;;  %v10738_v60 = vld [vmem:[#allocation39_spill] sm:$0xff]  ;;  %v10745_v63 = vld [vmem:[#allocation60_spill] sm:$0xff] }
 0x626   :  { %v10739_v28 = vcombine.low %v10737_v56, %v10738_v60  ;;  %v10747_v60 = vld [vmem:[#allocation62_spill] sm:$0xff] }
 0x628   :  { %5598 = vmatpush1.bf16.msra.mxu0 %v10730_v32  ;;  %5662 = vmatpush1.bf16.msra.mxu1 %v10731_v24 }
 0x629   :  { %5664 = vmatprep.subr.bf16.mxu0 %v10732_v46  ;;  %5728 = vmatprep.subr.bf16.mxu1 %v10733_v39 }
 0x6be   :  { %v2972_v5 = vpop.f32.mrb[16].mxu0  ;;  %v3043_v9 = vpop.f32.mrb[16].mxu1 }
 0x6bf   :  { %v2974_v41 = vpop.f32.mrb[17].mxu0  ;;  %v3045_v54 = vpop.f32.mrb[17].mxu1 }
 0x6c0   :  { %v3052_v61 = vcombine.low %v2972_v5, %v2974_v41  ;;  %v3053_v36 = vcombine.low %v3043_v9, %v3045_v54 }
 0x6c2   :  { %v3056_v25 = vadd.f32 %v3052_v61, %v10736_v18  ;;  %v3057_v32 = vadd.f32 %v3053_v36, %v10739_v28  ;;  %v10744_v36 = vld [vmem:[#allocation59_spill] sm:$0xff] }
 0x6c4   :  { %v4026_v3 = vmul.f32 -1.442695, %v3056_v25  ;;  %v4027_v24 = vmul.f32 -1.442695, %v3057_v32  ;;  %v3071_v46 = vrot.slane %v3057_v32, 4  ;;  %v10746_v25 = vld [vmem:[#allocation61_spill] sm:$0xff] }
 0x6c5   :  { %v10748_v32 = vld [vmem:[#allocation63_spill] sm:$0xff] }
 0x6c6   :  { %6095 = vpow2.f32 %v4026_v3 }
 0x6c7   :  { %6097 = vpow2.f32 %v4027_v24 }
 0x6c8   :  { %6099 = vtanh.f32 %v3071_v46  ;;  %v10742_v46 = vld [vmem:[#allocation57_spill] sm:$0xff] }
 0x6d0   :  { %v6096_v16 = vpop.eup %6095 }
 0x6d1   :  { %v3064_v39 = vadd.f32 1.0, %v6096_v16  ;;  %v6098_v40 = vpop.eup %6097 }
 0x6d2   :  { %v6100_v41 = vpop.eup %6099  ;;  %v3065_v22 = vadd.f32 1.0, %v6098_v40  ;;  %v10741_v40 = vld [vmem:[#allocation56_spill] sm:$0xff] }
 0x6d3   :  { %6101 = vrcp.f32 %v3064_v39  ;;  %v10743_v39 = vld [vmem:[#allocation58_spill] sm:$0xff] }
 0x6d4   :  { %6103 = vrcp.f32 %v3065_v22  ;;  %v10753_v22 = vld [vmem:[#allocation68_spill] sm:$0xff] }
 0x6dd   :  { %v6102_v5 = vpop.eup %6101 }
 0x6de   :  { %v3075_v9 = vrot.slane %v6102_v5, 4  ;;  %v3078_v54 = vmul.f32 %v6102_v5, %v6100_v41  ;;  %v6104_v3 = vpop.eup %6103  ;;  %v10749_v41 = vld [vmem:[#allocation64_spill] sm:$0xff]  ;;  %v10750_v5 = vld [vmem:[#allocation65_spill] sm:$0xff] }
 0x6e0   :  { %v3077_v18 = vmul.f32 %v3075_v9, %v9870_v59  ;;  %v10740_v59 = vld [vmem:[#allocation55_spill] sm:$0xff]  ;;  %v10751_v9 = vld [vmem:[#allocation66_spill] sm:$0xff] }
 0x6e2   :  { %v9946_v61 = vadd.f32 %v3078_v54, %v3077_v18  ;;  %v10752_v54 = vld [vmem:[#allocation67_spill] sm:$0xff]  ;;  %v10754_v18 = vld [vmem:[#allocation69_spill] sm:$0xff] }
 0x6e4   :  { %6105 = vtanh.f32 %v9946_v61 }
 0x6ee   :  { %v6106_v28 = vpop.eup %6105 }
 0x6ef   :  { %v3081_v56 = vmul.f32 %v6106_v28, %v6104_v3  ;;  %v10755_v3 = vld [vmem:[#allocation70_spill] sm:$0xff]  ;;  %v10756_v28 = vld [vmem:[#allocation71_spill] sm:$0xff] }
 0x6f1   :  { %3083 = vst [vmem:[#allocation3 + $0x8] sm:$0x3] %v3081_v56  ;;  %3085 = vst [vmem:[#allocation4 + $0x6] sm:$0xc] %v3081_v56  ;;  %v3087_v16 = vmul.f32 %v3081_v56, %v9643_v31  ;;  %v3086_v24 = vmul.f32 %v3081_v56, %v9640_v30  ;;  %v10757_v56 = vld [vmem:[#allocation72_spill] sm:$0xff] }
 0x6f3   :  { %3154 = vmatprep.mubr.f32.mxu0 %v3087_v16  ;;  %3225 = vmatprep.mubr.f32.mxu1 %v3087_v16  ;;  %v10758_v16 = vld [vmem:[#allocation73_spill] sm:$0xff] }
 0x6f4   :  { %3155 = vmatmul.mubr.f32.vlgmr.msra.gmra.mrb[18].mxu0 %v3086_v24  ;;  %3226 = vmatmul.mubr.f32.vlgmr.msra.gmra.mrb[18].mxu1 %v3086_v24  ;;  %v10759_v24 = vld [vmem:[#allocation74_spill] sm:$0xff] }
 0x6f5   :  { %5666 = vmatpush1.bf16.msra.mxu0 %v8719_v35  ;;  %5730 = vmatpush1.bf16.msra.mxu1 %v8728_v38 }
 0x6f6   :  { %5668 = vmatprep.subr.bf16.mxu0 %v8740_v42  ;;  %5732 = vmatprep.subr.bf16.mxu1 %v8754_v47 }
 0x6f9   :  { %5670 = vmatpush1.bf16.msra.mxu0 %v8763_v50  ;;  %5734 = vmatpush1.bf16.msra.mxu1 %v8769_v52 }
 0x6fa   :  { %5672 = vmatprep.subr.bf16.mxu0 %v8771_v53  ;;  %5736 = vmatprep.subr.bf16.mxu1 %v8783_v57 }
 0x6fd   :  { %5674 = vmatpush1.bf16.msra.mxu0 %v8805_v0  ;;  %5738 = vmatpush1.bf16.msra.mxu1 %v8809_v1 }
 0x6fe   :  { %5676 = vmatprep.subr.bf16.mxu0 %v8811_v2  ;;  %5740 = vmatprep.subr.bf16.mxu1 %v8823_v6 }
 0x701   :  { %5678 = vmatpush1.bf16.msra.mxu0 %v8843_v13  ;;  %5742 = vmatpush1.bf16.msra.mxu1 %v8847_v14 }
 0x702   :  { %5680 = vmatprep.subr.bf16.mxu0 %v8849_v15  ;;  %5744 = vmatprep.subr.bf16.mxu1 %v8861_v20 }
 0x705   :  { %5682 = vmatpush1.bf16.msra.mxu0 %v10603_v29  ;;  %5746 = vmatpush1.bf16.msra.mxu1 %v10604_v10 }
 0x706   :  { %5684 = vmatprep.subr.bf16.mxu0 %v10605_v58  ;;  %5748 = vmatprep.subr.bf16.mxu1 %v10606_v48 }
 0x709   :  { %5686 = vmatpush1.bf16.msra.mxu0 %v10607_v37  ;;  %5750 = vmatpush1.bf16.msra.mxu1 %v10608_v11 }
 0x70a   :  { %5688 = vmatprep.subr.bf16.mxu0 %v10609_v62  ;;  %5752 = vmatprep.subr.bf16.mxu1 %v10610_v49 }
 0x70d   :  { %5690 = vmatpush1.bf16.msra.mxu0 %v10611_v45  ;;  %5754 = vmatpush1.bf16.msra.mxu1 %v10612_v17 }
 0x70e   :  { %5692 = vmatprep.subr.bf16.mxu0 %v10613_v23  ;;  %5756 = vmatprep.subr.bf16.mxu1 %v10614_v7 }
 0x711   :  { %5694 = vmatpush1.bf16.msra.mxu0 %v10615_v21  ;;  %5758 = vmatpush1.bf16.msra.mxu1 %v10616_v51 }
 0x712   :  { %5696 = vmatprep.subr.bf16.mxu0 %v10617_v19  ;;  %5760 = vmatprep.subr.bf16.mxu1 %v10618_v26 }
 0x715   :  { %5698 = vmatpush1.bf16.msra.mxu0 %v10619_v44  ;;  %5762 = vmatpush1.bf16.msra.mxu1 %v10620_v8 }
 0x716   :  { %5700 = vmatprep.subr.bf16.mxu0 %v10621_v12  ;;  %5764 = vmatprep.subr.bf16.mxu1 %v10622_v27 }
 0x719   :  { %5702 = vmatpush1.bf16.msra.mxu0 %v10623_v33  ;;  %5766 = vmatpush1.bf16.msra.mxu1 %v10624_v55 }
 0x71a   :  { %5704 = vmatprep.subr.bf16.mxu0 %v10625_v34  ;;  %5768 = vmatprep.subr.bf16.mxu1 %v10626_v4 }
 0x71d   :  { %5706 = vmatpush1.bf16.msra.mxu0 %v10627_v43  ;;  %5770 = vmatpush1.bf16.msra.mxu1 %v10740_v59 }
 0x71e   :  { %5708 = vmatprep.subr.bf16.mxu0 %v10741_v40  ;;  %5772 = vmatprep.subr.bf16.mxu1 %v10742_v46 }
 0x721   :  { %5710 = vmatpush1.bf16.msra.mxu0 %v10743_v39  ;;  %5774 = vmatpush1.bf16.msra.mxu1 %v10744_v36  ;;  %v10766_v36 = vld [vmem:[#allocation76_spill] sm:$0xff] }
 0x722   :  { %5712 = vmatprep.subr.bf16.mxu0 %v10745_v63  ;;  %5776 = vmatprep.subr.bf16.mxu1 %v10746_v25  ;;  %v10763_v25 = vld [vmem:[#allocation40_spill] sm:$0xff] }
 0x725   :  { %5714 = vmatpush1.bf16.msra.mxu0 %v10747_v60  ;;  %5778 = vmatpush1.bf16.msra.mxu1 %v10748_v32 }
 0x726   :  { %5716 = vmatprep.subr.bf16.mxu0 %v10749_v41  ;;  %5780 = vmatprep.subr.bf16.mxu1 %v10750_v5  ;;  %v10760_v41 = vld [vmem:[#allocation75_spill] sm:$0xff]  ;;  %v10761_v5 = vld [vmem:[#allocation14_spill] sm:$0xff] }
 0x729   :  { %5718 = vmatpush1.bf16.msra.mxu0 %v10751_v9  ;;  %5782 = vmatpush1.bf16.msra.mxu1 %v10752_v54  ;;  %v10762_v9 = vld [vmem:[#allocation15_spill] sm:$0xff] }
 0x72a   :  { %5720 = vmatprep.subr.bf16.mxu0 %v10753_v22  ;;  %5784 = vmatprep.subr.bf16.mxu1 %v10754_v18 }
 0x72d   :  { %5722 = vmatpush1.bf16.msra.mxu0 %v10755_v3  ;;  %5786 = vmatpush1.bf16.msra.mxu1 %v10756_v28  ;;  %v10764_v28 = vld [vmem:[#allocation42_spill] sm:$0xff] }
 0x72e   :  { %5724 = vmatprep.subr.bf16.mxu0 %v10757_v56  ;;  %5788 = vmatprep.subr.bf16.mxu1 %v10758_v16  ;;  %v10765_v63 = vcombine.low %v10763_v25, %v10764_v28  ;;  %v10767_v16 = vld [vmem:[#allocation77_spill] sm:$0xff] }
 0x72f   :  { %v10768_v39 = vcombine.low %v10766_v36, %v10767_v16 }
 0x731   :  { %5726 = vmatpush1.bf16.msra.mxu0 %v10759_v24  ;;  %5790 = vmatpush1.bf16.msra.mxu1 %v10760_v41 }
 0x732   :  { %5792 = vmatprep.subr.bf16.mxu0 %v10761_v5  ;;  %5856 = vmatprep.subr.bf16.mxu1 %v10762_v9 }
 0x7c7   :  { %v3156_v54 = vpop.f32.mrb[18].mxu0  ;;  %v3227_v22 = vpop.f32.mrb[18].mxu1 }
 0x7c8   :  { %v3158_v32 = vpop.f32.mrb[19].mxu0  ;;  %v3229_v18 = vpop.f32.mrb[19].mxu1 }
 0x7c9   :  { %v3236_v60 = vcombine.low %v3156_v54, %v3158_v32  ;;  %v3237_v3 = vcombine.low %v3227_v22, %v3229_v18 }
 0x7cb   :  { %v3240_v56 = vadd.f32 %v3236_v60, %v10765_v63  ;;  %v3241_v24 = vadd.f32 %v3237_v3, %v10768_v39 }
 0x7cd   :  { %v4028_v46 = vmul.f32 -1.442695, %v3240_v56  ;;  %v4029_v41 = vmul.f32 -1.442695, %v3241_v24  ;;  %v3255_v5 = vrot.slane %v3241_v24, 4 }
 0x7cf   :  { %6107 = vpow2.f32 %v4028_v46 }
 0x7d0   :  { %6109 = vpow2.f32 %v4029_v41 }
 0x7d1   :  { %6111 = vtanh.f32 %v3255_v5 }
 0x7d9   :  { %v6108_v40 = vpop.eup %6107 }
 0x7da   :  { %v3248_v9 = vadd.f32 1.0, %v6108_v40  ;;  %v6110_v59 = vpop.eup %6109 }
 0x7db   :  { %v6112_v32 = vpop.eup %6111  ;;  %v3249_v25 = vadd.f32 1.0, %v6110_v59 }
 0x7dc   :  { %6113 = vrcp.f32 %v3248_v9 }
 0x7dd   :  { %6115 = vrcp.f32 %v3249_v25 }
 0x7e6   :  { %v6114_v54 = vpop.eup %6113 }
 0x7e7   :  { %v3259_v22 = vrot.slane %v6114_v54, 4  ;;  %v3262_v18 = vmul.f32 %v6114_v54, %v6112_v32  ;;  %v6116_v46 = vpop.eup %6115 }
 0x7e9   :  { %v3261_v63 = vmul.f32 %v3259_v22, %v9946_v61 }
 0x7eb   :  { %v10022_v60 = vadd.f32 %v3262_v18, %v3261_v63 }
 0x7ed   :  { %6117 = vtanh.f32 %v10022_v60 }
 0x7f7   :  { %v6118_v39 = vpop.eup %6117 }
 0x7f8   :  { %v3265_v36 = vmul.f32 %v6118_v39, %v6116_v46 }
 0x7fa   :  { %3267 = vst [vmem:[#allocation3 + $0xa] sm:$0x3] %v3265_v36  ;;  %3269 = vst [vmem:[#allocation4 + $0x8] sm:$0xc] %v3265_v36  ;;  %v3271_v40 = vmul.f32 %v3265_v36, %v9643_v31  ;;  %v3270_v41 = vmul.f32 %v3265_v36, %v9640_v30  ;;  %v3930_v36 = vld [vmem:[%s10328_s10] sm:$0x3] }
 0x7fc   :  { %3338 = vmatprep.mubr.f32.mxu0 %v3271_v40  ;;  %3409 = vmatprep.mubr.f32.mxu1 %v3271_v40 }
 0x7fd   :  { %3339 = vmatmul.mubr.f32.vlgmr.msra.gmra.mrb[20].mxu0 %v3270_v41  ;;  %3410 = vmatmul.mubr.f32.vlgmr.msra.gmra.mrb[20].mxu1 %v3270_v41 }
 0x7fe   :  { %5794 = vmatpush1.bf16.msra.mxu0 %v8719_v35  ;;  %5858 = vmatpush1.bf16.msra.mxu1 %v8728_v38  ;;  %v10769_v35 = vld [vmem:[#allocation55_spill] sm:$0xff]  ;;  %v10770_v38 = vld [vmem:[#allocation56_spill] sm:$0xff] }
 0x7ff   :  { %5796 = vmatprep.subr.bf16.mxu0 %v8740_v42  ;;  %5860 = vmatprep.subr.bf16.mxu1 %v8754_v47  ;;  %v10771_v42 = vld [vmem:[#allocation57_spill] sm:$0xff]  ;;  %v10772_v47 = vld [vmem:[#allocation58_spill] sm:$0xff] }
 0x802   :  { %5798 = vmatpush1.bf16.msra.mxu0 %v8763_v50  ;;  %5862 = vmatpush1.bf16.msra.mxu1 %v8769_v52  ;;  %v10773_v50 = vld [vmem:[#allocation59_spill] sm:$0xff]  ;;  %v10774_v52 = vld [vmem:[#allocation60_spill] sm:$0xff] }
 0x803   :  { %5800 = vmatprep.subr.bf16.mxu0 %v8771_v53  ;;  %5864 = vmatprep.subr.bf16.mxu1 %v8783_v57  ;;  %v10775_v53 = vld [vmem:[#allocation61_spill] sm:$0xff]  ;;  %v10776_v57 = vld [vmem:[#allocation62_spill] sm:$0xff] }
 0x806   :  { %5802 = vmatpush1.bf16.msra.mxu0 %v8805_v0  ;;  %5866 = vmatpush1.bf16.msra.mxu1 %v8809_v1  ;;  %v10777_v0 = vld [vmem:[#allocation63_spill] sm:$0xff]  ;;  %v10778_v1 = vld [vmem:[#allocation64_spill] sm:$0xff] }
 0x807   :  { %5804 = vmatprep.subr.bf16.mxu0 %v8811_v2  ;;  %5868 = vmatprep.subr.bf16.mxu1 %v8823_v6  ;;  %v10779_v2 = vld [vmem:[#allocation65_spill] sm:$0xff]  ;;  %v10780_v6 = vld [vmem:[#allocation66_spill] sm:$0xff] }
 0x80a   :  { %5806 = vmatpush1.bf16.msra.mxu0 %v8843_v13  ;;  %5870 = vmatpush1.bf16.msra.mxu1 %v8847_v14  ;;  %v10781_v13 = vld [vmem:[#allocation67_spill] sm:$0xff]  ;;  %v10782_v14 = vld [vmem:[#allocation68_spill] sm:$0xff] }
 0x80b   :  { %5808 = vmatprep.subr.bf16.mxu0 %v8849_v15  ;;  %5872 = vmatprep.subr.bf16.mxu1 %v8861_v20  ;;  %v10783_v15 = vld [vmem:[#allocation69_spill] sm:$0xff]  ;;  %v10784_v20 = vld [vmem:[#allocation70_spill] sm:$0xff] }
 0x80e   :  { %5810 = vmatpush1.bf16.msra.mxu0 %v10603_v29  ;;  %5874 = vmatpush1.bf16.msra.mxu1 %v10604_v10  ;;  %v3921_v29 = vld [vmem:[%s10327_s9] sm:$0x3] }
 0x80f   :  { %5812 = vmatprep.subr.bf16.mxu0 %v10605_v58  ;;  %5876 = vmatprep.subr.bf16.mxu1 %v10606_v48  ;;  %v3922_v10 = vld [vmem:[%s10326_s8] sm:$0x3] }
 0x810   :  { %v3923_v58 = vmul.f32 %v3922_v10, %v3921_v29  ;;  %v3728_v29 = vld [vmem:[%s10322_s4 + $0xc0] sm:$0xff]  ;;  %v3729_v10 = vld [vmem:[%s10322_s4 + $0xc8] sm:$0xff] }
 0x812   :  { %5814 = vmatpush1.bf16.msra.mxu0 %v10607_v37  ;;  %5878 = vmatpush1.bf16.msra.mxu1 %v10608_v11  ;;  %v3925_v48 = vsel %vm3924_vm5, %v3923_v58, 0.0 }
 0x813   :  { %5816 = vmatprep.subr.bf16.mxu0 %v10609_v62  ;;  %5880 = vmatprep.subr.bf16.mxu1 %v10610_v49 }
 0x814   :  { %3926 = vadd.xlane.f32.xlu0 %v3925_v48  ;;  %v5935_v48 = vpack.c.bf16 %v3729_v10, %v3728_v29 }
 0x816   :  { %5818 = vmatpush1.bf16.msra.mxu0 %v10611_v45  ;;  %5882 = vmatpush1.bf16.msra.mxu1 %v10612_v17 }
 0x817   :  { %5820 = vmatprep.subr.bf16.mxu0 %v10613_v23  ;;  %5884 = vmatprep.subr.bf16.mxu1 %v10614_v7  ;;  %v10790_v23 = vld [vmem:[#allocation78_spill] sm:$0xff]  ;;  %v10791_v7 = vld [vmem:[#allocation79_spill] sm:$0xff] }
 0x81a   :  { %5822 = vmatpush1.bf16.msra.mxu0 %v10615_v21  ;;  %5886 = vmatpush1.bf16.msra.mxu1 %v10616_v51  ;;  %v10792_v21 = vcombine.low %v10790_v23, %v10791_v7  ;;  %v3714_v23 = vld [vmem:[%s10322_s4 + $0x50] sm:$0xff]  ;;  %v3715_v7 = vld [vmem:[%s10322_s4 + $0x58] sm:$0xff] }
 0x81b   :  { %5824 = vmatprep.subr.bf16.mxu0 %v10617_v19  ;;  %5888 = vmatprep.subr.bf16.mxu1 %v10618_v26  ;;  %v10793_v19 = vld [vmem:[#allocation80_spill] sm:$0xff]  ;;  %v10794_v26 = vld [vmem:[#allocation81_spill] sm:$0xff] }
 0x81e   :  { %5826 = vmatpush1.bf16.msra.mxu0 %v10619_v44  ;;  %5890 = vmatpush1.bf16.msra.mxu1 %v10620_v8  ;;  %v10795_v44 = vcombine.low %v10793_v19, %v10794_v26  ;;  %v5941_v19 = vpack.c.bf16 %v3715_v7, %v3714_v23  ;;  %v3640_v23 = vld [vmem:[#allocation3 + $0x2] sm:$0x3]  ;;  %v3651_v7 = vld [vmem:[#allocation4 + $0x2] sm:$0x3] }
 0x81f   :  { %5828 = vmatprep.subr.bf16.mxu0 %v10621_v12  ;;  %5892 = vmatprep.subr.bf16.mxu1 %v10622_v27 }
 0x822   :  { %5830 = vmatpush1.bf16.msra.mxu0 %v10623_v33  ;;  %5894 = vmatpush1.bf16.msra.mxu1 %v10624_v55  ;;  %v10785_v33 = vld [vmem:[#allocation71_spill] sm:$0xff] }
 0x823   :  { %5832 = vmatprep.subr.bf16.mxu0 %v10625_v34  ;;  %5896 = vmatprep.subr.bf16.mxu1 %v10626_v4  ;;  %v10787_v4 = vld [vmem:[#allocation73_spill] sm:$0xff]  ;;  %v10788_v34 = vld [vmem:[#allocation74_spill] sm:$0xff]  ;;  %v10789_v55 = vld [vmem:[#allocation75_spill] sm:$0xff] }
 0x826   :  { %5834 = vmatpush1.bf16.msra.mxu0 %v10627_v43  ;;  %5898 = vmatpush1.bf16.msra.mxu1 %v10769_v35  ;;  %v10786_v43 = vld [vmem:[#allocation72_spill] sm:$0xff] }
 0x827   :  { %5836 = vmatprep.subr.bf16.mxu0 %v10770_v38  ;;  %5900 = vmatprep.subr.bf16.mxu1 %v10771_v42  ;;  %v3704_v38 = vld [vmem:[%s10322_s4] sm:$0xff]  ;;  %v3705_v42 = vld [vmem:[%s10322_s4 + $0x8] sm:$0xff] }
 0x82a   :  { %5838 = vmatpush1.bf16.msra.mxu0 %v10772_v47  ;;  %5902 = vmatpush1.bf16.msra.mxu1 %v10773_v50  ;;  %v5921_v47 = vpack.c.bf16 %v3705_v42, %v3704_v38  ;;  %v3722_v50 = vld [vmem:[%s10322_s4 + $0x90] sm:$0xff]  ;;  %v3823_v38 = vld [vmem:[%s10324_s6 + $0x18] sm:$0xff] }
 0x82b   :  { %5840 = vmatprep.subr.bf16.mxu0 %v10774_v52  ;;  %5904 = vmatprep.subr.bf16.mxu1 %v10775_v53  ;;  %v3723_v52 = vld [vmem:[%s10322_s4 + $0x98] sm:$0xff] }
 0x82c   :  { %v5923_v53 = vpack.c.bf16 %v3723_v52, %v3722_v50  ;;  %v3824_v50 = vld [vmem:[%s10324_s6 + $0x20] sm:$0xff]  ;;  %v3825_v52 = vld [vmem:[%s10324_s6 + $0x28] sm:$0xff] }
 0x82e   :  { %5842 = vmatpush1.bf16.msra.mxu0 %v10776_v57  ;;  %5906 = vmatpush1.bf16.msra.mxu1 %v10777_v0  ;;  %v3706_v57 = vld [vmem:[%s10322_s4 + $0x10] sm:$0xff]  ;;  %v3707_v0 = vld [vmem:[%s10322_s4 + $0x18] sm:$0xff] }
 0x82f   :  { %5844 = vmatprep.subr.bf16.mxu0 %v10778_v1  ;;  %5908 = vmatprep.subr.bf16.mxu1 %v10779_v2  ;;  %v5925_v1 = vpack.c.bf16 %v3707_v0, %v3706_v57  ;;  %v3724_v2 = vld [vmem:[%s10322_s4 + $0xa0] sm:$0xff]  ;;  %v3826_v57 = vld [vmem:[%s10324_s6 + $0x30] sm:$0xff]  ;;  %v3827_v0 = vld [vmem:[%s10324_s6 + $0x38] sm:$0xff] }
 0x832   :  { %5846 = vmatpush1.bf16.msra.mxu0 %v10780_v6  ;;  %5910 = vmatpush1.bf16.msra.mxu1 %v10781_v13  ;;  %v3725_v6 = vld [vmem:[%s10322_s4 + $0xa8] sm:$0xff]  ;;  %v3708_v13 = vld [vmem:[%s10322_s4 + $0x20] sm:$0xff] }
 0x833   :  { %5848 = vmatprep.subr.bf16.mxu0 %v10782_v14  ;;  %5912 = vmatprep.subr.bf16.mxu1 %v10783_v15  ;;  %v5927_v14 = vpack.c.bf16 %v3725_v6, %v3724_v2  ;;  %v3709_v15 = vld [vmem:[%s10322_s4 + $0x28] sm:$0xff]  ;;  %v3828_v2 = vld [vmem:[%s10324_s6 + $0x40] sm:$0xff] }
 0x834   :  { %v3829_v6 = vld [vmem:[%s10324_s6 + $0x48] sm:$0xff] }
 0x836   :  { %5850 = vmatpush1.bf16.msra.mxu0 %v10784_v20  ;;  %5914 = vmatpush1.bf16.msra.mxu1 %v10785_v33  ;;  %v3726_v20 = vld [vmem:[%s10322_s4 + $0xb0] sm:$0xff]  ;;  %v3727_v33 = vld [vmem:[%s10322_s4 + $0xb8] sm:$0xff] }
 0x837   :  { %5852 = vmatprep.subr.bf16.mxu0 %v10786_v43  ;;  %5916 = vmatprep.subr.bf16.mxu1 %v10787_v4  ;;  %v5929_v43 = vpack.c.bf16 %v3709_v15, %v3708_v13  ;;  %v5931_v4 = vpack.c.bf16 %v3727_v33, %v3726_v20  ;;  %v5967_v15 = vpack.c.bf16 %v3829_v6, %v3828_v2 }
 0x83a   :  { %5854 = vmatpush1.bf16.msra.mxu0 %v10788_v34  ;;  %5918 = vmatpush1.bf16.msra.mxu1 %v10789_v55  ;;  %v3710_v34 = vld [vmem:[%s10322_s4 + $0x30] sm:$0xff]  ;;  %v3711_v55 = vld [vmem:[%s10322_s4 + $0x38] sm:$0xff] }
 0x83b   :  { %v5933_v58 = vpack.c.bf16 %v3711_v55, %v3710_v34 }
 0x8a1   :  { %v3927_v39 = vpop.xlane.xlu0 %3926 }
 0x8d0   :  { %v3340_v37 = vpop.f32.mrb[20].mxu0  ;;  %v3411_v11 = vpop.f32.mrb[20].mxu1 }
 0x8d1   :  { %v3342_v62 = vpop.f32.mrb[21].mxu0  ;;  %v3413_v49 = vpop.f32.mrb[21].mxu1 }
 0x8d2   :  { %v3420_v45 = vcombine.low %v3340_v37, %v3342_v62  ;;  %v3421_v17 = vcombine.low %v3411_v11, %v3413_v49  ;;  %v3712_v37 = vld [vmem:[%s10322_s4 + $0x40] sm:$0xff]  ;;  %v3713_v11 = vld [vmem:[%s10322_s4 + $0x48] sm:$0xff]  ;;  %v3730_v62 = vld [vmem:[%s10322_s4 + $0xd0] sm:$0xff] }
 0x8d3   :  { %v3731_v49 = vld [vmem:[%s10322_s4 + $0xd8] sm:$0xff] }
 0x8d4   :  { %v3424_v51 = vadd.f32 %v3420_v45, %v10792_v21  ;;  %v3425_v8 = vadd.f32 %v3421_v17, %v10795_v44  ;;  %v5937_v45 = vpack.c.bf16 %v3713_v11, %v3712_v37  ;;  %v5939_v17 = vpack.c.bf16 %v3731_v49, %v3730_v62  ;;  %v3732_v21 = vld [vmem:[%s10322_s4 + $0xe0] sm:$0xff] }
 0x8d5   :  { %v3716_v44 = vld [vmem:[%s10322_s4 + $0x60] sm:$0xff] }
 0x8d6   :  { %v4030_v12 = vmul.f32 -1.442695, %v3424_v51  ;;  %v4031_v27 = vmul.f32 -1.442695, %v3425_v8  ;;  %v3439_v61 = vrot.slane %v3425_v8, 4  ;;  %v3733_v51 = vld [vmem:[%s10322_s4 + $0xe8] sm:$0xff] }
 0x8d7   :  { %v5943_v26 = vpack.c.bf16 %v3733_v51, %v3732_v21  ;;  %v3717_v8 = vld [vmem:[%s10322_s4 + $0x68] sm:$0xff]  ;;  %v3653_v21 = vld [vmem:[#allocation4] sm:$0x3] }
 0x8d8   :  { %6119 = vpow2.f32 %v4030_v12  ;;  %v3734_v12 = vld [vmem:[%s10322_s4 + $0xf0] sm:$0xff] }
 0x8d9   :  { %6121 = vpow2.f32 %v4031_v27  ;;  %v3735_v27 = vld [vmem:[%s10322_s4 + $0xf8] sm:$0xff] }
 0x8da   :  { %6123 = vtanh.f32 %v3439_v61  ;;  %v5945_v61 = vpack.c.bf16 %v3717_v8, %v3716_v44  ;;  %v3647_v44 = vld [vmem:[#allocation4 + $0x6] sm:$0x3]  ;;  %v3643_v8 = vld [vmem:[#allocation4 + $0xa] sm:$0x3] }
 0x8e2   :  { %v6120_v59 = vpop.eup %6119 }
 0x8e3   :  { %v3432_v3 = vadd.f32 1.0, %v6120_v59  ;;  %v6122_v28 = vpop.eup %6121  ;;  %v5947_v59 = vpack.c.bf16 %v3735_v27, %v3734_v12 }
 0x8e4   :  { %v6124_v56 = vpop.eup %6123  ;;  %v3433_v9 = vadd.f32 1.0, %v6122_v28  ;;  %v3719_v28 = vld [vmem:[%s10322_s4 + $0x78] sm:$0xff] }
 0x8e5   :  { %6125 = vrcp.f32 %v3432_v3  ;;  %v3718_v3 = vld [vmem:[%s10322_s4 + $0x70] sm:$0xff] }
 0x8e6   :  { %6127 = vrcp.f32 %v3433_v9 }
 0x8ef   :  { %v6126_v16 = vpop.eup %6125 }
 0x8f0   :  { %v3443_v24 = vrot.slane %v6126_v16, 4  ;;  %v3446_v5 = vmul.f32 %v6126_v16, %v6124_v56  ;;  %v6128_v22 = vpop.eup %6127  ;;  %v5949_v56 = vpack.c.bf16 %v3719_v28, %v3718_v3  ;;  %v3681_v3 = vrot.slane %v3651_v7, 4 }
 0x8f1   :  { %v3687_v28 = vrot.slane %v3653_v21, 2 }
 0x8f2   :  { %v3445_v32 = vmul.f32 %v3443_v24, %v10022_v60  ;;  %v3929_v60 = vmul.f32 0.125, %v3927_v39  ;;  %v10799_v39 = vld [vmem:[#allocation84_spill] sm:$0xff] }
 0x8f4   :  { %v10102_v54 = vadd.f32 %v3446_v5, %v3445_v32  ;;  %v3931_v40 = vmul.f32 %v3930_v36, %v3929_v60  ;;  %v10800_v60 = vld [vmem:[#allocation85_spill] sm:$0xff] }
 0x8f5   :  { %v10801_v36 = vcombine.low %v10799_v39, %v10800_v60 }
 0x8f6   :  { %6129 = vtanh.f32 %v10102_v54  ;;  %v3933_v41 = vsel %vm3932_vm6, %v3931_v40, 0.0 }
 0x8f7   :  { %3934 = vadd.xlane.f32.xlu0 %v3933_v41  ;;  %v3820_v41 = vld [vmem:[%s10324_s6] sm:$0xff] }
 0x900   :  { %v6130_v18 = vpop.eup %6129 }
 0x901   :  { %v3449_v25 = vmul.f32 %v6130_v18, %v6128_v22  ;;  %v10796_v18 = vld [vmem:[#allocation82_spill] sm:$0xff] }
 0x903   :  { %3451 = vst [vmem:[#allocation3 + $0xc] sm:$0x3] %v3449_v25  ;;  %3453 = vst [vmem:[#allocation4 + $0xa] sm:$0xc] %v3449_v25  ;;  %v3455_v63 = vmul.f32 %v3449_v25, %v9643_v31  ;;  %v3454_v46 = vmul.f32 %v3449_v25, %v9640_v30  ;;  %v3720_v31 = vld [vmem:[%s10322_s4 + $0x80] sm:$0xff]  ;;  %v3721_v30 = vld [vmem:[%s10322_s4 + $0x88] sm:$0xff] }
 0x904   :  { %v5919_v35 = vpack.c.bf16 %v3721_v30, %v3720_v31  ;;  %v10797_v25 = vld [vmem:[#allocation83_spill] sm:$0xff]  ;;  %v3821_v31 = vld [vmem:[%s10324_s6 + $0x8] sm:$0xff]  ;;  %v3822_v30 = vld [vmem:[%s10324_s6 + $0x10] sm:$0xff] }
 0x905   :  { %3522 = vmatprep.mubr.f32.mxu0 %v3455_v63  ;;  %3593 = vmatprep.mubr.f32.mxu1 %v3455_v63  ;;  %v10798_v63 = vcombine.low %v10796_v18, %v10797_v25  ;;  %v3663_v18 = vrot.slane %v3643_v8, 4 }
 0x906   :  { %3523 = vmatmul.mubr.f32.vlgmr.msra.gmra.mrb[22].mxu0 %v3454_v46  ;;  %3594 = vmatmul.mubr.f32.vlgmr.msra.gmra.mrb[22].mxu1 %v3454_v46 }
 0x907   :  { %5920 = vmatprep.subr.bf16.mxu0 %v5919_v35  ;;  %v5951_v35 = vpack.c.bf16 %v3821_v31, %v3820_v41 }
 0x908   :  { %5922 = vmatpush3.bf16.msra.mxu0 %v5921_v47  ;;  %v5955_v47 = vpack.c.bf16 %v3823_v38, %v3822_v30 }
 0x909   :  { %5924 = vmatprep.subr.bf16.mxu0 %v5923_v53  ;;  %5952 = vmatprep.subr.bf16.mxu1 %v5951_v35  ;;  %v5959_v53 = vpack.c.bf16 %v3825_v52, %v3824_v50  ;;  %v3946_v50 = vld [vmem:[#allocation6] sm:$0x1] }
 0x90a   :  { %5954 = vmatpush3.bf16.msra.mxu1 %v5951_v35 }
 0x90b   :  { %5956 = vmatprep.subr.bf16.mxu1 %v5955_v47 }
 0x90c   :  { %5926 = vmatpush3.bf16.msra.mxu0 %v5925_v1  ;;  %v5963_v1 = vpack.c.bf16 %v3827_v0, %v3826_v57  ;;  %v3646_v0 = vld [vmem:[#allocation3 + $0x8] sm:$0x3] }
 0x90d   :  { %5928 = vmatprep.subr.bf16.mxu0 %v5927_v14 }
 0x90e   :  { %5958 = vmatpush3.bf16.msra.mxu1 %v5955_v47 }
 0x90f   :  { %5960 = vmatprep.subr.bf16.mxu1 %v5959_v53 }
 0x910   :  { %5930 = vmatpush3.bf16.msra.mxu0 %v5929_v43 }
 0x911   :  { %5932 = vmatprep.subr.bf16.mxu0 %v5931_v4 }
 0x912   :  { %5962 = vmatpush3.bf16.msra.mxu1 %v5959_v53 }
 0x913   :  { %5964 = vmatprep.subr.bf16.mxu1 %v5963_v1 }
 0x914   :  { %5934 = vmatpush3.bf16.msra.mxu0 %v5933_v58 }
 0x915   :  { %5936 = vmatprep.subr.bf16.mxu0 %v5935_v48 }
 0x916   :  { %5966 = vmatpush3.bf16.msra.mxu1 %v5963_v1 }
 0x917   :  { %5968 = vmatprep.subr.bf16.mxu1 %v5967_v15 }
 0x918   :  { %5938 = vmatpush3.bf16.msra.mxu0 %v5937_v45 }
 0x919   :  { %5940 = vmatprep.subr.bf16.mxu0 %v5939_v17  ;;  %v3649_v17 = vld [vmem:[#allocation4 + $0x4] sm:$0x3] }
 0x91a   :  { %5970 = vmatpush3.bf16.msra.mxu1 %v5967_v15  ;;  %v3675_v12 = vrot.slane %v3649_v17, 6 }
 0x91c   :  { %5942 = vmatpush3.bf16.msra.mxu0 %v5941_v19  ;;  %v3641_v19 = vld [vmem:[#allocation4 + $0xc] sm:$0x3] }
 0x91d   :  { %5944 = vmatprep.subr.bf16.mxu0 %v5943_v26  ;;  %v3642_v26 = vld [vmem:[#allocation3 + $0x4] sm:$0x3] }
 0x920   :  { %5946 = vmatpush3.bf16.msra.mxu0 %v5945_v61  ;;  %v3645_v61 = vld [vmem:[#allocation4 + $0x8] sm:$0x3] }
 0x921   :  { %5948 = vmatprep.subr.bf16.mxu0 %v5947_v59  ;;  %v3656_v59 = vrot.slane %v3640_v23, 6 }
 0x924   :  { %5950 = vmatpush3.bf16.msra.mxu0 %v5949_v56  ;;  %v3657_v56 = vrot.slane %v3641_v19, 6 }
 0x984   :  { %v3935_v49 = vpop.xlane.xlu0 %3934 }
 0x985   :  { %v3936_v45 = vrot.slane %v3935_v49, 4 }
 0x987   :  { %v3937_v51 = vadd.f32 %v3936_v45, %v3935_v49 }
 0x989   :  { %v3938_v27 = vrot.slane %v3937_v51, 2 }
 0x9d9   :  { %v3524_v16 = vpop.f32.mrb[22].mxu0  ;;  %v3595_v24 = vpop.f32.mrb[22].mxu1 }
 0x9da   :  { %v3526_v5 = vpop.f32.mrb[23].mxu0  ;;  %v3597_v9 = vpop.f32.mrb[23].mxu1 }
 0x9db   :  { %v3604_v32 = vcombine.low %v3524_v16, %v3526_v5  ;;  %v3605_v22 = vcombine.low %v3595_v24, %v3597_v9  ;;  %v3638_v16 = vld [vmem:[#allocation3] sm:$0x3]  ;;  %v3662_v24 = vrot.slane %v3642_v26, 4  ;;  %v3699_v5 = vsel %vm1808_vm0, %v3647_v44, %v3675_v12  ;;  %v3648_v9 = vld [vmem:[#allocation3 + $0xa] sm:$0x3] }
 0x9dc   :  { %v3690_v41 = vsel %vm1808_vm0, %v3638_v16, %v3656_v59  ;;  %v3701_v31 = vsel %vm3692_vm7, %v3699_v5, %v3681_v3  ;;  %v3674_v30 = vrot.slane %v3648_v9, 6  ;;  %v4034_v26 = vld [vmem:[%s10323_s5] ss:$0 sm:$0xff] }
 0x9dd   :  { %v3608_v46 = vadd.f32 %v3604_v32, %v10798_v63  ;;  %v3609_v40 = vadd.f32 %v3605_v22, %v10801_v36  ;;  %v3939_v32 = vadd.f32 %v3938_v27, %v3937_v51  ;;  %v3650_v63 = vld [vmem:[#allocation3 + $0xc] sm:$0x3]  ;;  %v3693_v38 = vsel %vm3692_vm7, %v3690_v41, %v3662_v24 }
 0x9de   :  { %v3703_v57 = vsel %vm3695_vm8, %v3701_v31, %v3687_v28  ;;  %v3698_v1 = vsel %vm1808_vm0, %v3646_v0, %v3674_v30 }
 0x9df   :  { %v4032_v42 = vmul.f32 -1.442695, %v3608_v46  ;;  %v4033_v13 = vmul.f32 -1.442695, %v3609_v40  ;;  %v3623_v14 = vrot.slane %v3609_v40, 4  ;;  %v3669_v46 = vrot.slane %v3645_v61, 2 }
 0x9e0   :  { %v3940_v36 = vrot.slane %v3939_v32, 1 }
 0x9e1   :  { %6131 = vpow2.f32 %v4032_v42  ;;  %v3680_v42 = vrot.slane %v3650_v63, 4 }
 0x9e2   :  { %6133 = vpow2.f32 %v4033_v13  ;;  %v3941_v47 = vadd.f32 %v3940_v36, %v3939_v32 }
 0x9e3   :  { %6135 = vtanh.f32 %v3623_v14  ;;  %v3700_v2 = vsel %vm3692_vm7, %v3698_v1, %v3680_v42 }
 0x9e4   :  { %6031 = vpush %v3941_v47 }
 0x9e5   :  { %6033 = vpush %v3946_v50 }
 0x9eb   :  { %v6132_v20 = vpop.eup %6131 }
 0x9ec   :  { %v3616_v33 = vadd.f32 1.0, %v6132_v20  ;;  %v6134_v43 = vpop.eup %6133  ;;  %v3830_v20 = vld [vmem:[%s10324_s6 + $0x50] sm:$0xff] }
 0x9ed   :  { %v6136_v4 = vpop.eup %6135  ;;  %v3617_v10 = vadd.f32 1.0, %v6134_v43 }
 0x9ee   :  { %6137 = vrcp.f32 %v3616_v33  ;;  %v3831_v33 = vld [vmem:[%s10324_s6 + $0x58] sm:$0xff] }
 0x9ef   :  { %6139 = vrcp.f32 %v3617_v10  ;;  %v5971_v43 = vpack.c.bf16 %v3831_v33, %v3830_v20  ;;  %v3835_v10 = vld [vmem:[%s10324_s6 + $0x78] sm:$0xff] }
 0x9f1   :  { %5972 = vmatprep.subr.bf16.mxu1 %v5971_v43 }
 0x9f2   :  { %5974 = vmatpush3.bf16.msra.mxu1 %v5971_v43 }
 0x9f8   :  { %v6138_v34 = vpop.eup %6137 }
 0x9f9   :  { %v3627_v55 = vrot.slane %v6138_v34, 4  ;;  %v3630_v29 = vmul.f32 %v6138_v34, %v6136_v4  ;;  %v6140_v37 = vpop.eup %6139  ;;  %v3832_v4 = vld [vmem:[%s10324_s6 + $0x60] sm:$0xff]  ;;  %v3833_v34 = vld [vmem:[%s10324_s6 + $0x68] sm:$0xff] }
 0x9fb   :  { %v3629_v58 = vmul.f32 %v3627_v55, %v10102_v54  ;;  %v3644_v54 = vld [vmem:[#allocation3 + $0x6] sm:$0x3]  ;;  %v5975_v55 = vpack.c.bf16 %v3833_v34, %v3832_v4 }
 0x9fc   :  { %v3668_v25 = vrot.slane %v3644_v54, 2 }
 0x9fd   :  { %v3631_v48 = vadd.f32 %v3630_v29, %v3629_v58  ;;  %5976 = vmatprep.subr.bf16.mxu1 %v5975_v55  ;;  %v3834_v29 = vld [vmem:[%s10324_s6 + $0x70] sm:$0xff]  ;;  %s6231_s6 = smov 0.0  }
 0x9fe   :  { %v3696_v52 = vsel %vm3695_vm8, %v3693_v38, %v3668_v25  ;;  %5978 = vmatpush3.bf16.msra.mxu1 %v5975_v55  ;;  %v5979_v58 = vpack.c.bf16 %v3835_v10, %v3834_v29 }
 0x9ff   :  { %6141 = vtanh.f32 %v3631_v48 }
 0xa00   :  { %5980 = vmatprep.subr.bf16.mxu1 %v5979_v58 }
 0xa02   :  { %5982 = vmatpush3.bf16.msra.mxu1 %v5979_v58 }
 0xa09   :  { %v6142_v11 = vpop.eup %6141 }
 0xa0a   :  { %v3633_v62 = vmul.f32 %v6142_v11, %v6140_v37 }
 0xa0c   :  { %3635 = vst [vmem:[#allocation3 + $0xe] sm:$0x3] %v3633_v62  ;;  %3637 = vst [vmem:[#allocation4 + $0xc] sm:$0xc] %v3633_v62 }
 0xa13   :  { %v3639_v22 = vld [vmem:[#allocation4 + $0xe] sm:$0x3]  ;;  %v3652_v60 = vld [vmem:[#allocation3 + $0xe] sm:$0x3] }
 0xa14   :  { %v3691_v39 = vsel %vm1808_vm0, %v3639_v22, %v3657_v56  ;;  %v3686_v53 = vrot.slane %v3652_v60, 2 }
 0xa15   :  { %v3694_v40 = vsel %vm3692_vm7, %v3691_v39, %v3663_v18  ;;  %s6032_s10 = spop %6031 }
 0xa16   :  { %v3697_v35 = vsel %vm3695_vm8, %v3694_v40, %v3669_v46  ;;  %v3702_v6 = vsel %vm3695_vm8, %v3700_v2, %v3686_v53  ;;  %s10255_s2 = smul.f32 0.5, %s6032_s10  ;;  %s6034_s8 = spop %6033 }
 0xa17   :  { %3807 = vmatprep.mubr.f32.mxu0 %v3697_v35  ;;  %s3948_s30 = smax.f32 %s6231_s6, %s6034_s8  ;;  %s6232_s10 = smov [#allocation9]  }
 0xa18   :  { %3808 = vmatmul.mubr.f32.vlgmr.msra.gmra.mrb[24].mxu0 %v3696_v52  ;;  %s3952_s20 = sand.u32 2147483647, %s10255_s2  ;;  %s3950_s15 = smul.f32 %s3948_s30, %s10255_s2  ;;  %v3970_v21 = vstv %s10255_s2 }
 0xa19   :  { %3812 = vmatprep.mubr.f32.mxu0 %v3703_v57  ;;  %s3953_s21 = ssub.f32 0.0, %s3952_s20  ;;  %s3949_s0 = smax.f32 %s6231_s6, %s10255_s2  ;;  %3972 = vst.msk [vmem:[#allocation9] sm:$0x1] %vm3971_vm10, %v3970_v21 }
 0xa1a   :  { %s3951_s16 = ssub.f32 %s3949_s0, %s3950_s15  ;;  %s3993_s2 = sshll.u32 %s6232_s10, 4  ;;  %s3994_s2 = int_to_ptr.vmem [resolvable:$true] %s3993_s2 }
 0xa1b   :  { %v3954_v13 = vstv %s3953_s21  ;;  %s6159_s20 = scalar_lea.vmem %s3994_s2, 16  ;;  %s6163_s21 = scalar_lea.vmem %s3994_s2, 32 }
 0xa1c   :  { %3813 = vmatmul.mubr.f32.gmra.mrb[26].mxu0 %v3702_v6  ;;  %v3955_v14 = vmul.f32 1.442695, %v3954_v13  ;;  %p6160_p0 = scmp.ne.s32.totalorder %s3994_s2, %s6159_s20  ;;  %p6164_p1 = scmp.lt.s32.totalorder %s3994_s2, %s3994_s2 }
 0xa1d   :  { %p6165_p2 = scmp.lt.s32.totalorder %s6163_s21, %s6159_s20 }
 0xa1e   :  { %6143 = vpow2.f32 %v3955_v14 }
 0xa1f   :  { %p6166_p3 = por %p6165_p2, %p6164_p1 }
 0xa21   :  { %p6167_p4 = pnand %p6166_p3, %p6160_p0 }
 0xa28   :  { %v6144_v15 = vpop.eup %6143 }
 0xa29   :  { %6035 = vpush %v6144_v15 }
 0xa5a   :  { %s6036_s9 = spop %6035 }
 0xa5b   :  { %v3958_v48 = vstv %s6036_s9 }
 0xa5c   :  { %v3959_v37 = vadd.f32 1.0, %v3958_v48  ;;  %v3962_v11 = vmul.f32 -0.5, %v3958_v48  ;;  %v3965_v49 = vand.u32 2147483647, %v3958_v48 }
 0xa5e   :  { %6145 = vlog2.f32 %v3959_v37  ;;  %v3963_v62 = vadd.f32 1.0, %v3962_v11  ;;  %vm3966_vm9 = vcmp.lt.f32.partialorder %v3965_v49, 0.0004427343 }
 0xa60   :  { %v3964_v45 = vmul.f32 %v3963_v62, %v3958_v48 }
 0xa68   :  { %v6146_v17 = vpop.eup %6145 }
 0xa69   :  { %v3961_v23 = vmul.f32 0.6931472, %v6146_v17 }
 0xa6b   :  { %v3967_v7 = vsel %vm3966_vm9, %v3964_v45, %v3961_v23 }
 0xa6c   :  { %6037 = vpush %v3967_v7 }
 0xa9d   :  { %s6038_s17 = spop %6037 }
 0xa9e   :  { %s3969_s18 = sadd.f32 %s6038_s17, %s3951_s16 }
 0xaa0   :  { %v3973_v51 = vstv %s3969_s18 }
 0xaa1   :  { %3974 = vst.msk [vmem:[#allocation11] sm:$0x1] %vm3971_vm10, %v3973_v51 }
 0xaeb   :  { %v4068_v19 = vpop.f32.mrb[24].mxu0 }
 0xaec   :  { %v4069_v44 = vpop.f32.mrb[25].mxu0 }
 0xaed   :  { %v4070_v8 = vadd.f32 %v4069_v44, %v4068_v19 }
 0xaef   :  { %v3810_v54 = vadd.f32 %v4070_v8, %v4034_v26  ;;  %v4071_v12 = vpop.f32.mrb[26].mxu0 }
 0xaf0   :  { %v4072_v27 = vpop.f32.mrb[27].mxu0 }
 0xaf1   :  { %v3818_v61 = vmax.f32 %v3810_v54, 0.0  ;;  %v4073_v59 = vadd.f32 %v4072_v27, %v4071_v12 }
 0xaf3   :  { %v3815_v3 = vadd.f32 %v4073_v59, %v4034_v26  ;;  %4124 = vmatprep.mubr.f32.mxu1 %v3818_v61 }
 0xaf5   :  { %v3819_v28 = vmax.f32 %v3815_v3, 0.0 }
 0xaf7   :  { %4125 = vmatmul.mubr.f32.vlgmr.msra.gmra.mrb[24].mxu1 %v3819_v28 }
 0xaf8   :  { %6170 = shalt.err (!%p6167_p4)
}
 0xaf9   :  { %s6171_s7 = scalar_lea.hbm %s10330_s13, 16 }
 0xafa   :  { %p6172_p5 = scmp.ne.s32.totalorder %s10330_s13, %s6171_s7  ;;  %p6175_p6 = scmp.lt.u32.totalorder %s6171_s7, %s10330_s13 }
 0xafc   :  { %p6177_p7 = pnand %p6175_p6, %p6172_p5 }
 0xafe   :  { %6180 = shalt.err (!%p6177_p7)
}
 0xaff   :  { %3996 = dma.vmem_to_hbm [thread:$0]  %s3994_s2, 16, %s10330_s13, [#allocation10]  }
 0xb00   :  { %s6233_s3 = smov [#allocation11]  }
 0xb01   :  { %s4003_s27 = sshll.u32 %s6233_s3, 4  ;;  %s4004_s27 = int_to_ptr.vmem [resolvable:$true] %s4003_s27 }
 0xb02   :  { %s6181_s28 = scalar_lea.vmem %s4004_s27, 16  ;;  %s6185_s29 = scalar_lea.vmem %s4004_s27, 32 }
 0xb03   :  { %p6182_p8 = scmp.ne.s32.totalorder %s4004_s27, %s6181_s28  ;;  %p6186_p9 = scmp.lt.s32.totalorder %s4004_s27, %s4004_s27 }
 0xb04   :  { %p6187_p10 = scmp.lt.s32.totalorder %s6185_s29, %s6181_s28 }
 0xb06   :  { %p6188_p11 = por %p6187_p10, %p6186_p9 }
 0xb08   :  { %p6189_p12 = pnand %p6188_p11, %p6182_p8 }
 0xb0a   :  { %6192 = shalt.err (!%p6189_p12)
}
 0xb0b   :  { %s6193_s6 = scalar_lea.hbm %s10331_s14, 16 }
 0xb0c   :  { %p6194_p13 = scmp.ne.s32.totalorder %s10331_s14, %s6193_s6  ;;  %p6197_p0 = scmp.lt.u32.totalorder %s6193_s6, %s10331_s14 }
 0xb0e   :  { %p6199_p1 = pnand %p6197_p0, %p6194_p13 }
 0xb10   :  { %6202 = shalt.err (!%p6199_p1)
}
 0xb11   :  { %4006 = dma.vmem_to_hbm [thread:$0]  %s4004_s27, 16, %s10331_s14, [#allocation10]   ;;  %v4035_v56 = vld [vmem:[#allocation5] ss:$0 sm:$0xff]  ;;  %vm3918_vm11 = vcmask 7168  }
 0xb12   :  { %s6234_s18 = smov [#allocation7]  }
 0xb13   :  { %s3980_s1 = sshll.u32 %s6234_s18, 4  ;;  %s3981_s1 = int_to_ptr.vmem [resolvable:$true] %s3980_s1 }
 0xb14   :  { %s6203_s19 = scalar_lea.vmem %s3981_s1, 256  ;;  %p6208_p3 = scmp.lt.s32.totalorder %s3981_s1, %s3981_s1 }
 0xb15   :  { %p6204_p2 = scmp.ne.s32.totalorder %s3981_s1, %s6203_s19  ;;  %p6209_p4 = scmp.lt.s32.totalorder %s6203_s19, %s6203_s19 }
 0xb17   :  { %p6210_p5 = por %p6209_p4, %p6208_p3 }
 0xb19   :  { %p6211_p6 = pnand %p6210_p5, %p6204_p2 }
 0xbca   :  { %v4126_v16 = vpop.f32.mrb[24].mxu1 }
 0xbcb   :  { %v3915_v24 = vadd.f32 %v4126_v16, %v4035_v56  ;;  %v3909_v5 = vpop.f32.mrb[25].mxu1 }
 0xbcc   :  { %v3910_v9 = vadd.f32 %v4035_v56, %v3909_v5 }
 0xbcd   :  { %3920 = vst.msk [vmem:[#allocation7 + $0x8] sm:$0xff] %vm3918_vm11, %v3915_v24 }
 0xbce   :  { %3919 = vst.msk [vmem:[#allocation7] sm:$0xff] %vm3918_vm11, %v3910_v9 }
 0xbcf   :  { %6214 = shalt.err (!%p6211_p6)
}
 0xbd0   :  { %s6215_s2 = scalar_lea.hbm %s10329_s12, 256 }
 0xbd1   :  { %p6216_p7 = scmp.ne.s32.totalorder %s10329_s12, %s6215_s2  ;;  %p6219_p8 = scmp.lt.u32.totalorder %s6215_s2, %s10329_s12 }
 0xbd3   :  { %p6221_p9 = pnand %p6219_p8, %p6216_p7 }
 0xbd5   :  { %6224 = shalt.err (!%p6221_p9)
}
 0xbd6   :  { %s6235_s7 = smov 128   ;;  %s6236_s23 = smov 8  }
 0xbd7   :  { %3986 = dma.vmem_to_hbm [thread:$0]  %s3981_s1, 256, %s10329_s12, [#allocation8], %s6235_s7, %s6235_s7, %s6236_s23  }
 0xbd8   :  { %6225 = dma.done.wait [#allocation8], 256  }
 0xbd9   :  { %6226 = vsyncadd [#allocation8], 4294967040 }
 0xbda   :  { %6227 = dma.done.wait [#allocation10], 32  }
 0xbdb   :  { %6228 = vsyncadd [#allocation10], 4294967264 }
 0xbdc   :  { %4016 = vsyncpa [#allocation8], 1 }
 0xbdd   :  { %4017 = vsyncpa [#allocation10], 1 }

</bundles_post_ra>
